<compile_context>
chip_gen: v5e
topology: v5e:2x2
jax: 0.10.0
libtpu: 0.0.40
codegen_flags: <defaults>
</compile_context>

<pallas_src>
import jax
import jax.numpy as jnp
import numpy as np
from jax import lax
from jax.experimental import pallas as pl
from jax.experimental.pallas import tpu as pltpu

EPS = 1e-5  # BatchNorm1d default eps


# ---------------------------------------------------------------------------
# Fused kernel
# ---------------------------------------------------------------------------
def _icassp2cnn_kernel(lens_ref, scal_ref, xp_ref, w1_ref, w2_ref,
                       gamma_ref, beta_ref, wih0_ref, b0_ref,
                       whh0_ref, w1cat_ref, b1_ref,
                       wlin_ref, blin_ref, out_ref, gates_scr):
    """xp: ((T+4)*BP, E) time-major, time-padded by 2 each side, batch padded
    to BP (multiple of 8), flattened over (time, batch).  w1/w2: (3|5, E, E)
    conv taps.  wih0: (2E, 4H).  whh0: (H, 4H) f32.  w1cat: (2H, 4H) f32 =
    [wih1; whh1].  lens: (BP, 1) int32.  scal: SMEM int32[2] = [max(lengths),
    real batch B].  out: (BP, LP) lane-padded logits.  gates_scr: (T*BP, 4H)
    f32 hoisted layer-0 gate pre-activations."""
    BP = lens_ref.shape[0]
    TB, H4 = gates_scr.shape
    T = TB // BP
    H = H4 // 4
    E = w1_ref.shape[1]
    cdt = xp_ref.dtype

    # ---- fused conv: skip the zero-padded taps of the k=3 branch -----------
    def tap(w_ref, k, time_off):
        return jnp.dot(xp_ref[pl.ds((k + time_off) * BP, TB), :], w_ref[k],
                       preferred_element_type=jnp.float32)

    acc_lo = tap(w1_ref, 0, 1)                 # k=3 conv (pad=1) -> first E ch
    for k in range(1, 3):
        acc_lo = acc_lo + tap(w1_ref, k, 1)
    acc_hi = tap(w2_ref, 0, 0)                 # k=5 conv (pad=2) -> last E ch
    for k in range(1, 5):
        acc_hi = acc_hi + tap(w2_ref, k, 0)
    # Conv biases intentionally dropped: training-mode BN subtracts the batch
    # mean, which cancels a per-channel constant exactly.  This also keeps the
    # padded batch rows at exact zero so they do not perturb the BN statistics.

    # ---- training-mode BatchNorm + ReLU; stats reduced on the MXU ----------
    nreal = scal_ref[1]                                   # real batch size
    inv_n = 1.0 / (T * nreal).astype(jnp.float32)
    ones8 = jnp.ones((8, TB), jnp.float32)
    gamma = gamma_ref[...]
    beta = beta_ref[...]

    def bn_relu(acc, g, b):
        s1 = jnp.dot(ones8, acc, preferred_element_type=jnp.float32)[0:1, :]
        s2 = jnp.dot(ones8, acc * acc, preferred_element_type=jnp.float32)[0:1, :]
        mean = s1 * inv_n
        var = s2 * inv_n - mean * mean
        scale = g * lax.rsqrt(var + EPS)
        shift = b - mean * scale
        return jnp.maximum(acc * scale + shift, 0.0)

    feat_lo = bn_relu(acc_lo, gamma[:, :E], beta[:, :E])
    feat_hi = bn_relu(acc_hi, gamma[:, E:], beta[:, E:])

    # ---- hoisted layer-0 input projection (one big MXU pass) ---------------
    gates_scr[...] = (
        jnp.dot(feat_lo.astype(cdt), wih0_ref[pl.ds(0, E), :],
                preferred_element_type=jnp.float32)
        + jnp.dot(feat_hi.astype(cdt), wih0_ref[pl.ds(E, E), :],
                  preferred_element_type=jnp.float32)
        + b0_ref[...])

    # ---- wavefront LSTM recurrence ------------------------------------------
    lens = lens_ref[...]                        # (BP, 1) int32, hoisted

    def lstm_act(g, c_prev):
        i = jax.nn.sigmoid(g[:, 0 * H:1 * H])   # PyTorch gate order i, f, g, o
        f = jax.nn.sigmoid(g[:, 1 * H:2 * H])
        gg = jnp.tanh(g[:, 2 * H:3 * H])
        o = jax.nn.sigmoid(g[:, 3 * H:4 * H])
        c = f * c_prev + i * gg
        return o * jnp.tanh(c), c

    def step0(t, h0, c0):
        row = t * BP
        if not isinstance(row, int):
            row = pl.multiple_of(row, BP)
        g = gates_scr[pl.ds(row, BP), :] + jnp.dot(
            h0, whh0_ref[...], preferred_element_type=jnp.float32)
        return lstm_act(g, c0)
        # No length masking for layer 0: a layer-0 state at a padded step only
        # ever feeds layer-1 steps that are themselves masked out.

    def step1(t, h0_in, h1, c1):
        hx = jnp.concatenate([h0_in, h1], axis=-1)            # (BP, 2H)
        g = jnp.dot(hx, w1cat_ref[...],
                    preferred_element_type=jnp.float32) + b1_ref[...]
        h_new, c_new = lstm_act(g, c1)
        valid = lens > t                                       # packed-seq mask
        return jnp.where(valid, h_new, h1), jnp.where(valid, c_new, c1)

    n_steps = scal_ref[0]                       # max(lengths), from SMEM
    zero = jnp.zeros((BP, H), jnp.float32)

    h0, c0 = step0(0, zero, zero)               # prologue: layer-0 step 0

    def wave(s, carry):
        h0, c0, h1, c1 = carry
        # Layer-1 step s-1 and layer-0 step s are independent -> co-issue.
        h1n, c1n = step1(s - 1, h0, h1, c1)
        h0n, c0n = step0(s, h0, c0)
        return (h0n, c0n, h1n, c1n)

    h0, c0, h1, c1 = lax.fori_loop(1, n_steps, wave, (h0, c0, zero, zero))
    h1, c1 = step1(n_steps - 1, h0, h1, c1)     # epilogue: last layer-1 step

    # ---- head: lane-padded logits (sliced back to L in the wrapper) --------
    out_ref[...] = (jnp.dot(h1, wlin_ref[...], preferred_element_type=jnp.float32)
                    + blin_ref[...]).astype(out_ref.dtype)


# ---------------------------------------------------------------------------
# Wrapper
# ---------------------------------------------------------------------------
def icassp2cnn_forward(x, lengths, params, *, compute_dtype=jnp.bfloat16):
    """x: (T, B, E) float time-major, lengths: (B,) int32 (descending)."""
    T, B, E = x.shape
    H = params["whh0"].shape[0]
    L = params["wlin"].shape[1]
    LP = ((L + 127) // 128) * 128          # lane-dense head output
    BP = ((B + 7) // 8) * 8                # sublane-dense batch
    cdt = compute_dtype

    # Time-major conv input: pad 2 frames each side, zero-pad batch to BP,
    # flatten (time, batch) rows.  Pad rows stay exactly zero through the conv.
    xp_flat = jnp.pad(x, ((2, 2), (0, BP - B), (0, 0))).reshape(
        (T + 4) * BP, E).astype(cdt)

    lens_p = jnp.pad(lengths.astype(jnp.int32), (0, BP - B)).reshape(BP, 1)
    max_len = jnp.clip(jnp.max(lengths).astype(jnp.int32), 1, T)
    scalars = jnp.stack([max_len, jnp.asarray(B, jnp.int32)])

    # Throughput-bound (hoisted) matmul weights in compute_dtype; the
    # latency-bound recurrent weights and all accumulators stay f32.
    w1 = params["w1"].astype(cdt)
    w2 = params["w2"].astype(cdt)
    wih0 = params["wih0"].astype(cdt)
    whh0 = params["whh0"].astype(jnp.float32)
    w1cat = jnp.concatenate([params["wih1"], params["whh1"]],
                            axis=0).astype(jnp.float32)
    wlin_p = jnp.pad(params["wlin"], ((0, 0), (0, LP - L))).astype(jnp.float32)
    blin_p = jnp.pad(params["blin"], ((0, 0), (0, LP - L))).astype(jnp.float32)
    gamma = params["gamma"].astype(jnp.float32)
    beta = params["beta"].astype(jnp.float32)
    b0 = params["bl0"].astype(jnp.float32)
    b1 = params["bl1"].astype(jnp.float32)

    # Scoped-VMEM limit sized from the resident buffers (+ headroom for the
    # conv/feat/gates temporaries).
    def nbytes(a):
        return a.size * jnp.dtype(a.dtype).itemsize
    resident = sum(nbytes(a) for a in
                   (xp_flat, w1, w2, wih0, whh0, w1cat, wlin_p))
    resident += T * BP * 4 * H * 4 + BP * LP * 4      # gates scratch + out
    vmem_limit = int(min(max(4 * resident + (16 << 20), 32 << 20), 112 << 20))

    vmem = pl.BlockSpec(memory_space=pltpu.MemorySpace.VMEM)
    smem = pl.BlockSpec(memory_space=pltpu.MemorySpace.SMEM)

    # TODO(synk): at production shapes (E=640, H=512, long T) this all-resident
    #             design must become a (T*B)-row-tiled pipeline: streaming BN,
    #             double-buffered BlockSpecs, a "parallel" axis for the v7x
    #             second TensorCore, pl.ANY + manual DMA so the conv/projection
    #             weights are reclaimed during the recurrence, and a bf16 gates
    #             scratch to halve the v5e vst traffic.
    logits_p = pl.pallas_call(
        _icassp2cnn_kernel,
        out_shape=jax.ShapeDtypeStruct((BP, LP), jnp.float32),
        in_specs=[vmem, smem] + [vmem] * 12,
        out_specs=vmem,
        scratch_shapes=[pltpu.VMEM((T * BP, 4 * H), jnp.float32)],
        compiler_params=pltpu.CompilerParams(vmem_limit_bytes=vmem_limit),
    )(lens_p, scalars, xp_flat, w1, w2, gamma, beta, wih0, b0,
      whh0, w1cat, b1, wlin_p, blin_p)
    return logits_p[:B, :L]


# ---------------------------------------------------------------------------
# Pure-JAX reference (unfused, two-pass BN, conv biases kept, both LSTM layers
# masked) — validates that every optimization is semantics-preserving.
# ---------------------------------------------------------------------------
def reference_forward(x, lengths, params):
    T, B, E = x.shape
    xb = jnp.transpose(x, (1, 0, 2)).astype(jnp.float32)
    xp = jnp.pad(xb, ((0, 0), (2, 2), (0, 0)))

    def conv(w, b, off):
        K = w.shape[0]
        acc = jnp.zeros((B, T, E), jnp.float32) + b
        for k in range(K):
            acc = acc + jnp.einsum("bte,eo->bto", xp[:, off + k:off + k + T, :], w[k])
        return acc

    cat = jnp.concatenate([conv(params["w1"], params["b1"], 1),
                           conv(params["w2"], params["b2"], 0)], axis=-1)
    cat2 = cat.reshape(B * T, 2 * E)
    mean = jnp.mean(cat2, axis=0, keepdims=True)
    var = jnp.mean((cat2 - mean) ** 2, axis=0, keepdims=True)
    y = jnp.maximum((cat2 - mean) * lax.rsqrt(var + EPS) * params["gamma"]
                    + params["beta"], 0.0).reshape(B, T, 2 * E)

    H = params["whh0"].shape[0]
    h0 = c0 = h1 = c1 = jnp.zeros((B, H), jnp.float32)

    def cell(xt, h, c, wih, whh, bias):
        g = xt @ wih + h @ whh + bias
        i = jax.nn.sigmoid(g[:, :H])
        f = jax.nn.sigmoid(g[:, H:2 * H])
        gg = jnp.tanh(g[:, 2 * H:3 * H])
        o = jax.nn.sigmoid(g[:, 3 * H:])
        c_new = f * c + i * gg
        return o * jnp.tanh(c_new), c_new

    lens = lengths.reshape(B, 1)
    for t in range(T):
        m = lens > t
        h0n, c0n = cell(y[:, t, :], h0, c0, params["wih0"], params["whh0"], params["bl0"])
        h0 = jnp.where(m, h0n, h0)
        c0 = jnp.where(m, c0n, c0)
        h1n, c1n = cell(h0, h1, c1, params["wih1"], params["whh1"], params["bl1"])
        h1 = jnp.where(m, h1n, h1)
        c1 = jnp.where(m, c1n, c1)
    return h1 @ params["wlin"] + params["blin"]


if __name__ == "__main__":
    # Small shapes consistent with the module: embed_size=E, hidden_size=H,
    # num_lstm_layers=2, bidirectional=False, label_size=31.
    E, H, L = 128, 128, 31
    T, B = 8, 4
    s = 0.05

    key = jax.random.PRNGKey(0)
    ks = jax.random.split(key, 16)
    params = {
        # Conv1d(E, E, 3).weight stored as (K, C_in, C_out); bias as (1, E)
        "w1":    jax.random.normal(ks[0], (3, E, E), jnp.float32) * s,
        "b1":    jax.random.normal(ks[1], (1, E), jnp.float32) * s,
        # Conv1d(E, E, 5)
        "w2":    jax.random.normal(ks[2], (5, E, E), jnp.float32) * s,
        "b2":    jax.random.normal(ks[3], (1, E), jnp.float32) * s,
        # BatchNorm1d(2E) affine params
        "gamma": jax.random.normal(ks[4], (1, 2 * E), jnp.float32) * s + 1.0,
        "beta":  jax.random.normal(ks[5], (1, 2 * E), jnp.float32) * s,
        # LSTM layer 0: W_ih (2E,4H), W_hh (H,4H), combined bias (1,4H)
        "wih0":  jax.random.normal(ks[6], (2 * E, 4 * H), jnp.float32) * s,
        "whh0":  jax.random.normal(ks[7], (H, 4 * H), jnp.float32) * s,
        "bl0":   jax.random.normal(ks[8], (1, 4 * H), jnp.float32) * s,
        # LSTM layer 1: W_ih (H,4H), W_hh (H,4H), combined bias (1,4H)
        "wih1":  jax.random.normal(ks[9], (H, 4 * H), jnp.float32) * s,
        "whh1":  jax.random.normal(ks[10], (H, 4 * H), jnp.float32) * s,
        "bl1":   jax.random.normal(ks[11], (1, 4 * H), jnp.float32) * s,
        # Linear(H, 31)
        "wlin":  jax.random.normal(ks[12], (H, L), jnp.float32) * s,
        "blin":  jax.random.normal(ks[13], (1, L), jnp.float32) * s,
    }

    x = jax.random.normal(ks[14], (T, B, E), jnp.float32)
    # pack_padded_sequence requires descending lengths (enforce_sorted default)
    lengths = jnp.array([8, 6, 5, 3], jnp.int32)

    fwd = jax.jit(icassp2cnn_forward, static_argnames=("compute_dtype",))
    logits = jax.block_until_ready(fwd(x, lengths, params))            # bf16 path
    logits_f32 = jax.block_until_ready(
        fwd(x, lengths, params, compute_dtype=jnp.float32))            # f32 check

    ref = reference_forward(x, lengths, params)
    assert logits.shape == (B, L)
    # f32 kernel path: tight check against the unfused f32 reference.
    np.testing.assert_allclose(np.asarray(logits_f32), np.asarray(ref),
                               rtol=2e-3, atol=2e-3)
    # bf16 weights / f32 accumulation path: bf16-appropriate tolerance.
    np.testing.assert_allclose(np.asarray(logits), np.asarray(ref),
                               rtol=1e-2, atol=1e-2)
    print("KERNEL_OK")
</pallas_src>

<mosaic_0001>
module attributes {stable_mosaic.version = 11 : i64} {
  func.func @_icassp2cnn_kernel(%arg0: memref<8x1xi32, #tpu.memory_space<vmem>>, %arg1: memref<2xi32, #tpu.memory_space<smem>>, %arg2: memref<96x128xbf16, #tpu.memory_space<vmem>>, %arg3: memref<3x128x128xbf16, #tpu.memory_space<vmem>>, %arg4: memref<5x128x128xbf16, #tpu.memory_space<vmem>>, %arg5: memref<1x256xf32, #tpu.memory_space<vmem>>, %arg6: memref<1x256xf32, #tpu.memory_space<vmem>>, %arg7: memref<256x512xbf16, #tpu.memory_space<vmem>>, %arg8: memref<1x512xf32, #tpu.memory_space<vmem>>, %arg9: memref<128x512xf32, #tpu.memory_space<vmem>>, %arg10: memref<256x512xf32, #tpu.memory_space<vmem>>, %arg11: memref<1x512xf32, #tpu.memory_space<vmem>>, %arg12: memref<128x128xf32, #tpu.memory_space<vmem>>, %arg13: memref<1x128xf32, #tpu.memory_space<vmem>>, %arg14: memref<8x128xf32, #tpu.memory_space<vmem>>, %arg15: memref<64x512xf32, #tpu.memory_space<vmem>>) attributes {dimension_semantics = [], scalar_prefetch = 0 : i64, scratch_operands = 1 : i64, tpu.core_type = #tpu.core_type<tc>} {
    %c8 = arith.constant 8 : index
    %c0 = arith.constant 0 : index
    %0 = vector.load %arg2[%c8, %c0] : memref<96x128xbf16, #tpu.memory_space<vmem>>, vector<64x128xbf16>
    %c0_0 = arith.constant 0 : index
    %c0_1 = arith.constant 0 : index
    %c0_2 = arith.constant 0 : index
    %1 = vector.load %arg3[%c0_0, %c0_1, %c0_2] : memref<3x128x128xbf16, #tpu.memory_space<vmem>>, vector<1x128x128xbf16>
    %2 = vector.shape_cast %1 : vector<1x128x128xbf16> to vector<128x128xbf16>
    %cst = arith.constant dense<0.000000e+00> : vector<64x128xf32>
    %3 = tpu.matmul %0, %2, %cst {dimension_numbers = #tpu.dot_dimension_numbers<[1], [0], [0], [1], [0, 0, 1, 1], [], []>} : vector<64x128xbf16>, vector<128x128xbf16>, vector<64x128xf32> -> vector<64x128xf32>
    %c16 = arith.constant 16 : index
    %c0_3 = arith.constant 0 : index
    %4 = vector.load %arg2[%c16, %c0_3] : memref<96x128xbf16, #tpu.memory_space<vmem>>, vector<64x128xbf16>
    %c1 = arith.constant 1 : index
    %c0_4 = arith.constant 0 : index
    %c0_5 = arith.constant 0 : index
    %5 = vector.load %arg3[%c1, %c0_4, %c0_5] : memref<3x128x128xbf16, #tpu.memory_space<vmem>>, vector<1x128x128xbf16>
    %6 = vector.shape_cast %5 : vector<1x128x128xbf16> to vector<128x128xbf16>
    %cst_6 = arith.constant dense<0.000000e+00> : vector<64x128xf32>
    %7 = tpu.matmul %4, %6, %cst_6 {dimension_numbers = #tpu.dot_dimension_numbers<[1], [0], [0], [1], [0, 0, 1, 1], [], []>} : vector<64x128xbf16>, vector<128x128xbf16>, vector<64x128xf32> -> vector<64x128xf32>
    %8 = arith.addf %3, %7 : vector<64x128xf32>
    %c24 = arith.constant 24 : index
    %c0_7 = arith.constant 0 : index
    %9 = vector.load %arg2[%c24, %c0_7] : memref<96x128xbf16, #tpu.memory_space<vmem>>, vector<64x128xbf16>
    %c2 = arith.constant 2 : index
    %c0_8 = arith.constant 0 : index
    %c0_9 = arith.constant 0 : index
    %10 = vector.load %arg3[%c2, %c0_8, %c0_9] : memref<3x128x128xbf16, #tpu.memory_space<vmem>>, vector<1x128x128xbf16>
    %11 = vector.shape_cast %10 : vector<1x128x128xbf16> to vector<128x128xbf16>
    %cst_10 = arith.constant dense<0.000000e+00> : vector<64x128xf32>
    %12 = tpu.matmul %9, %11, %cst_10 {dimension_numbers = #tpu.dot_dimension_numbers<[1], [0], [0], [1], [0, 0, 1, 1], [], []>} : vector<64x128xbf16>, vector<128x128xbf16>, vector<64x128xf32> -> vector<64x128xf32>
    %13 = arith.addf %8, %12 : vector<64x128xf32>
    %c0_11 = arith.constant 0 : index
    %c0_12 = arith.constant 0 : index
    %14 = vector.load %arg2[%c0_11, %c0_12] : memref<96x128xbf16, #tpu.memory_space<vmem>>, vector<64x128xbf16>
    %c0_13 = arith.constant 0 : index
    %c0_14 = arith.constant 0 : index
    %c0_15 = arith.constant 0 : index
    %15 = vector.load %arg4[%c0_13, %c0_14, %c0_15] : memref<5x128x128xbf16, #tpu.memory_space<vmem>>, vector<1x128x128xbf16>
    %16 = vector.shape_cast %15 : vector<1x128x128xbf16> to vector<128x128xbf16>
    %cst_16 = arith.constant dense<0.000000e+00> : vector<64x128xf32>
    %17 = tpu.matmul %14, %16, %cst_16 {dimension_numbers = #tpu.dot_dimension_numbers<[1], [0], [0], [1], [0, 0, 1, 1], [], []>} : vector<64x128xbf16>, vector<128x128xbf16>, vector<64x128xf32> -> vector<64x128xf32>
    %c8_17 = arith.constant 8 : index
    %c0_18 = arith.constant 0 : index
    %18 = vector.load %arg2[%c8_17, %c0_18] : memref<96x128xbf16, #tpu.memory_space<vmem>>, vector<64x128xbf16>
    %c1_19 = arith.constant 1 : index
    %c0_20 = arith.constant 0 : index
    %c0_21 = arith.constant 0 : index
    %19 = vector.load %arg4[%c1_19, %c0_20, %c0_21] : memref<5x128x128xbf16, #tpu.memory_space<vmem>>, vector<1x128x128xbf16>
    %20 = vector.shape_cast %19 : vector<1x128x128xbf16> to vector<128x128xbf16>
    %cst_22 = arith.constant dense<0.000000e+00> : vector<64x128xf32>
    %21 = tpu.matmul %18, %20, %cst_22 {dimension_numbers = #tpu.dot_dimension_numbers<[1], [0], [0], [1], [0, 0, 1, 1], [], []>} : vector<64x128xbf16>, vector<128x128xbf16>, vector<64x128xf32> -> vector<64x128xf32>
    %22 = arith.addf %17, %21 : vector<64x128xf32>
    %c16_23 = arith.constant 16 : index
    %c0_24 = arith.constant 0 : index
    %23 = vector.load %arg2[%c16_23, %c0_24] : memref<96x128xbf16, #tpu.memory_space<vmem>>, vector<64x128xbf16>
    %c2_25 = arith.constant 2 : index
    %c0_26 = arith.constant 0 : index
    %c0_27 = arith.constant 0 : index
    %24 = vector.load %arg4[%c2_25, %c0_26, %c0_27] : memref<5x128x128xbf16, #tpu.memory_space<vmem>>, vector<1x128x128xbf16>
    %25 = vector.shape_cast %24 : vector<1x128x128xbf16> to vector<128x128xbf16>
    %cst_28 = arith.constant dense<0.000000e+00> : vector<64x128xf32>
    %26 = tpu.matmul %23, %25, %cst_28 {dimension_numbers = #tpu.dot_dimension_numbers<[1], [0], [0], [1], [0, 0, 1, 1], [], []>} : vector<64x128xbf16>, vector<128x128xbf16>, vector<64x128xf32> -> vector<64x128xf32>
    %27 = arith.addf %22, %26 : vector<64x128xf32>
    %c24_29 = arith.constant 24 : index
    %c0_30 = arith.constant 0 : index
    %28 = vector.load %arg2[%c24_29, %c0_30] : memref<96x128xbf16, #tpu.memory_space<vmem>>, vector<64x128xbf16>
    %c3 = arith.constant 3 : index
    %c0_31 = arith.constant 0 : index
    %c0_32 = arith.constant 0 : index
    %29 = vector.load %arg4[%c3, %c0_31, %c0_32] : memref<5x128x128xbf16, #tpu.memory_space<vmem>>, vector<1x128x128xbf16>
    %30 = vector.shape_cast %29 : vector<1x128x128xbf16> to vector<128x128xbf16>
    %cst_33 = arith.constant dense<0.000000e+00> : vector<64x128xf32>
    %31 = tpu.matmul %28, %30, %cst_33 {dimension_numbers = #tpu.dot_dimension_numbers<[1], [0], [0], [1], [0, 0, 1, 1], [], []>} : vector<64x128xbf16>, vector<128x128xbf16>, vector<64x128xf32> -> vector<64x128xf32>
    %32 = arith.addf %27, %31 : vector<64x128xf32>
    %c32 = arith.constant 32 : index
    %c0_34 = arith.constant 0 : index
    %33 = vector.load %arg2[%c32, %c0_34] : memref<96x128xbf16, #tpu.memory_space<vmem>>, vector<64x128xbf16>
    %c4 = arith.constant 4 : index
    %c0_35 = arith.constant 0 : index
    %c0_36 = arith.constant 0 : index
    %34 = vector.load %arg4[%c4, %c0_35, %c0_36] : memref<5x128x128xbf16, #tpu.memory_space<vmem>>, vector<1x128x128xbf16>
    %35 = vector.shape_cast %34 : vector<1x128x128xbf16> to vector<128x128xbf16>
    %cst_37 = arith.constant dense<0.000000e+00> : vector<64x128xf32>
    %36 = tpu.matmul %33, %35, %cst_37 {dimension_numbers = #tpu.dot_dimension_numbers<[1], [0], [0], [1], [0, 0, 1, 1], [], []>} : vector<64x128xbf16>, vector<128x128xbf16>, vector<64x128xf32> -> vector<64x128xf32>
    %37 = arith.addf %32, %36 : vector<64x128xf32>
    %c1_38 = arith.constant 1 : index
    %38 = memref.load %arg1[%c1_38] : memref<2xi32, #tpu.memory_space<smem>>
    %c8_i32 = arith.constant 8 : i32
    %39 = arith.muli %c8_i32, %38 : i32
    %40 = arith.sitofp %39 : i32 to f32
    %cst_39 = arith.constant 1.000000e+00 : f32
    %41 = arith.divf %cst_39, %40 : f32
    %cst_40 = arith.constant 1.000000e+00 : f32
    %42 = vector.broadcast %cst_40 : f32 to vector<8x64xf32>
    %c0_41 = arith.constant 0 : index
    %c0_42 = arith.constant 0 : index
    %43 = vector.load %arg5[%c0_41, %c0_42] : memref<1x256xf32, #tpu.memory_space<vmem>>, vector<1x256xf32>
    %c0_43 = arith.constant 0 : index
    %c0_44 = arith.constant 0 : index
    %44 = vector.load %arg6[%c0_43, %c0_44] : memref<1x256xf32, #tpu.memory_space<vmem>>, vector<1x256xf32>
    %45 = vector.extract_strided_slice %43 {offsets = [0, 0], sizes = [1, 128], strides = [1, 1]} : vector<1x256xf32> to vector<1x128xf32>
    %46 = vector.extract_strided_slice %44 {offsets = [0, 0], sizes = [1, 128], strides = [1, 1]} : vector<1x256xf32> to vector<1x128xf32>
    %cst_45 = arith.constant dense<0.000000e+00> : vector<8x128xf32>
    %47 = tpu.matmul %42, %13, %cst_45 {dimension_numbers = #tpu.dot_dimension_numbers<[1], [0], [0], [1], [0, 0, 1, 1], [], []>} : vector<8x64xf32>, vector<64x128xf32>, vector<8x128xf32> -> vector<8x128xf32>
    %48 = vector.extract_strided_slice %47 {offsets = [0, 0], sizes = [1, 128], strides = [1, 1]} : vector<8x128xf32> to vector<1x128xf32>
    %49 = arith.mulf %13, %13 : vector<64x128xf32>
    %cst_46 = arith.constant dense<0.000000e+00> : vector<8x128xf32>
    %50 = tpu.matmul %42, %49, %cst_46 {dimension_numbers = #tpu.dot_dimension_numbers<[1], [0], [0], [1], [0, 0, 1, 1], [], []>} : vector<8x64xf32>, vector<64x128xf32>, vector<8x128xf32> -> vector<8x128xf32>
    %51 = vector.extract_strided_slice %50 {offsets = [0, 0], sizes = [1, 128], strides = [1, 1]} : vector<8x128xf32> to vector<1x128xf32>
    %52 = vector.broadcast %41 : f32 to vector<1x128xf32>
    %53 = arith.mulf %48, %52 : vector<1x128xf32>
    %54 = vector.broadcast %41 : f32 to vector<1x128xf32>
    %55 = arith.mulf %51, %54 : vector<1x128xf32>
    %56 = arith.mulf %53, %53 : vector<1x128xf32>
    %57 = arith.subf %55, %56 : vector<1x128xf32>
    %cst_47 = arith.constant 9.99999974E-6 : f32
    %58 = vector.broadcast %cst_47 : f32 to vector<1x128xf32>
    %59 = arith.addf %57, %58 : vector<1x128xf32>
    %60 = math.rsqrt %59 : vector<1x128xf32>
    %61 = arith.mulf %45, %60 : vector<1x128xf32>
    %62 = arith.mulf %53, %61 : vector<1x128xf32>
    %63 = arith.subf %46, %62 : vector<1x128xf32>
    %64 = vector.broadcast %61 : vector<1x128xf32> to vector<64x128xf32>
    %65 = arith.mulf %13, %64 : vector<64x128xf32>
    %66 = vector.broadcast %63 : vector<1x128xf32> to vector<64x128xf32>
    %67 = arith.addf %65, %66 : vector<64x128xf32>
    %cst_48 = arith.constant 0.000000e+00 : f32
    %68 = vector.broadcast %cst_48 : f32 to vector<64x128xf32>
    %69 = arith.maximumf %67, %68 : vector<64x128xf32>
    %70 = vector.extract_strided_slice %43 {offsets = [0, 128], sizes = [1, 128], strides = [1, 1]} : vector<1x256xf32> to vector<1x128xf32>
    %71 = vector.extract_strided_slice %44 {offsets = [0, 128], sizes = [1, 128], strides = [1, 1]} : vector<1x256xf32> to vector<1x128xf32>
    %cst_49 = arith.constant dense<0.000000e+00> : vector<8x128xf32>
    %72 = tpu.matmul %42, %37, %cst_49 {dimension_numbers = #tpu.dot_dimension_numbers<[1], [0], [0], [1], [0, 0, 1, 1], [], []>} : vector<8x64xf32>, vector<64x128xf32>, vector<8x128xf32> -> vector<8x128xf32>
    %73 = vector.extract_strided_slice %72 {offsets = [0, 0], sizes = [1, 128], strides = [1, 1]} : vector<8x128xf32> to vector<1x128xf32>
    %74 = arith.mulf %37, %37 : vector<64x128xf32>
    %cst_50 = arith.constant dense<0.000000e+00> : vector<8x128xf32>
    %75 = tpu.matmul %42, %74, %cst_50 {dimension_numbers = #tpu.dot_dimension_numbers<[1], [0], [0], [1], [0, 0, 1, 1], [], []>} : vector<8x64xf32>, vector<64x128xf32>, vector<8x128xf32> -> vector<8x128xf32>
    %76 = vector.extract_strided_slice %75 {offsets = [0, 0], sizes = [1, 128], strides = [1, 1]} : vector<8x128xf32> to vector<1x128xf32>
    %77 = vector.broadcast %41 : f32 to vector<1x128xf32>
    %78 = arith.mulf %73, %77 : vector<1x128xf32>
    %79 = vector.broadcast %41 : f32 to vector<1x128xf32>
    %80 = arith.mulf %76, %79 : vector<1x128xf32>
    %81 = arith.mulf %78, %78 : vector<1x128xf32>
    %82 = arith.subf %80, %81 : vector<1x128xf32>
    %cst_51 = arith.constant 9.99999974E-6 : f32
    %83 = vector.broadcast %cst_51 : f32 to vector<1x128xf32>
    %84 = arith.addf %82, %83 : vector<1x128xf32>
    %85 = math.rsqrt %84 : vector<1x128xf32>
    %86 = arith.mulf %70, %85 : vector<1x128xf32>
    %87 = arith.mulf %78, %86 : vector<1x128xf32>
    %88 = arith.subf %71, %87 : vector<1x128xf32>
    %89 = vector.broadcast %86 : vector<1x128xf32> to vector<64x128xf32>
    %90 = arith.mulf %37, %89 : vector<64x128xf32>
    %91 = vector.broadcast %88 : vector<1x128xf32> to vector<64x128xf32>
    %92 = arith.addf %90, %91 : vector<64x128xf32>
    %cst_52 = arith.constant 0.000000e+00 : f32
    %93 = vector.broadcast %cst_52 : f32 to vector<64x128xf32>
    %94 = arith.maximumf %92, %93 : vector<64x128xf32>
    %95 = arith.truncf %69 : vector<64x128xf32> to vector<64x128xbf16>
    %c0_53 = arith.constant 0 : index
    %c0_54 = arith.constant 0 : index
    %96 = vector.load %arg7[%c0_53, %c0_54] : memref<256x512xbf16, #tpu.memory_space<vmem>>, vector<128x512xbf16>
    %cst_55 = arith.constant dense<0.000000e+00> : vector<64x512xf32>
    %97 = tpu.matmul %95, %96, %cst_55 {dimension_numbers = #tpu.dot_dimension_numbers<[1], [0], [0], [1], [0, 0, 1, 1], [], []>} : vector<64x128xbf16>, vector<128x512xbf16>, vector<64x512xf32> -> vector<64x512xf32>
    %98 = arith.truncf %94 : vector<64x128xf32> to vector<64x128xbf16>
    %c128 = arith.constant 128 : index
    %c0_56 = arith.constant 0 : index
    %99 = vector.load %arg7[%c128, %c0_56] : memref<256x512xbf16, #tpu.memory_space<vmem>>, vector<128x512xbf16>
    %cst_57 = arith.constant dense<0.000000e+00> : vector<64x512xf32>
    %100 = tpu.matmul %98, %99, %cst_57 {dimension_numbers = #tpu.dot_dimension_numbers<[1], [0], [0], [1], [0, 0, 1, 1], [], []>} : vector<64x128xbf16>, vector<128x512xbf16>, vector<64x512xf32> -> vector<64x512xf32>
    %101 = arith.addf %97, %100 : vector<64x512xf32>
    %c0_58 = arith.constant 0 : index
    %c0_59 = arith.constant 0 : index
    %102 = vector.load %arg8[%c0_58, %c0_59] : memref<1x512xf32, #tpu.memory_space<vmem>>, vector<1x512xf32>
    %103 = vector.broadcast %102 : vector<1x512xf32> to vector<64x512xf32>
    %104 = arith.addf %101, %103 : vector<64x512xf32>
    %c0_60 = arith.constant 0 : index
    %c0_61 = arith.constant 0 : index
    %105 = vector.load %arg15[%c0_60, %c0_61] : memref<64x512xf32, #tpu.memory_space<vmem>>, vector<64x512xf32>
    tpu.vector_store %arg15[%c0_60, %c0_61], %104 {strides = array<i32>} : memref<64x512xf32, #tpu.memory_space<vmem>>, vector<64x512xf32>,
    %c0_62 = arith.constant 0 : index
    %c0_63 = arith.constant 0 : index
    %106 = vector.load %arg0[%c0_62, %c0_63] : memref<8x1xi32, #tpu.memory_space<vmem>>, vector<8x1xi32>
    %c0_64 = arith.constant 0 : index
    %107 = memref.load %arg1[%c0_64] : memref<2xi32, #tpu.memory_space<smem>>
    %cst_65 = arith.constant 0.000000e+00 : f32
    %108 = vector.broadcast %cst_65 : f32 to vector<8x128xf32>
    %c0_66 = arith.constant 0 : index
    %c0_67 = arith.constant 0 : index
    %109 = vector.load %arg15[%c0_66, %c0_67] : memref<64x512xf32, #tpu.memory_space<vmem>>, vector<8x512xf32>
    %c0_68 = arith.constant 0 : index
    %c0_69 = arith.constant 0 : index
    %110 = vector.load %arg9[%c0_68, %c0_69] : memref<128x512xf32, #tpu.memory_space<vmem>>, vector<128x512xf32>
    %cst_70 = arith.constant dense<0.000000e+00> : vector<8x512xf32>
    %111 = tpu.matmul %108, %110, %cst_70 {dimension_numbers = #tpu.dot_dimension_numbers<[1], [0], [0], [1], [0, 0, 1, 1], [], []>} : vector<8x128xf32>, vector<128x512xf32>, vector<8x512xf32> -> vector<8x512xf32>
    %112 = arith.addf %109, %111 : vector<8x512xf32>
    %113 = vector.extract_strided_slice %112 {offsets = [0, 0], sizes = [8, 128], strides = [1, 1]} : vector<8x512xf32> to vector<8x128xf32>
    %114 = arith.negf %113 : vector<8x128xf32>
    %115 = math.exp %114 : vector<8x128xf32>
    %cst_71 = arith.constant 1.000000e+00 : f32
    %116 = vector.broadcast %cst_71 : f32 to vector<8x128xf32>
    %117 = arith.addf %116, %115 : vector<8x128xf32>
    %118 = arith.divf %116, %117 : vector<8x128xf32>
    %119 = vector.extract_strided_slice %112 {offsets = [0, 128], sizes = [8, 128], strides = [1, 1]} : vector<8x512xf32> to vector<8x128xf32>
    %120 = arith.negf %119 : vector<8x128xf32>
    %121 = math.exp %120 : vector<8x128xf32>
    %cst_72 = arith.constant 1.000000e+00 : f32
    %122 = vector.broadcast %cst_72 : f32 to vector<8x128xf32>
    %123 = arith.addf %122, %121 : vector<8x128xf32>
    %124 = arith.divf %122, %123 : vector<8x128xf32>
    %125 = vector.extract_strided_slice %112 {offsets = [0, 256], sizes = [8, 128], strides = [1, 1]} : vector<8x512xf32> to vector<8x128xf32>
    %126 = math.tanh %125 : vector<8x128xf32>
    %127 = vector.extract_strided_slice %112 {offsets = [0, 384], sizes = [8, 128], strides = [1, 1]} : vector<8x512xf32> to vector<8x128xf32>
    %128 = arith.negf %127 : vector<8x128xf32>
    %129 = math.exp %128 : vector<8x128xf32>
    %cst_73 = arith.constant 1.000000e+00 : f32
    %130 = vector.broadcast %cst_73 : f32 to vector<8x128xf32>
    %131 = arith.addf %130, %129 : vector<8x128xf32>
    %132 = arith.divf %130, %131 : vector<8x128xf32>
    %133 = arith.mulf %124, %108 : vector<8x128xf32>
    %134 = arith.mulf %118, %126 : vector<8x128xf32>
    %135 = arith.addf %133, %134 : vector<8x128xf32>
    %136 = math.tanh %135 : vector<8x128xf32>
    %137 = arith.mulf %132, %136 : vector<8x128xf32>
    %c1_i32 = arith.constant 1 : i32
    %138 = arith.subi %107, %c1_i32 : i32
    %139 = arith.addi %c1_i32, %138 : i32
    %c1_i32_74 = arith.constant 1 : i32
    %140:4 = scf.for %arg16 = %c1_i32 to %139 step %c1_i32_74 iter_args(%arg17 = %137, %arg18 = %135, %arg19 = %108, %arg20 = %108) -> (vector<8x128xf32>, vector<8x128xf32>, vector<8x128xf32>, vector<8x128xf32>)  : i32 {
      %c1_i32_91 = arith.constant 1 : i32
      %184 = arith.subi %arg16, %c1_i32_91 : i32
      %185 = tpu.concatenate %arg17, %arg19 in 1 : vector<8x128xf32>, vector<8x128xf32> -> vector<8x256xf32>
      %c0_92 = arith.constant 0 : index
      %c0_93 = arith.constant 0 : index
      %186 = vector.load %arg10[%c0_92, %c0_93] : memref<256x512xf32, #tpu.memory_space<vmem>>, vector<256x512xf32>
      %cst_94 = arith.constant dense<0.000000e+00> : vector<8x512xf32>
      %187 = tpu.matmul %185, %186, %cst_94 {dimension_numbers = #tpu.dot_dimension_numbers<[1], [0], [0], [1], [0, 0, 1, 1], [], []>} : vector<8x256xf32>, vector<256x512xf32>, vector<8x512xf32> -> vector<8x512xf32>
      %c0_95 = arith.constant 0 : index
      %c0_96 = arith.constant 0 : index
      %188 = vector.load %arg11[%c0_95, %c0_96] : memref<1x512xf32, #tpu.memory_space<vmem>>, vector<1x512xf32>
      %189 = vector.broadcast %188 : vector<1x512xf32> to vector<8x512xf32>
      %190 = arith.addf %187, %189 : vector<8x512xf32>
      %191 = vector.extract_strided_slice %190 {offsets = [0, 0], sizes = [8, 128], strides = [1, 1]} : vector<8x512xf32> to vector<8x128xf32>
      %192 = arith.negf %191 : vector<8x128xf32>
      %193 = math.exp %192 : vector<8x128xf32>
      %cst_97 = arith.constant 1.000000e+00 : f32
      %194 = vector.broadcast %cst_97 : f32 to vector<8x128xf32>
      %195 = arith.addf %194, %193 : vector<8x128xf32>
      %196 = arith.divf %194, %195 : vector<8x128xf32>
      %197 = vector.extract_strided_slice %190 {offsets = [0, 128], sizes = [8, 128], strides = [1, 1]} : vector<8x512xf32> to vector<8x128xf32>
      %198 = arith.negf %197 : vector<8x128xf32>
      %199 = math.exp %198 : vector<8x128xf32>
      %cst_98 = arith.constant 1.000000e+00 : f32
      %200 = vector.broadcast %cst_98 : f32 to vector<8x128xf32>
      %201 = arith.addf %200, %199 : vector<8x128xf32>
      %202 = arith.divf %200, %201 : vector<8x128xf32>
      %203 = vector.extract_strided_slice %190 {offsets = [0, 256], sizes = [8, 128], strides = [1, 1]} : vector<8x512xf32> to vector<8x128xf32>
      %204 = math.tanh %203 : vector<8x128xf32>
      %205 = vector.extract_strided_slice %190 {offsets = [0, 384], sizes = [8, 128], strides = [1, 1]} : vector<8x512xf32> to vector<8x128xf32>
      %206 = arith.negf %205 : vector<8x128xf32>
      %207 = math.exp %206 : vector<8x128xf32>
      %cst_99 = arith.constant 1.000000e+00 : f32
      %208 = vector.broadcast %cst_99 : f32 to vector<8x128xf32>
      %209 = arith.addf %208, %207 : vector<8x128xf32>
      %210 = arith.divf %208, %209 : vector<8x128xf32>
      %211 = arith.mulf %202, %arg20 : vector<8x128xf32>
      %212 = arith.mulf %196, %204 : vector<8x128xf32>
      %213 = arith.addf %211, %212 : vector<8x128xf32>
      %214 = math.tanh %213 : vector<8x128xf32>
      %215 = arith.mulf %210, %214 : vector<8x128xf32>
      %216 = vector.broadcast %184 : i32 to vector<8x1xi32>
      %217 = arith.cmpi sgt, %106, %216 : vector<8x1xi32>
      %218 = vector.shape_cast %217 : vector<8x1xi1> to vector<8x1xi1>
      %219 = vector.broadcast %218 : vector<8x1xi1> to vector<8x128xi1>
      %220 = arith.select %219, %215, %arg19 : vector<8x128xi1>, vector<8x128xf32>
      %221 = vector.shape_cast %217 : vector<8x1xi1> to vector<8x1xi1>
      %222 = vector.broadcast %221 : vector<8x1xi1> to vector<8x128xi1>
      %223 = arith.select %222, %213, %arg20 : vector<8x128xi1>, vector<8x128xf32>
      %c8_i32_100 = arith.constant 8 : i32
      %224 = arith.muli %arg16, %c8_i32_100 : i32
      %225 = tpu.assume_multiple %224, 8 : i32
      %226 = arith.index_cast %225 : i32 to index
      %c0_101 = arith.constant 0 : index
      %227 = vector.load %arg15[%226, %c0_101] : memref<64x512xf32, #tpu.memory_space<vmem>>, vector<8x512xf32>
      %c0_102 = arith.constant 0 : index
      %c0_103 = arith.constant 0 : index
      %228 = vector.load %arg9[%c0_102, %c0_103] : memref<128x512xf32, #tpu.memory_space<vmem>>, vector<128x512xf32>
      %cst_104 = arith.constant dense<0.000000e+00> : vector<8x512xf32>
      %229 = tpu.matmul %arg17, %228, %cst_104 {dimension_numbers = #tpu.dot_dimension_numbers<[1], [0], [0], [1], [0, 0, 1, 1], [], []>} : vector<8x128xf32>, vector<128x512xf32>, vector<8x512xf32> -> vector<8x512xf32>
      %230 = arith.addf %227, %229 : vector<8x512xf32>
      %231 = vector.extract_strided_slice %230 {offsets = [0, 0], sizes = [8, 128], strides = [1, 1]} : vector<8x512xf32> to vector<8x128xf32>
      %232 = arith.negf %231 : vector<8x128xf32>
      %233 = math.exp %232 : vector<8x128xf32>
      %cst_105 = arith.constant 1.000000e+00 : f32
      %234 = vector.broadcast %cst_105 : f32 to vector<8x128xf32>
      %235 = arith.addf %234, %233 : vector<8x128xf32>
      %236 = arith.divf %234, %235 : vector<8x128xf32>
      %237 = vector.extract_strided_slice %230 {offsets = [0, 128], sizes = [8, 128], strides = [1, 1]} : vector<8x512xf32> to vector<8x128xf32>
      %238 = arith.negf %237 : vector<8x128xf32>
      %239 = math.exp %238 : vector<8x128xf32>
      %cst_106 = arith.constant 1.000000e+00 : f32
      %240 = vector.broadcast %cst_106 : f32 to vector<8x128xf32>
      %241 = arith.addf %240, %239 : vector<8x128xf32>
      %242 = arith.divf %240, %241 : vector<8x128xf32>
      %243 = vector.extract_strided_slice %230 {offsets = [0, 256], sizes = [8, 128], strides = [1, 1]} : vector<8x512xf32> to vector<8x128xf32>
      %244 = math.tanh %243 : vector<8x128xf32>
      %245 = vector.extract_strided_slice %230 {offsets = [0, 384], sizes = [8, 128], strides = [1, 1]} : vector<8x512xf32> to vector<8x128xf32>
      %246 = arith.negf %245 : vector<8x128xf32>
      %247 = math.exp %246 : vector<8x128xf32>
      %cst_107 = arith.constant 1.000000e+00 : f32
      %248 = vector.broadcast %cst_107 : f32 to vector<8x128xf32>
      %249 = arith.addf %248, %247 : vector<8x128xf32>
      %250 = arith.divf %248, %249 : vector<8x128xf32>
      %251 = arith.mulf %242, %arg18 : vector<8x128xf32>
      %252 = arith.mulf %236, %244 : vector<8x128xf32>
      %253 = arith.addf %251, %252 : vector<8x128xf32>
      %254 = math.tanh %253 : vector<8x128xf32>
      %255 = arith.mulf %250, %254 : vector<8x128xf32>
      scf.yield %255, %253, %220, %223 : vector<8x128xf32>, vector<8x128xf32>, vector<8x128xf32>, vector<8x128xf32>
    }
    %c1_i32_75 = arith.constant 1 : i32
    %141 = arith.subi %107, %c1_i32_75 : i32
    %142 = tpu.concatenate %140#0, %140#2 in 1 : vector<8x128xf32>, vector<8x128xf32> -> vector<8x256xf32>
    %c0_76 = arith.constant 0 : index
    %c0_77 = arith.constant 0 : index
    %143 = vector.load %arg10[%c0_76, %c0_77] : memref<256x512xf32, #tpu.memory_space<vmem>>, vector<256x512xf32>
    %cst_78 = arith.constant dense<0.000000e+00> : vector<8x512xf32>
    %144 = tpu.matmul %142, %143, %cst_78 {dimension_numbers = #tpu.dot_dimension_numbers<[1], [0], [0], [1], [0, 0, 1, 1], [], []>} : vector<8x256xf32>, vector<256x512xf32>, vector<8x512xf32> -> vector<8x512xf32>
    %c0_79 = arith.constant 0 : index
    %c0_80 = arith.constant 0 : index
    %145 = vector.load %arg11[%c0_79, %c0_80] : memref<1x512xf32, #tpu.memory_space<vmem>>, vector<1x512xf32>
    %146 = vector.broadcast %145 : vector<1x512xf32> to vector<8x512xf32>
    %147 = arith.addf %144, %146 : vector<8x512xf32>
    %148 = vector.extract_strided_slice %147 {offsets = [0, 0], sizes = [8, 128], strides = [1, 1]} : vector<8x512xf32> to vector<8x128xf32>
    %149 = arith.negf %148 : vector<8x128xf32>
    %150 = math.exp %149 : vector<8x128xf32>
    %cst_81 = arith.constant 1.000000e+00 : f32
    %151 = vector.broadcast %cst_81 : f32 to vector<8x128xf32>
    %152 = arith.addf %151, %150 : vector<8x128xf32>
    %153 = arith.divf %151, %152 : vector<8x128xf32>
    %154 = vector.extract_strided_slice %147 {offsets = [0, 128], sizes = [8, 128], strides = [1, 1]} : vector<8x512xf32> to vector<8x128xf32>
    %155 = arith.negf %154 : vector<8x128xf32>
    %156 = math.exp %155 : vector<8x128xf32>
    %cst_82 = arith.constant 1.000000e+00 : f32
    %157 = vector.broadcast %cst_82 : f32 to vector<8x128xf32>
    %158 = arith.addf %157, %156 : vector<8x128xf32>
    %159 = arith.divf %157, %158 : vector<8x128xf32>
    %160 = vector.extract_strided_slice %147 {offsets = [0, 256], sizes = [8, 128], strides = [1, 1]} : vector<8x512xf32> to vector<8x128xf32>
    %161 = math.tanh %160 : vector<8x128xf32>
    %162 = vector.extract_strided_slice %147 {offsets = [0, 384], sizes = [8, 128], strides = [1, 1]} : vector<8x512xf32> to vector<8x128xf32>
    %163 = arith.negf %162 : vector<8x128xf32>
    %164 = math.exp %163 : vector<8x128xf32>
    %cst_83 = arith.constant 1.000000e+00 : f32
    %165 = vector.broadcast %cst_83 : f32 to vector<8x128xf32>
    %166 = arith.addf %165, %164 : vector<8x128xf32>
    %167 = arith.divf %165, %166 : vector<8x128xf32>
    %168 = arith.mulf %159, %140#3 : vector<8x128xf32>
    %169 = arith.mulf %153, %161 : vector<8x128xf32>
    %170 = arith.addf %168, %169 : vector<8x128xf32>
    %171 = math.tanh %170 : vector<8x128xf32>
    %172 = arith.mulf %167, %171 : vector<8x128xf32>
    %173 = vector.broadcast %141 : i32 to vector<8x1xi32>
    %174 = arith.cmpi sgt, %106, %173 : vector<8x1xi32>
    %175 = vector.shape_cast %174 : vector<8x1xi1> to vector<8x1xi1>
    %176 = vector.broadcast %175 : vector<8x1xi1> to vector<8x128xi1>
    %177 = arith.select %176, %172, %140#2 : vector<8x128xi1>, vector<8x128xf32>
    %c0_84 = arith.constant 0 : index
    %c0_85 = arith.constant 0 : index
    %178 = vector.load %arg12[%c0_84, %c0_85] : memref<128x128xf32, #tpu.memory_space<vmem>>, vector<128x128xf32>
    %cst_86 = arith.constant dense<0.000000e+00> : vector<8x128xf32>
    %179 = tpu.matmul %177, %178, %cst_86 {dimension_numbers = #tpu.dot_dimension_numbers<[1], [0], [0], [1], [0, 0, 1, 1], [], []>} : vector<8x128xf32>, vector<128x128xf32>, vector<8x128xf32> -> vector<8x128xf32>
    %c0_87 = arith.constant 0 : index
    %c0_88 = arith.constant 0 : index
    %180 = vector.load %arg13[%c0_87, %c0_88] : memref<1x128xf32, #tpu.memory_space<vmem>>, vector<1x128xf32>
    %181 = vector.broadcast %180 : vector<1x128xf32> to vector<8x128xf32>
    %182 = arith.addf %179, %181 : vector<8x128xf32>
    %c0_89 = arith.constant 0 : index
    %c0_90 = arith.constant 0 : index
    %183 = vector.load %arg14[%c0_89, %c0_90] : memref<8x128xf32, #tpu.memory_space<vmem>>, vector<8x128xf32>
    tpu.vector_store %arg14[%c0_89, %c0_90], %182 {strides = array<i32>} : memref<8x128xf32, #tpu.memory_space<vmem>>, vector<8x128xf32>,
    return
  }
}

</mosaic_0001>

<bundles_post_ra>
// kernel: icassp2cnn_forward.1
= control target key start
LH: loop header
LB: loop body
LE: loop exit
PB: predicated region body
PF: predicated region fallthrough
CT: control target
= control target key end

     0   :  { %19 = vsyncpa [#allocation4], 0  ;;  %s4241_s16 = smov [#allocation3]   ;;  %s6662_s0 = inlined_call_operand.vmem [shape: s32[8,1], index: 0, kind: input, shape index: {}]   ;;  %s6663_s1 = inlined_call_operand.vmem [shape: s32[2], index: 1, kind: input, shape index: {}]   ;;  %s6664_s2 = inlined_call_operand.vmem [shape: bf16[96,128], index: 2, kind: input, shape index: {}]   ;;  %s6665_s3 = inlined_call_operand.vmem [shape: bf16[3,128,128], index: 3, kind: input, shape index: {}]   ;;  %s6666_s4 = inlined_call_operand.vmem [shape: bf16[5,128,128], index: 4, kind: input, shape index: {}]   ;;  %s6667_s5 = inlined_call_operand.vmem [shape: f32[1,256], index: 5, kind: input, shape index: {}]   ;;  %s6668_s6 = inlined_call_operand.vmem [shape: f32[1,256], index: 6, kind: input, shape index: {}]   ;;  %s6669_s7 = inlined_call_operand.vmem [shape: bf16[256,512], index: 7, kind: input, shape index: {}]   ;;  %s6670_s8 = inlined_call_operand.vmem [shape: f32[1,512], index: 8, kind: input, shape index: {}]   ;;  %s6671_s9 = inlined_call_operand.vmem [shape: f32[128,512], index: 9, kind: input, shape index: {}]   ;;  %s6672_s10 = inlined_call_operand.vmem [shape: f32[256,512], index: 10, kind: input, shape index: {}]   ;;  %s6673_s11 = inlined_call_operand.vmem [shape: f32[1,512], index: 11, kind: input, shape index: {}]   ;;  %s6674_s12 = inlined_call_operand.vmem [shape: f32[128,128], index: 12, kind: input, shape index: {}]   ;;  %s6675_s13 = inlined_call_operand.vmem [shape: f32[1,128], index: 13, kind: input, shape index: {}]   ;;  %s6676_s14 = inlined_call_operand.vmem [shape: f32[8,128], index: 14, kind: output, shape index: {}]  }
   0x1   :  { %s27_s15 = sshll.u32 %s6663_s1, 4  ;;  %s28_s15 = int_to_ptr.vmem [resolvable:$true] %s27_s15 }
   0x2   :  { %30 = dma.vmem_to_smem %s28_s15, 16, %s4241_s16, [#allocation4]  }
   0x3   :  { %4205 = dma.done.wait [#allocation4], 16  }
   0x4   :  { %4206 = vsyncadd [#allocation4], 4294967280 }
   0x5   :  { %59 = sfence }
   0x6   :  { %v3852_v0 = vld [vmem:[%s6665_s3 + $0x78] sm:$0xff]  ;;  %v3851_v4 = vld [vmem:[%s6665_s3 + $0x70] sm:$0xff]  ;;  %v3850_v8 = vld [vmem:[%s6665_s3 + $0x68] sm:$0xff]  ;;  %vm1002_vm0 = vcmask 523264   ;;  %s4972_s28 = sld [smem:[#allocation3]] }
   0x7   :  { %v3844_v1 = vld [vmem:[%s6665_s3 + $0x38] sm:$0xff]  ;;  %174 = vmatpush.bf16.msra.mxu0 %v3852_v0  ;;  %v3843_v5 = vld [vmem:[%s6665_s3 + $0x30] sm:$0xff]  ;;  %v3842_v9 = vld [vmem:[%s6665_s3 + $0x28] sm:$0xff] }
   0x8   :  { %v3864_v2 = vld [vmem:[%s6665_s3 + $0xb8] sm:$0xff]  ;;  %261 = vmatpush.bf16.msra.mxu1 %v3844_v1  ;;  %v3863_v6 = vld [vmem:[%s6665_s3 + $0xb0] sm:$0xff]  ;;  %v3862_v10 = vld [vmem:[%s6665_s3 + $0xa8] sm:$0xff] }
   0x9   :  { %v3884_v3 = vld [vmem:[%s6666_s4 + $0x78] sm:$0xff]  ;;  %387 = vmatpush.bf16.msra.mxu2 %v3864_v2  ;;  %v3883_v7 = vld [vmem:[%s6666_s4 + $0x70] sm:$0xff]  ;;  %v3882_v11 = vld [vmem:[%s6666_s4 + $0x68] sm:$0xff] }
   0xa   :  { %513 = vmatpush.bf16.msra.mxu3 %v3884_v3  ;;  %v3849_v12 = vld [vmem:[%s6665_s3 + $0x60] sm:$0xff]  ;;  %v3848_v16 = vld [vmem:[%s6665_s3 + $0x58] sm:$0xff]  ;;  %v3847_v20 = vld [vmem:[%s6665_s3 + $0x50] sm:$0xff] }
   0xb   :  { %175 = vmatpush.bf16.msra.mxu0 %v3851_v4  ;;  %v3841_v13 = vld [vmem:[%s6665_s3 + $0x20] sm:$0xff]  ;;  %v3840_v17 = vld [vmem:[%s6665_s3 + $0x18] sm:$0xff]  ;;  %v3839_v21 = vld [vmem:[%s6665_s3 + $0x10] sm:$0xff] }
   0xc   :  { %262 = vmatpush.bf16.msra.mxu1 %v3843_v5  ;;  %v3861_v14 = vld [vmem:[%s6665_s3 + $0xa0] sm:$0xff]  ;;  %v3860_v18 = vld [vmem:[%s6665_s3 + $0x98] sm:$0xff]  ;;  %v3859_v22 = vld [vmem:[%s6665_s3 + $0x90] sm:$0xff]  ;;  %p3822_p0 = scmp.le.s32.totalorder %s4972_s28, 1 }
   0xd   :  { %388 = vmatpush.bf16.msra.mxu2 %v3863_v6  ;;  %v3881_v15 = vld [vmem:[%s6666_s4 + $0x60] sm:$0xff]  ;;  %v3880_v19 = vld [vmem:[%s6666_s4 + $0x58] sm:$0xff]  ;;  %v3879_v23 = vld [vmem:[%s6666_s4 + $0x50] sm:$0xff] }
   0xe   :  { %514 = vmatpush.bf16.msra.mxu3 %v3883_v7  ;;  %v3846_v24 = vld [vmem:[%s6665_s3 + $0x48] sm:$0xff]  ;;  %v3845_v28 = vld [vmem:[%s6665_s3 + $0x40] sm:$0xff]  ;;  %v3876_v35 = vld [vmem:[%s6666_s4 + $0x38] sm:$0xff] }
   0xf   :  { %176 = vmatpush.bf16.msra.mxu0 %v3850_v8  ;;  %v3838_v25 = vld [vmem:[%s6665_s3 + $0x8] sm:$0xff]  ;;  %v3837_v29 = vld [vmem:[%s6665_s3] sm:$0xff]  ;;  %v3892_v36 = vld [vmem:[%s6666_s4 + $0xb8] sm:$0xff] }
  0x10   :  { %263 = vmatpush.bf16.msra.mxu1 %v3842_v9  ;;  %v3858_v26 = vld [vmem:[%s6665_s3 + $0x88] sm:$0xff]  ;;  %v3857_v30 = vld [vmem:[%s6665_s3 + $0x80] sm:$0xff]  ;;  %v3900_v37 = vld [vmem:[%s6666_s4 + $0xf8] sm:$0xff] }
  0x11   :  { %389 = vmatpush.bf16.msra.mxu2 %v3862_v10  ;;  %v3878_v27 = vld [vmem:[%s6666_s4 + $0x48] sm:$0xff]  ;;  %v3877_v31 = vld [vmem:[%s6666_s4 + $0x40] sm:$0xff]  ;;  %v3912_v38 = vld [vmem:[%s6666_s4 + $0x138] sm:$0xff] }
  0x12   :  { %515 = vmatpush.bf16.msra.mxu3 %v3882_v11  ;;  %v4008_v32 = vld [vmem:[%s6664_s2 + $0x4] sm:$0xff]   ;;  %v4431_v34 = vld [vmem:[%s6664_s2 + $0xc] sm:$0xff]  ;;  %v4494_v53 = vld [vmem:[%s6664_s2 + $0x14] sm:$0xff] }
  0x13   :  { %177 = vmatpush.bf16.msra.mxu0 %v3849_v12  ;;  %v4426_v33 = vld [vmem:[%s6664_s2 + $0x8] sm:$0xff]   ;;  %v3875_v39 = vld [vmem:[%s6666_s4 + $0x30] sm:$0xff]  ;;  %v3873_v47 = vld [vmem:[%s6666_s4 + $0x20] sm:$0xff] }
  0x14   :  { %264 = vmatpush.bf16.msra.mxu1 %v3841_v13  ;;  %v3891_v40 = vld [vmem:[%s6666_s4 + $0xb0] sm:$0xff]  ;;  %v3874_v43 = vld [vmem:[%s6666_s4 + $0x28] sm:$0xff]  ;;  %v3889_v48 = vld [vmem:[%s6666_s4 + $0xa0] sm:$0xff] }
  0x15   :  { %390 = vmatpush.bf16.msra.mxu2 %v3861_v14  ;;  %v3899_v41 = vld [vmem:[%s6666_s4 + $0xf0] sm:$0xff]  ;;  %v3890_v44 = vld [vmem:[%s6666_s4 + $0xa8] sm:$0xff]  ;;  %v3897_v49 = vld [vmem:[%s6666_s4 + $0xe0] sm:$0xff] }
  0x16   :  { %516 = vmatpush.bf16.msra.mxu3 %v3881_v15  ;;  %v3911_v42 = vld [vmem:[%s6666_s4 + $0x130] sm:$0xff]  ;;  %v3898_v45 = vld [vmem:[%s6666_s4 + $0xe8] sm:$0xff]  ;;  %v3909_v50 = vld [vmem:[%s6666_s4 + $0x120] sm:$0xff] }
  0x17   :  { %178 = vmatpush.bf16.msra.mxu0 %v3848_v16  ;;  %v3910_v46 = vld [vmem:[%s6666_s4 + $0x128] sm:$0xff]  ;;  %v4489_v52 = vld [vmem:[%s6664_s2 + $0x10] sm:$0xff]   ;;  %v3872_v54 = vld [vmem:[%s6666_s4 + $0x18] sm:$0xff] }
  0x18   :  { %265 = vmatpush.bf16.msra.mxu1 %v3840_v17  ;;  %v4010_v51 = vld [vmem:[%s6664_s2 + $0xc] sm:$0xff]   ;;  %v3888_v55 = vld [vmem:[%s6666_s4 + $0x98] sm:$0xff]  ;;  %v3869_v2 = vld [vmem:[%s6666_s4] sm:$0xff] }
  0x19   :  { %391 = vmatpush.bf16.msra.mxu2 %v3860_v18  ;;  %v3896_v56 = vld [vmem:[%s6666_s4 + $0xd8] sm:$0xff]  ;;  %v3871_v58 = vld [vmem:[%s6666_s4 + $0x10] sm:$0xff]  ;;  %v3870_v62 = vld [vmem:[%s6666_s4 + $0x8] sm:$0xff] }
  0x1a   :  { %517 = vmatpush.bf16.msra.mxu3 %v3880_v19  ;;  %v3908_v57 = vld [vmem:[%s6666_s4 + $0x118] sm:$0xff]  ;;  %v3887_v59 = vld [vmem:[%s6666_s4 + $0x90] sm:$0xff]  ;;  %v3886_v63 = vld [vmem:[%s6666_s4 + $0x88] sm:$0xff] }
  0x1b   :  { %179 = vmatpush.bf16.msra.mxu0 %v3847_v20  ;;  %v3895_v60 = vld [vmem:[%s6666_s4 + $0xd0] sm:$0xff]  ;;  %v3894_v0 = vld [vmem:[%s6666_s4 + $0xc8] sm:$0xff]  ;;  %v3885_v3 = vld [vmem:[%s6666_s4 + $0x80] sm:$0xff] }
  0x1c   :  { %266 = vmatpush.bf16.msra.mxu1 %v3839_v21  ;;  %v3907_v61 = vld [vmem:[%s6666_s4 + $0x110] sm:$0xff]  ;;  %v3906_v1 = vld [vmem:[%s6666_s4 + $0x108] sm:$0xff]  ;;  %v3893_v4 = vld [vmem:[%s6666_s4 + $0xc0] sm:$0xff] }
  0x1d   :  { %392 = vmatpush.bf16.msra.mxu2 %v3859_v22  ;;  %v3905_v5 = vld [vmem:[%s6666_s4 + $0x100] sm:$0xff]  ;;  %v4011_v6 = vld [vmem:[%s6664_s2 + $0x14] sm:$0xff]   ;;  %v4207_v8 = vld [vmem:[%s6664_s2 + $0x1c] sm:$0xf] }
  0x1e   :  { %518 = vmatpush.bf16.msra.mxu3 %v3879_v23  ;;  %v3992_v7 = vld [vmem:[%s6664_s2 + $0x18] sm:$0xff]   ;;  %v67_v10 = vld [vmem:[%s6664_s2 + $0x20] sm:$0xff]   ;;  %v3901_v15 = vld [vmem:[%s6664_s2 + $0x10] sm:$0xff] }
  0x1f   :  { %180 = vmatpush.bf16.msra.mxu0 %v3846_v24  ;;  %v3855_v9 = vld [vmem:[%s6664_s2 + $0x1c] sm:$0xff]  ;;  %v3856_v13 = vld [vmem:[%s6664_s2 + $0x24] sm:$0xff]  ;;  %v3867_v18 = vld [vmem:[%s6664_s2 + $0x10] sm:$0xff] }
  0x20   :  { %267 = vmatpush.bf16.msra.mxu1 %v3838_v25  ;;  %v4208_v11 = vld [vmem:[%s6664_s2 + $0x1c] sm:$0xf0]   ;;  %v3866_v16 = vld [vmem:[%s6664_s2 + $0x8] sm:$0xff]  ;;  %v3902_v17 = vld [vmem:[%s6664_s2 + $0x18] sm:$0xff] }
  0x21   :  { %393 = vmatpush.bf16.msra.mxu2 %v3858_v26  ;;  %v4160_v12 = vor.u32 %v4208_v11, %v4207_v8  ;;  %v3865_v14 = vld [vmem:[%s6664_s2] sm:$0xff]  ;;  %v3868_v20 = vld [vmem:[%s6664_s2 + $0x18] sm:$0xff]  ;;  %v3904_v21 = vld [vmem:[%s6664_s2 + $0x28] sm:$0xff] }
  0x22   :  { %519 = vmatpush.bf16.msra.mxu3 %v3878_v27  ;;  %v3903_v19 = vld [vmem:[%s6664_s2 + $0x20] sm:$0xff]  ;;  %s3557_s2 = sld [smem:[#allocation3 + $0x1]] }
  0x23   :  { %181 = vmatpush.bf16.msra.mxu0 %v3845_v28 }
  0x24   :  { %268 = vmatpush.bf16.msra.mxu1 %v3837_v29 }
  0x25   :  { %394 = vmatpush.bf16.msra.mxu2 %v3857_v30 }
  0x26   :  { %520 = vmatpush.bf16.msra.mxu3 %v3877_v31  ;;  %182 = vmatmul.bf16.vlgmr.msra.gmra.mxu0 %v4426_v33 }
  0x27   :  { %269 = vmatmul.bf16.vlgmr.msra.gmra.mxu1 %v4008_v32  ;;  %614 = vmatpush.bf16.msrb.mxu0 %v3876_v35 }
  0x28   :  { %395 = vmatmul.bf16.vlgmr.msra.gmra.mxu2 %v4431_v34  ;;  %708 = vmatpush.bf16.msrb.mxu1 %v3892_v36  ;;  %s3558_s25 = sshll.u32 %s3557_s2, 3 }
  0x29   :  { %521 = vmatmul.bf16.vlgmr.msra.gmra.mxu3 %v4008_v32  ;;  %810 = vmatpush.bf16.msrb.mxu2 %v3900_v37  ;;  %s983_s26 = scvt.s32.f32 %s3558_s25 }
  0x2a   :  { %944 = vmatpush.bf16.msrb.mxu3 %v3912_v38 }
  0x2b   :  { %615 = vmatpush.bf16.msrb.mxu0 %v3875_v39 }
  0x2c   :  { %709 = vmatpush.bf16.msrb.mxu1 %v3891_v40 }
  0x2d   :  { %811 = vmatpush.bf16.msrb.mxu2 %v3899_v41 }
  0x2e   :  { %945 = vmatpush.bf16.msrb.mxu3 %v3911_v42 }
  0x2f   :  { %616 = vmatpush.bf16.msrb.mxu0 %v3874_v43 }
  0x30   :  { %710 = vmatpush.bf16.msrb.mxu1 %v3890_v44 }
  0x31   :  { %812 = vmatpush.bf16.msrb.mxu2 %v3898_v45 }
  0x32   :  { %946 = vmatpush.bf16.msrb.mxu3 %v3910_v46 }
  0x33   :  { %617 = vmatpush.bf16.msrb.mxu0 %v3873_v47 }
  0x34   :  { %711 = vmatpush.bf16.msrb.mxu1 %v3889_v48 }
  0x35   :  { %813 = vmatpush.bf16.msrb.mxu2 %v3897_v49 }
  0x36   :  { %947 = vmatpush.bf16.msrb.mxu3 %v3909_v50  ;;  %187 = vmatmul.bf16.gmra.mxu0 %v4489_v52 }
  0x37   :  { %274 = vmatmul.bf16.gmra.mxu1 %v4010_v51  ;;  %618 = vmatpush.bf16.msrb.mxu0 %v3872_v54 }
  0x38   :  { %400 = vmatmul.bf16.gmra.mxu2 %v4494_v53  ;;  %712 = vmatpush.bf16.msrb.mxu1 %v3888_v55 }
  0x39   :  { %526 = vmatmul.bf16.gmra.mxu3 %v4010_v51  ;;  %814 = vmatpush.bf16.msrb.mxu2 %v3896_v56 }
  0x3a   :  { %948 = vmatpush.bf16.msrb.mxu3 %v3908_v57 }
  0x3b   :  { %619 = vmatpush.bf16.msrb.mxu0 %v3871_v58 }
  0x3c   :  { %713 = vmatpush.bf16.msrb.mxu1 %v3887_v59 }
  0x3d   :  { %815 = vmatpush.bf16.msrb.mxu2 %v3895_v60 }
  0x3e   :  { %949 = vmatpush.bf16.msrb.mxu3 %v3907_v61 }
  0x3f   :  { %620 = vmatpush.bf16.msrb.mxu0 %v3870_v62 }
  0x40   :  { %714 = vmatpush.bf16.msrb.mxu1 %v3886_v63 }
  0x41   :  { %816 = vmatpush.bf16.msrb.mxu2 %v3894_v0 }
  0x42   :  { %950 = vmatpush.bf16.msrb.mxu3 %v3906_v1 }
  0x43   :  { %621 = vmatpush.bf16.msrb.mxu0 %v3869_v2 }
  0x44   :  { %715 = vmatpush.bf16.msrb.mxu1 %v3885_v3 }
  0x45   :  { %817 = vmatpush.bf16.msrb.mxu2 %v3893_v4 }
  0x46   :  { %951 = vmatpush.bf16.msrb.mxu3 %v3905_v5  ;;  %192 = vmatmul.bf16.gmra.mxu0 %v3992_v7 }
  0x47   :  { %279 = vmatmul.bf16.gmra.mxu1 %v4011_v6 }
  0x48   :  { %405 = vmatmul.bf16.gmra.mxu2 %v3855_v9 }
  0x49   :  { %531 = vmatmul.bf16.gmra.mxu3 %v4011_v6 }
  0x56   :  { %197 = vmatmul.bf16.gmra.mxu0 %v67_v10 }
  0x57   :  { %284 = vmatmul.bf16.gmra.mxu1 %v4160_v12 }
  0x58   :  { %410 = vmatmul.bf16.gmra.mxu2 %v3856_v13 }
  0x59   :  { %536 = vmatmul.bf16.gmra.mxu3 %v4160_v12 }
  0x66   :  { %622 = vmatmul.bf16.vlgmr.msrb.gmra.mxu0 %v3865_v14 }
  0x67   :  { %716 = vmatmul.bf16.vlgmr.msrb.gmra.mxu1 %v4426_v33 }
  0x68   :  { %818 = vmatmul.bf16.vlgmr.msrb.gmra.mxu2 %v4431_v34 }
  0x69   :  { %952 = vmatmul.bf16.vlgmr.msrb.gmra.mxu3 %v3901_v15 }
  0x76   :  { %627 = vmatmul.bf16.gmra.mxu0 %v3866_v16 }
  0x77   :  { %721 = vmatmul.bf16.gmra.mxu1 %v4489_v52 }
  0x78   :  { %823 = vmatmul.bf16.gmra.mxu2 %v4494_v53 }
  0x79   :  { %957 = vmatmul.bf16.gmra.mxu3 %v3902_v17 }
  0x86   :  { %632 = vmatmul.bf16.gmra.mxu0 %v3867_v18 }
  0x87   :  { %726 = vmatmul.bf16.gmra.mxu1 %v3992_v7 }
  0x88   :  { %828 = vmatmul.bf16.gmra.mxu2 %v3855_v9 }
  0x89   :  { %962 = vmatmul.bf16.gmra.mxu3 %v3903_v19 }
  0x96   :  { %637 = vmatmul.bf16.gmra.mxu0 %v3868_v20 }
  0x97   :  { %731 = vmatmul.bf16.gmra.mxu1 %v67_v10 }
  0x98   :  { %833 = vmatmul.bf16.gmra.mxu2 %v3856_v13 }
  0x99   :  { %967 = vmatmul.bf16.gmra.mxu3 %v3904_v21 }
  0xa3   :  { %v183_v22 = vpop.f32.mrf.mxu0 }
  0xa4   :  { %v270_v23 = vpop.f32.mrf.mxu1 }
  0xa5   :  { %v271_v13 = vadd.f32 %v270_v23, %v183_v22 }
  0xab   :  { %v4595_v24 = vpop.f32.mrf.mxu2  ;;  %v185_v26 = vpop.f32.mrf.mxu0 }
  0xac   :  { %v4597_v25 = vpop.f32.mrf.mxu3  ;;  %v272_v27 = vpop.f32.mrf.mxu1  ;;  %v4655_v16 = vadd.f32 %v4595_v24, %v271_v13  ;;  %v4242_v24 = vmov 1.0  }
  0xad   :  { %v273_v8 = vadd.f32 %v272_v27, %v185_v26 }
  0xae   :  { %v1026_v23 = vmul.f32 %v4655_v16, %v4655_v16 }
  0xb3   :  { %v398_v28 = vpop.f32.mrf.mxu2  ;;  %v188_v30 = vpop.f32.mrf.mxu0 }
  0xb4   :  { %v4599_v29 = vpop.f32.mrf.mxu3  ;;  %v275_v31 = vpop.f32.mrf.mxu1  ;;  %v4649_v14 = vadd.f32 %v398_v28, %v273_v8 }
  0xb5   :  { %v276_v3 = vadd.f32 %v275_v31, %v188_v30 }
  0xb6   :  { %v1027_v18 = vmul.f32 %v4649_v14, %v4649_v14 }
  0xbb   :  { %v401_v32 = vpop.f32.mrf.mxu2  ;;  %v190_v34 = vpop.f32.mrf.mxu0 }
  0xbc   :  { %v4601_v33 = vpop.f32.mrf.mxu3  ;;  %v277_v35 = vpop.f32.mrf.mxu1  ;;  %v4640_v9 = vadd.f32 %v401_v32, %v276_v3 }
  0xbd   :  { %v278_v0 = vadd.f32 %v277_v35, %v190_v34 }
  0xbe   :  { %v1028_v17 = vmul.f32 %v4640_v9, %v4640_v9 }
  0xc3   :  { %v403_v36 = vpop.f32.mrf.mxu2  ;;  %v193_v38 = vpop.f32.mrf.mxu0 }
  0xc4   :  { %v4603_v37 = vpop.f32.mrf.mxu3  ;;  %v280_v39 = vpop.f32.mrf.mxu1  ;;  %v4631_v4 = vadd.f32 %v403_v36, %v278_v0 }
  0xc5   :  { %v281_v61 = vadd.f32 %v280_v39, %v193_v38 }
  0xc6   :  { %v1029_v15 = vmul.f32 %v4631_v4, %v4631_v4 }
  0xcb   :  { %v406_v40 = vpop.f32.mrf.mxu2  ;;  %v195_v42 = vpop.f32.mrf.mxu0 }
  0xcc   :  { %v4605_v41 = vpop.f32.mrf.mxu3  ;;  %v282_v43 = vpop.f32.mrf.mxu1  ;;  %v4626_v1 = vadd.f32 %v406_v40, %v281_v61 }
  0xcd   :  { %v283_v56 = vadd.f32 %v282_v43, %v195_v42  ;;  %v984_v42 = vstv %s983_s26 }
  0xce   :  { %v1030_v12 = vmul.f32 %v4626_v1, %v4626_v1  ;;  %4083 = vrcp.f32 %v984_v42  ;;  %vm990_vm1 = vweird.f32 %v984_v42 }
  0xd3   :  { %v408_v44 = vpop.f32.mrf.mxu2  ;;  %v198_v46 = vpop.f32.mrf.mxu0 }
  0xd4   :  { %v4607_v45 = vpop.f32.mrf.mxu3  ;;  %v285_v47 = vpop.f32.mrf.mxu1  ;;  %v4621_v62 = vadd.f32 %v408_v44, %v283_v56 }
  0xd5   :  { %v286_v52 = vadd.f32 %v285_v47, %v198_v46  ;;  %v4084_v47 = vpop.eup %4083 }
  0xd6   :  { %v1031_v5 = vmul.f32 %v4621_v62, %v4621_v62  ;;  %vm991_vm2 = vweird.f32 %v4084_v47 }
  0xd7   :  { %vm992_vm3 = vmor %vm990_vm1, %vm991_vm2 }
  0xdb   :  { %v411_v48 = vpop.f32.mrf.mxu2  ;;  %v200_v50 = vpop.f32.mrf.mxu0 }
  0xdc   :  { %v4609_v49 = vpop.f32.mrf.mxu3  ;;  %v287_v51 = vpop.f32.mrf.mxu1  ;;  %v4613_v57 = vadd.f32 %v411_v48, %v286_v52  ;;  %v986_v48 = vmul.f32 %v4084_v47, %v984_v42  ;;  %v994_v52 = vand.u32 2147483647, %v984_v42 }
  0xdd   :  { %v288_v53 = vadd.f32 %v287_v51, %v200_v50 }
  0xde   :  { %v1032_v2 = vmul.f32 %v4613_v57, %v4613_v57  ;;  %v987_v51 = vsub.f32 1.0, %v986_v48  ;;  %vm995_vm4 = vcmp.eq.f32.partialorder %v994_v52, 8.507059e+37 }
  0xe3   :  { %v413_v54 = vpop.f32.mrf.mxu2  ;;  %v4617_v59 = vpop.f32.mrf.mxu0 }
  0xe4   :  { %v4611_v55 = vpop.f32.mrf.mxu3  ;;  %v4615_v58 = vadd.f32 %v413_v54, %v288_v53  ;;  %v4619_v60 = vpop.f32.mrf.mxu1  ;;  %v996_v53 = vand.u32 2147483648, %v984_v42  ;;  %v988_v54 = vmul.f32 %v4084_v47, %v987_v51 }
  0xe6   :  { %v1033_v63 = vmul.f32 %v4615_v58, %v4615_v58  ;;  %1014 = vmatpush.msra.mxu0 %v4615_v58  ;;  %v989_v3 = vadd.f32 %v4084_v47, %v988_v54 }
  0xe8   :  { %1015 = vmatpush.msra.mxu0 %v4613_v57  ;;  %1042 = vmatpush.msra.mxu1 %v1033_v63  ;;  %v997_v63 = vor.u32 1.1754944e-38, %v996_v53 }
  0xea   :  { %1016 = vmatpush.msra.mxu0 %v4621_v62  ;;  %1043 = vmatpush.msra.mxu1 %v1032_v2 }
  0xeb   :  { %v4636_v6 = vpop.f32.mrf.mxu2  ;;  %v4643_v10 = vpop.f32.mrf.mxu0 }
  0xec   :  { %v4638_v7 = vpop.f32.mrf.mxu3  ;;  %1017 = vmatpush.msra.mxu0 %v4626_v1  ;;  %1044 = vmatpush.msra.mxu1 %v1031_v5  ;;  %v4645_v11 = vpop.f32.mrf.mxu1 }
  0xee   :  { %1018 = vmatpush.msra.mxu0 %v4631_v4  ;;  %1045 = vmatpush.msra.mxu1 %v1030_v12  ;;  %v993_v12 = vsel %vm992_vm3, %v4084_v47, %v989_v3 }
  0xef   :  { %v998_v13 = vsel %vm995_vm4, %v997_v63, %v993_v12 }
  0xf0   :  { %1019 = vmatpush.msra.mxu0 %v4640_v9  ;;  %1046 = vmatpush.msra.mxu1 %v1029_v15  ;;  %4012 = vpush %v998_v13 }
  0xf2   :  { %1020 = vmatpush.msra.mxu0 %v4649_v14  ;;  %1047 = vmatpush.msra.mxu1 %v1028_v17 }
  0xf3   :  { %v4663_v19 = vpop.f32.mrf.mxu2  ;;  %v628_v21 = vpop.f32.mrf.mxu0 }
  0xf4   :  { %v4665_v20 = vpop.f32.mrf.mxu3  ;;  %1021 = vmatpush.msra.mxu0 %v4655_v16  ;;  %1048 = vmatpush.msra.mxu1 %v1027_v18  ;;  %v4668_v22 = vpop.f32.mrf.mxu1 }
  0xf5   :  { %3559 = vmatmul.msk.f32.vlgmr.msra.gmra.mxu0 %vm1002_vm0, %v4242_v24 }
  0xf6   :  { %1049 = vmatpush.msra.mxu1 %v1026_v23 }
  0xf7   :  { %3560 = vmatmul.msk.f32.vlgmr.msra.gmra.mxu1 %vm1002_vm0, %v4242_v24 }
  0xfb   :  { %v4676_v26 = vpop.f32.mrf.mxu2  ;;  %v630_v28 = vpop.f32.mrf.mxu0 }
  0xfc   :  { %v4678_v27 = vpop.f32.mrf.mxu3  ;;  %v724_v30 = vpop.f32.mrf.mxu1  ;;  %v631_v23 = vadd.f32 %v630_v28, %v4603_v37  ;;  %v624_v37 = vadd.f32 %v4617_v59, %v4597_v25 }
  0xfe   :  { %v740_v47 = vadd.f32 %v724_v30, %v631_v23  ;;  %v737_v59 = vadd.f32 %v4619_v60, %v624_v37 }
 0x103   :  { %v826_v31 = vpop.f32.mrf.mxu2  ;;  %v633_v34 = vpop.f32.mrf.mxu0 }
 0x104   :  { %v4680_v32 = vpop.f32.mrf.mxu3  ;;  %v727_v35 = vpop.f32.mrf.mxu1  ;;  %v634_v15 = vadd.f32 %v633_v34, %v4605_v41 }
 0x106   :  { %v741_v52 = vadd.f32 %v727_v35, %v634_v15 }
 0x10b   :  { %v829_v36 = vpop.f32.mrf.mxu2  ;;  %v635_v39 = vpop.f32.mrf.mxu0 }
 0x10c   :  { %v963_v38 = vpop.f32.mrf.mxu3  ;;  %v729_v40 = vpop.f32.mrf.mxu1  ;;  %v636_v5 = vadd.f32 %v635_v39, %v4607_v45  ;;  %v843_v41 = vadd.f32 %v829_v36, %v741_v52 }
 0x10e   :  { %v742_v42 = vadd.f32 %v729_v40, %v636_v5  ;;  %v842_v40 = vadd.f32 %v826_v31, %v740_v47  ;;  %v4704_v30 = vadd.f32 %v963_v38, %v843_v41 }
 0x110   :  { %v4712_v31 = vadd.f32 %v4680_v32, %v842_v40  ;;  %v1127_v60 = vmul.f32 %v4704_v30, %v4704_v30 }
 0x112   :  { %v1126_v32 = vmul.f32 %v4712_v31, %v4712_v31 }
 0x113   :  { %v831_v43 = vpop.f32.mrf.mxu2  ;;  %v638_v46 = vpop.f32.mrf.mxu0 }
 0x114   :  { %v965_v44 = vpop.f32.mrf.mxu3  ;;  %v732_v50 = vpop.f32.mrf.mxu1  ;;  %v639_v0 = vadd.f32 %v638_v46, %v4609_v49  ;;  %v629_v46 = vadd.f32 %v628_v21, %v4601_v33  ;;  %v844_v53 = vadd.f32 %v831_v43, %v742_v42 }
 0x116   :  { %v743_v17 = vadd.f32 %v732_v50, %v639_v0  ;;  %v739_v28 = vadd.f32 %v4668_v22, %v629_v46  ;;  %v4697_v33 = vadd.f32 %v965_v44, %v844_v53 }
 0x11b   :  { %v834_v56 = vpop.f32.mrf.mxu2  ;;  %v640_v2 = vpop.f32.mrf.mxu0 }
 0x11c   :  { %v968_v61 = vpop.f32.mrf.mxu3  ;;  %v641_v8 = vadd.f32 %v640_v2, %v4611_v55  ;;  %v734_v18 = vpop.f32.mrf.mxu1  ;;  %v845_v48 = vadd.f32 %v834_v56, %v743_v17  ;;  %v626_v55 = vadd.f32 %v4643_v10, %v4599_v29  ;;  %v841_v10 = vadd.f32 %v4676_v26, %v739_v28  ;;  %v4759_v17 = vld [vmem:[%s6668_s6] sm:$0x3] }
 0x11d   :  { %v839_v26 = vadd.f32 %v4636_v6, %v737_v59 }
 0x11e   :  { %v744_v51 = vadd.f32 %v734_v18, %v641_v8  ;;  %v4690_v34 = vadd.f32 %v968_v61, %v845_v48  ;;  %v738_v29 = vadd.f32 %v4645_v11, %v626_v55  ;;  %v1128_v11 = vmul.f32 %v4697_v33, %v4697_v33  ;;  %v4753_v8 = vld [vmem:[%s6667_s5] sm:$0x3] }
 0x11f   :  { %v4719_v35 = vadd.f32 %v4678_v27, %v841_v10  ;;  %v4731_v6 = vadd.f32 %v4638_v7, %v839_v26  ;;  %v3677_v26 = vld [vmem:[%s6669_s7 + $0x1e0] sm:$0xf] }
 0x120   :  { %v1129_v25 = vmul.f32 %v4690_v34, %v4690_v34  ;;  %v840_v22 = vadd.f32 %v4663_v19, %v738_v29 }
 0x121   :  { %v1125_v27 = vmul.f32 %v4719_v35, %v4719_v35  ;;  %v1123_v36 = vmul.f32 %v4731_v6, %v4731_v6  ;;  %s4013_s27 = spop %4012 }
 0x122   :  { %v4725_v19 = vadd.f32 %v4665_v20, %v840_v22  ;;  %v4746_v7 = vstv %s4013_s27 }
 0x123   :  { %v836_v49 = vpop.f32.mrf.mxu2 }
 0x124   :  { %v846_v45 = vadd.f32 %v836_v49, %v744_v51  ;;  %v970_v39 = vpop.f32.mrf.mxu3  ;;  %v1124_v20 = vmul.f32 %v4725_v19, %v4725_v19 }
 0x126   :  { %v4692_v50 = vadd.f32 %v970_v39, %v846_v45 }
 0x128   :  { %v1130_v21 = vmul.f32 %v4692_v50, %v4692_v50  ;;  %1111 = vmatpush.msra.mxu2 %v4692_v50 }
 0x12a   :  { %1112 = vmatpush.msra.mxu2 %v4690_v34  ;;  %1139 = vmatpush.msra.mxu3 %v1130_v21 }
 0x12c   :  { %1113 = vmatpush.msra.mxu2 %v4697_v33  ;;  %1140 = vmatpush.msra.mxu3 %v1129_v25 }
 0x12e   :  { %1114 = vmatpush.msra.mxu2 %v4704_v30  ;;  %1141 = vmatpush.msra.mxu3 %v1128_v11 }
 0x130   :  { %1115 = vmatpush.msra.mxu2 %v4712_v31  ;;  %1142 = vmatpush.msra.mxu3 %v1127_v60  ;;  %v3975_v60 = vld [vmem:[%s6669_s7 + $0x1ec] sm:$0xf0] }
 0x132   :  { %1116 = vmatpush.msra.mxu2 %v4719_v35  ;;  %1143 = vmatpush.msra.mxu3 %v1126_v32  ;;  %v3973_v32 = vld [vmem:[%s6669_s7 + $0x1e4] sm:$0xf] }
 0x134   :  { %1117 = vmatpush.msra.mxu2 %v4725_v19  ;;  %1144 = vmatpush.msra.mxu3 %v1125_v27  ;;  %v3678_v27 = vor.u32 %v3975_v60, %v3677_v26  ;;  %v3959_v26 = vld [vmem:[%s6669_s7 + $0x16c] sm:$0xf0]  ;;  %v3957_v60 = vld [vmem:[%s6669_s7 + $0x164] sm:$0xf] }
 0x136   :  { %1118 = vmatpush.msra.mxu2 %v4731_v6  ;;  %1145 = vmatpush.msra.mxu3 %v1124_v20  ;;  %v3679_v20 = vld [vmem:[%s6669_s7 + $0x1f0] sm:$0xf0] }
 0x137   :  { %3561 = vmatmul.msk.f32.vlgmr.msra.gmra.mxu2 %vm1002_vm0, %v4242_v24  ;;  %1437 = vmatpush.bf16.msrb.mxu0 %v3678_v27  ;;  %v3615_v27 = vld [vmem:[%s6669_s7 + $0x170] sm:$0xf0] }
 0x138   :  { %1146 = vmatpush.msra.mxu3 %v1123_v36  ;;  %v3685_v36 = vld [vmem:[%s6669_s7 + $0x1e8] sm:$0xf] }
 0x139   :  { %3562 = vmatmul.msk.f32.vlgmr.msra.gmra.mxu3 %vm1002_vm0, %v4242_v24 }
 0x172   :  { %v1023_v38 = vpop.f32.mrf.mxu0 }
 0x173   :  { %v1055_v43 = vmul.f32 %v4746_v7, %v1023_v38  ;;  %v3976_v38 = vld [vmem:[%s6669_s7 + $0x1f4] sm:$0xf0] }
 0x174   :  { %v1051_v44 = vpop.f32.mrf.mxu1 }
 0x175   :  { %v1057_v54 = vmul.f32 %v1055_v43, %v1055_v43  ;;  %v1056_v56 = vmul.f32 %v4746_v7, %v1051_v44  ;;  %v3686_v44 = vor.u32 %v3976_v38, %v3685_v36  ;;  %v3960_v36 = vld [vmem:[%s6669_s7 + $0x174] sm:$0xf0]  ;;  %v3618_v38 = vor.u32 %v3957_v60, %v3615_v27 }
 0x177   :  { %v1058_v61 = vsub.f32 %v1056_v56, %v1057_v54  ;;  %v3974_v54 = vld [vmem:[%s6669_s7 + $0x1ec] sm:$0xf]  ;;  %v3687_v56 = vld [vmem:[%s6669_s7 + $0x1f8] sm:$0xf0]  ;;  %1495 = vmatpush.bf16.msrb.mxu2 %v3686_v44 }
 0x178   :  { %v3958_v44 = vld [vmem:[%s6669_s7 + $0x16c] sm:$0xf] }
 0x179   :  { %v1059_v63 = vadd.f32 1e-05, %v1058_v61  ;;  %v3690_v61 = vor.u32 %v3974_v54, %v3687_v56  ;;  %v3623_v54 = vld [vmem:[%s6669_s7 + $0x178] sm:$0xf0] }
 0x17a   :  { %v3626_v56 = vor.u32 %v3958_v44, %v3623_v54  ;;  %v1167_v54 = vrot.slane %v4753_v8, 1 }
 0x17b   :  { %4085 = vrsqrt.f32 %v1059_v63  ;;  %vm1066_vm5 = vweird.f32 %v1059_v63  ;;  %1524 = vmatpush.bf16.msrb.mxu3 %v3690_v61  ;;  %v3597_v61 = vld [vmem:[%s6669_s7 + $0x140] sm:$0xf] }
 0x181   :  { %v4086_v0 = vpop.eup %4085 }
 0x182   :  { %v1061_v2 = vmul.f32 %v4086_v0, %v1059_v63  ;;  %vm1067_vm6 = vweird.f32 %v4086_v0  ;;  %v3661_v63 = vld [vmem:[%s6669_s7 + $0x1c0] sm:$0xf] }
 0x183   :  { %vm1068_vm7 = vmor %vm1066_vm5, %vm1067_vm6 }
 0x184   :  { %v1062_v3 = vmul.f32 %v4086_v0, %v1061_v2  ;;  %v3969_v2 = vld [vmem:[%s6669_s7 + $0x1c4] sm:$0xf] }
 0x186   :  { %v1063_v5 = vmul.f32 0.5, %v1062_v3 }
 0x188   :  { %v1064_v24 = vsub.f32 1.5, %v1063_v5  ;;  %v3663_v5 = vld [vmem:[%s6669_s7 + $0x1d0] sm:$0xf0] }
 0x18a   :  { %v1065_v12 = vmul.f32 %v4086_v0, %v1064_v24  ;;  %v3669_v24 = vld [vmem:[%s6669_s7 + $0x1c8] sm:$0xf] }
 0x18c   :  { %v1069_v13 = vsel %vm1068_vm7, %v4086_v0, %v1065_v12  ;;  %v3971_v0 = vld [vmem:[%s6669_s7 + $0x1cc] sm:$0xf0]  ;;  %v3972_v12 = vld [vmem:[%s6669_s7 + $0x1d4] sm:$0xf0] }
 0x18d   :  { %v1070_v15 = vmul.f32 %v1069_v13, %v4753_v8  ;;  %v3662_v3 = vor.u32 %v3971_v0, %v3661_v63  ;;  %v3666_v13 = vor.u32 %v3969_v2, %v3663_v5  ;;  %v3955_v63 = vld [vmem:[%s6669_s7 + $0x14c] sm:$0xf0]  ;;  %v3953_v0 = vld [vmem:[%s6669_s7 + $0x144] sm:$0xf]  ;;  %v3605_v5 = vld [vmem:[%s6669_s7 + $0x148] sm:$0xf] }
 0x18e   :  { %v3598_v2 = vor.u32 %v3955_v63, %v3597_v61 }
 0x18f   :  { %v1071_v18 = vmul.f32 %v1070_v15, %v1055_v43  ;;  %v1074_v23 = vperm.slane %v1070_v15, 0  ;;  %v3682_v43 = vor.u32 %v3973_v32, %v3679_v20  ;;  %v3670_v15 = vor.u32 %v3972_v12, %v3669_v24  ;;  %1438 = vmatpush.bf16.msrb.mxu0 %v3662_v3  ;;  %v3621_v20 = vld [vmem:[%s6669_s7 + $0x168] sm:$0xf]  ;;  %v3599_v3 = vld [vmem:[%s6669_s7 + $0x150] sm:$0xf0] }
 0x190   :  { %v3956_v24 = vld [vmem:[%s6669_s7 + $0x154] sm:$0xf0]  ;;  %v3602_v12 = vor.u32 %v3953_v0, %v3599_v3  ;;  %v1172_v0 = vrot.slane %v4759_v17, 1 }
 0x191   :  { %v1072_v42 = vsub.f32 %v4759_v17, %v1071_v18  ;;  %v1076_v48 = vmul.f32 %v1074_v23, %v4655_v16  ;;  %v1077_v49 = vmul.f32 %v1074_v23, %v4649_v14  ;;  %v1078_v46 = vmul.f32 %v1074_v23, %v4640_v9  ;;  %1466 = vmatpush.bf16.msrb.mxu1 %v3682_v43  ;;  %v3970_v18 = vld [vmem:[%s6669_s7 + $0x1cc] sm:$0xf]  ;;  %v3805_v17 = vld [vmem:[%s6669_s7 + $0xe0] sm:$0xf] }
 0x192   :  { %v1079_v52 = vmul.f32 %v1074_v23, %v4631_v4  ;;  %v1080_v53 = vmul.f32 %v1074_v23, %v4626_v1  ;;  %v1081_v45 = vmul.f32 %v1074_v23, %v4621_v62  ;;  %v1082_v55 = vmul.f32 %v1074_v23, %v4613_v57  ;;  %1496 = vmatpush.bf16.msrb.mxu2 %v3670_v15  ;;  %v3954_v15 = vld [vmem:[%s6669_s7 + $0x14c] sm:$0xf] }
 0x193   :  { %v1085_v51 = vperm.slane %v1072_v42, 0  ;;  %v1083_v39 = vmul.f32 %v1074_v23, %v4615_v58  ;;  %v3671_v23 = vld [vmem:[%s6669_s7 + $0x1d8] sm:$0xf0]  ;;  %v3622_v43 = vor.u32 %v3960_v36, %v3621_v20 }
 0x194   :  { %v3674_v42 = vor.u32 %v3970_v18, %v3671_v23  ;;  %v3607_v18 = vld [vmem:[%s6669_s7 + $0x158] sm:$0xf0] }
 0x195   :  { %v1087_v47 = vadd.f32 %v1085_v51, %v1076_v48  ;;  %v1088_v41 = vadd.f32 %v1085_v51, %v1077_v49  ;;  %v1089_v37 = vadd.f32 %v1085_v51, %v1078_v46  ;;  %v1090_v28 = vadd.f32 %v1085_v51, %v1079_v52  ;;  %1467 = vmatpush.bf16.msrb.mxu1 %v3666_v13  ;;  %v3645_v48 = vld [vmem:[%s6669_s7 + $0x1a0] sm:$0xf]  ;;  %v3965_v49 = vld [vmem:[%s6669_s7 + $0x1a4] sm:$0xf]  ;;  %v3647_v52 = vld [vmem:[%s6669_s7 + $0x1b0] sm:$0xf0] }
 0x196   :  { %v1091_v16 = vadd.f32 %v1085_v51, %v1080_v53  ;;  %v1092_v40 = vadd.f32 %v1085_v51, %v1081_v45  ;;  %v1093_v21 = vadd.f32 %v1085_v51, %v1082_v55  ;;  %v1094_v14 = vadd.f32 %v1085_v51, %v1083_v39  ;;  %v3967_v51 = vld [vmem:[%s6669_s7 + $0x1ac] sm:$0xf0]  ;;  %1525 = vmatpush.bf16.msrb.mxu3 %v3674_v42  ;;  %v3653_v53 = vld [vmem:[%s6669_s7 + $0x1a8] sm:$0xf]  ;;  %v3968_v45 = vld [vmem:[%s6669_s7 + $0x1b4] sm:$0xf0] }
 0x197   :  { %v1095_v29 = vmax.f32 %v1087_v47, 0.0  ;;  %v1096_v9 = vmax.f32 %v1088_v41, 0.0  ;;  %v1097_v10 = vmax.f32 %v1089_v37, 0.0  ;;  %v1098_v4 = vmax.f32 %v1090_v28, 0.0  ;;  %v3966_v47 = vld [vmem:[%s6669_s7 + $0x1ac] sm:$0xf] }
 0x198   :  { %v1099_v25 = vmax.f32 %v1091_v16, 0.0  ;;  %v1100_v1 = vmax.f32 %v1092_v40, 0.0  ;;  %v1101_v59 = vmax.f32 %v1093_v21, 0.0  ;;  %v1102_v62 = vmax.f32 %v1094_v14, 0.0  ;;  %v3655_v41 = vld [vmem:[%s6669_s7 + $0x1b8] sm:$0xf0] }
 0x199   :  { %v4770_v22 = vpack.c.bf16 %v1096_v9, %v1095_v29  ;;  %v4772_v57 = vpack.c.bf16 %v1098_v4, %v1097_v10  ;;  %v3646_v46 = vor.u32 %v3967_v51, %v3645_v48  ;;  %v3650_v55 = vor.u32 %v3965_v49, %v3647_v52  ;;  %v3629_v28 = vld [vmem:[%s6669_s7 + $0x180] sm:$0xf]  ;;  %v3963_v16 = vld [vmem:[%s6669_s7 + $0x18c] sm:$0xf0]  ;;  %v3961_v40 = vld [vmem:[%s6669_s7 + $0x184] sm:$0xf] }
 0x19a   :  { %v4774_v58 = vpack.c.bf16 %v1100_v1, %v1099_v25  ;;  %v4776_v11 = vpack.c.bf16 %v1102_v62, %v1101_v59  ;;  %v3654_v39 = vor.u32 %v3968_v45, %v3653_v53  ;;  %v3658_v37 = vor.u32 %v3966_v47, %v3655_v41  ;;  %v3631_v14 = vld [vmem:[%s6669_s7 + $0x190] sm:$0xf0]  ;;  %v3637_v29 = vld [vmem:[%s6669_s7 + $0x188] sm:$0xf]  ;;  %v3964_v9 = vld [vmem:[%s6669_s7 + $0x194] sm:$0xf0] }
 0x19b   :  { %1439 = vmatpush.bf16.msrb.mxu0 %v3646_v46  ;;  %1468 = vmatpush.bf16.msrb.mxu1 %v3650_v55  ;;  %v3630_v21 = vor.u32 %v3963_v16, %v3629_v28  ;;  %v3634_v10 = vor.u32 %v3961_v40, %v3631_v14  ;;  %v3638_v4 = vor.u32 %v3964_v9, %v3637_v29  ;;  %v3962_v25 = vld [vmem:[%s6669_s7 + $0x18c] sm:$0xf]  ;;  %v3639_v1 = vld [vmem:[%s6669_s7 + $0x198] sm:$0xf0]  ;;  %v3613_v62 = vld [vmem:[%s6669_s7 + $0x160] sm:$0xf] }
 0x19c   :  { %1497 = vmatpush.bf16.msrb.mxu2 %v3654_v39  ;;  %1526 = vmatpush.bf16.msrb.mxu3 %v3658_v37  ;;  %v3642_v59 = vor.u32 %v3962_v25, %v3639_v1  ;;  %v3614_v32 = vor.u32 %v3959_v26, %v3613_v62  ;;  %v3606_v13 = vor.u32 %v3956_v24, %v3605_v5  ;;  %v3581_v42 = vld [vmem:[%s6669_s7 + $0x120] sm:$0xf]  ;;  %v3951_v48 = vld [vmem:[%s6669_s7 + $0x12c] sm:$0xf0]  ;;  %v3949_v51 = vld [vmem:[%s6669_s7 + $0x124] sm:$0xf] }
 0x19d   :  { %v3610_v23 = vor.u32 %v3954_v15, %v3607_v18  ;;  %v3582_v46 = vor.u32 %v3951_v48, %v3581_v42  ;;  %v3583_v52 = vld [vmem:[%s6669_s7 + $0x130] sm:$0xf0]  ;;  %v3589_v53 = vld [vmem:[%s6669_s7 + $0x128] sm:$0xf]  ;;  %v3952_v45 = vld [vmem:[%s6669_s7 + $0x134] sm:$0xf0] }
 0x19e   :  { %v3586_v39 = vor.u32 %v3949_v51, %v3583_v52  ;;  %v3590_v47 = vor.u32 %v3952_v45, %v3589_v53  ;;  %v3950_v41 = vld [vmem:[%s6669_s7 + $0x12c] sm:$0xf]  ;;  %v3591_v37 = vld [vmem:[%s6669_s7 + $0x138] sm:$0xf0]  ;;  %v3565_v28 = vld [vmem:[%s6669_s7 + $0x100] sm:$0xf] }
 0x19f   :  { %1440 = vmatpush.bf16.msrb.mxu0 %v3630_v21  ;;  %1469 = vmatpush.bf16.msrb.mxu1 %v3634_v10  ;;  %v3594_v40 = vor.u32 %v3950_v41, %v3591_v37  ;;  %v3947_v21 = vld [vmem:[%s6669_s7 + $0x10c] sm:$0xf0]  ;;  %v3945_v14 = vld [vmem:[%s6669_s7 + $0x104] sm:$0xf]  ;;  %v3567_v29 = vld [vmem:[%s6669_s7 + $0x110] sm:$0xf0] }
 0x1a0   :  { %1498 = vmatpush.bf16.msrb.mxu2 %v3638_v4  ;;  %1527 = vmatpush.bf16.msrb.mxu3 %v3642_v59  ;;  %v3566_v4 = vor.u32 %v3947_v21, %v3565_v28  ;;  %v3573_v25 = vld [vmem:[%s6669_s7 + $0x108] sm:$0xf]  ;;  %v3948_v1 = vld [vmem:[%s6669_s7 + $0x114] sm:$0xf0]  ;;  %v3946_v59 = vld [vmem:[%s6669_s7 + $0x10c] sm:$0xf]  ;;  %v3570_v62 = vor.u32 %v3945_v14, %v3567_v29 }
 0x1a1   :  { %v3574_v26 = vor.u32 %v3948_v1, %v3573_v25  ;;  %v3943_v48 = vld [vmem:[%s6669_s7 + $0xec] sm:$0xf0]  ;;  %v3807_v51 = vld [vmem:[%s6669_s7 + $0xf0] sm:$0xf0]  ;;  %v3942_v45 = vld [vmem:[%s6669_s7 + $0xec] sm:$0xf] }
 0x1a2   :  { %v3939_v41 = vld [vmem:[%s6669_s7 + $0xcc] sm:$0xf0]  ;;  %v3937_v37 = vld [vmem:[%s6669_s7 + $0xc4] sm:$0xf]  ;;  %v3791_v28 = vld [vmem:[%s6669_s7 + $0xd0] sm:$0xf0] }
 0x1a3   :  { %1441 = vmatpush.bf16.msrb.mxu0 %v3614_v32  ;;  %1470 = vmatpush.bf16.msrb.mxu1 %v3618_v38  ;;  %v3797_v21 = vld [vmem:[%s6669_s7 + $0xc8] sm:$0xf]  ;;  %v3940_v14 = vld [vmem:[%s6669_s7 + $0xd4] sm:$0xf0]  ;;  %v3938_v29 = vld [vmem:[%s6669_s7 + $0xcc] sm:$0xf] }
 0x1a4   :  { %1499 = vmatpush.bf16.msrb.mxu2 %v3622_v43  ;;  %1528 = vmatpush.bf16.msrb.mxu3 %v3626_v56  ;;  %v3799_v25 = vld [vmem:[%s6669_s7 + $0xd8] sm:$0xf0]  ;;  %v3773_v1 = vld [vmem:[%s6669_s7 + $0xa0] sm:$0xf] }
 0x1a7   :  { %1442 = vmatpush.bf16.msrb.mxu0 %v3598_v2  ;;  %1471 = vmatpush.bf16.msrb.mxu1 %v3602_v12 }
 0x1a8   :  { %1500 = vmatpush.bf16.msrb.mxu2 %v3606_v13  ;;  %1529 = vmatpush.bf16.msrb.mxu3 %v3610_v23 }
 0x1ab   :  { %1443 = vmatpush.bf16.msrb.mxu0 %v3582_v46  ;;  %1472 = vmatpush.bf16.msrb.mxu1 %v3586_v39  ;;  %v3944_v46 = vld [vmem:[%s6669_s7 + $0xf4] sm:$0xf0]  ;;  %v3789_v39 = vld [vmem:[%s6669_s7 + $0xc0] sm:$0xf] }
 0x1ac   :  { %1501 = vmatpush.bf16.msrb.mxu2 %v3590_v47  ;;  %1530 = vmatpush.bf16.msrb.mxu3 %v3594_v40  ;;  %v3794_v40 = vor.u32 %v3937_v37, %v3791_v28  ;;  %v3923_v28 = vld [vmem:[%s6669_s7 + $0x4c] sm:$0xf0] }
 0x1af   :  { %1444 = vmatpush.bf16.msrb.mxu0 %v3566_v4  ;;  %1473 = vmatpush.bf16.msrb.mxu1 %v3570_v62  ;;  %v3798_v4 = vor.u32 %v3940_v14, %v3797_v21  ;;  %v3802_v62 = vor.u32 %v3938_v29, %v3799_v25  ;;  %v3733_v29 = vld [vmem:[%s6669_s7 + $0x48] sm:$0xf]  ;;  %v3709_v25 = vld [vmem:[%s6669_s7 + $0x20] sm:$0xf] }
 0x1b0   :  { %1502 = vmatpush.bf16.msrb.mxu2 %v3574_v26  ;;  %v3781_v26 = vld [vmem:[%s6669_s7 + $0xa8] sm:$0xf] }
 0x1ba   :  { %v1120_v49 = vpop.f32.mrf.mxu2 }
 0x1bb   :  { %v1151_v55 = vmul.f32 %v1120_v49, %v4746_v7  ;;  %v3813_v49 = vld [vmem:[%s6669_s7 + $0xe8] sm:$0xf] }
 0x1bc   :  { %v1148_v16 = vpop.f32.mrf.mxu3  ;;  %v3814_v53 = vor.u32 %v3944_v46, %v3813_v49  ;;  %v3743_v49 = vld [vmem:[%s6669_s7 + $0x70] sm:$0xf0]  ;;  %v3749_v46 = vld [vmem:[%s6669_s7 + $0x68] sm:$0xf] }
 0x1bd   :  { %v1153_v9 = vmul.f32 %v1151_v55, %v1151_v55  ;;  %v1152_v10 = vmul.f32 %v1148_v16, %v4746_v7  ;;  %v3575_v7 = vld [vmem:[%s6669_s7 + $0x118] sm:$0xf0]  ;;  %v3790_v16 = vor.u32 %v3939_v41, %v3789_v39 }
 0x1be   :  { %v3578_v32 = vor.u32 %v3946_v59, %v3575_v7  ;;  %1771 = vmatpush.bf16.msra.mxu2 %v3814_v53  ;;  %v3935_v59 = vld [vmem:[%s6669_s7 + $0xac] sm:$0xf0]  ;;  %v3751_v39 = vld [vmem:[%s6669_s7 + $0x78] sm:$0xf0] }
 0x1bf   :  { %v1154_v60 = vsub.f32 %v1152_v10, %v1153_v9 }
 0x1c0   :  { %1531 = vmatpush.bf16.msrb.mxu3 %v3578_v32  ;;  %v3774_v32 = vor.u32 %v3935_v59, %v3773_v1  ;;  %v3919_v1 = vld [vmem:[%s6669_s7 + $0x2c] sm:$0xf0] }
 0x1c1   :  { %v1155_v27 = vadd.f32 1e-05, %v1154_v60 }
 0x1c2   :  { %1772 = vmatpush.bf16.msra.mxu2 %v3798_v4 }
 0x1c3   :  { %4087 = vrsqrt.f32 %v1155_v27  ;;  %vm1162_vm9 = vweird.f32 %v1155_v27 }
 0x1c9   :  { %v4088_v20 = vpop.eup %4087 }
 0x1ca   :  { %v1157_v36 = vmul.f32 %v4088_v20, %v1155_v27  ;;  %vm1163_vm8 = vweird.f32 %v4088_v20  ;;  %v3936_v27 = vld [vmem:[%s6669_s7 + $0xb4] sm:$0xf0] }
 0x1cb   :  { %vm1164_vm10 = vmor %vm1162_vm9, %vm1163_vm8 }
 0x1cc   :  { %v1158_v38 = vmul.f32 %v4088_v20, %v1157_v36  ;;  %v3783_v36 = vld [vmem:[%s6669_s7 + $0xb8] sm:$0xf0] }
 0x1ce   :  { %v1159_v43 = vmul.f32 0.5, %v1158_v38 }
 0x1d0   :  { %v1160_v44 = vsub.f32 1.5, %v1159_v43  ;;  %v3782_v43 = vor.u32 %v3936_v27, %v3781_v26  ;;  %v3711_v26 = vld [vmem:[%s6669_s7 + $0x30] sm:$0xf0]  ;;  %v3918_v27 = vld [vmem:[%s6669_s7 + $0x2c] sm:$0xf] }
 0x1d2   :  { %v1161_v56 = vmul.f32 %v4088_v20, %v1160_v44  ;;  %v3757_v44 = vld [vmem:[%s6669_s7 + $0x80] sm:$0xf]  ;;  %1773 = vmatpush.bf16.msra.mxu2 %v3782_v43 }
 0x1d3   :  { %v3693_v43 = vld [vmem:[%s6669_s7] sm:$0xf] }
 0x1d4   :  { %v1165_v61 = vsel %vm1164_vm10, %v4088_v20, %v1161_v56  ;;  %v3934_v20 = vld [vmem:[%s6669_s7 + $0xac] sm:$0xf]  ;;  %v3929_v56 = vld [vmem:[%s6669_s7 + $0x84] sm:$0xf] }
 0x1d5   :  { %v1169_v63 = vmul.f32 %v1167_v54, %v1165_v61  ;;  %v3931_v54 = vld [vmem:[%s6669_s7 + $0x8c] sm:$0xf0]  ;;  %v3786_v61 = vor.u32 %v3934_v20, %v3783_v36  ;;  %v3719_v20 = vld [vmem:[%s6669_s7 + $0x38] sm:$0xf0] }
 0x1d7   :  { %v1170_v2 = vmul.f32 %v1169_v63, %v1151_v55  ;;  %v4976_v3 = vperm.slane %v1169_v63, 0  ;;  %v3815_v55 = vld [vmem:[%s6669_s7 + $0xf8] sm:$0xf0]  ;;  %v3759_v63 = vld [vmem:[%s6669_s7 + $0x90] sm:$0xf0] }
 0x1d8   :  { %v3818_v47 = vor.u32 %v3942_v45, %v3815_v55  ;;  %v3926_v55 = vld [vmem:[%s6669_s7 + $0x6c] sm:$0xf] }
 0x1d9   :  { %v1174_v5 = vsub.f32 %v1172_v0, %v1170_v2  ;;  %v1178_v12 = vmul.f32 %v4976_v3, %v4731_v6  ;;  %v1179_v13 = vmul.f32 %v4976_v3, %v4725_v19  ;;  %v3941_v6 = vld [vmem:[%s6669_s7 + $0xe4] sm:$0xf]  ;;  %v3806_v19 = vor.u32 %v3943_v48, %v3805_v17  ;;  %v3765_v0 = vld [vmem:[%s6669_s7 + $0x88] sm:$0xf]  ;;  %v3932_v2 = vld [vmem:[%s6669_s7 + $0x94] sm:$0xf0] }
 0x1da   :  { %v3810_v52 = vor.u32 %v3941_v6, %v3807_v51  ;;  %v1180_v9 = vmul.f32 %v4976_v3, %v4719_v35  ;;  %v1181_v10 = vmul.f32 %v4976_v3, %v4712_v31  ;;  %1800 = vmatpush.bf16.msra.mxu3 %v3818_v47  ;;  %v3933_v35 = vld [vmem:[%s6669_s7 + $0xa4] sm:$0xf]  ;;  %v3775_v31 = vld [vmem:[%s6669_s7 + $0xb0] sm:$0xf0]  ;;  %v3741_v48 = vld [vmem:[%s6669_s7 + $0x60] sm:$0xf]  ;;  %v1182_v41 = vmul.f32 %v4976_v3, %v4704_v30 }
 0x1db   :  { %v4978_v24 = vperm.slane %v1174_v5, 0  ;;  %1713 = vmatpush.bf16.msra.mxu0 %v3806_v19  ;;  %v3778_v38 = vor.u32 %v3933_v35, %v3775_v31  ;;  %v3927_v6 = vld [vmem:[%s6669_s7 + $0x6c] sm:$0xf0]  ;;  %v3925_v19 = vld [vmem:[%s6669_s7 + $0x64] sm:$0xf]  ;;  %v3754_v37 = vor.u32 %v3926_v55, %v3751_v39  ;;  %v1183_v21 = vmul.f32 %v4976_v3, %v4697_v33  ;;  %v1968_v55 = vld [vmem:[%s6671_s9 + $0x1d8] sm:$0xff] }
 0x1dc   :  { %1742 = vmatpush.bf16.msra.mxu1 %v3810_v52  ;;  %v3742_v51 = vor.u32 %v3927_v6, %v3741_v48  ;;  %v3928_v52 = vld [vmem:[%s6669_s7 + $0x74] sm:$0xf0]  ;;  %v3746_v53 = vor.u32 %v3925_v19, %v3743_v49  ;;  %v3725_v47 = vld [vmem:[%s6669_s7 + $0x40] sm:$0xf]  ;;  %v3735_v33 = vld [vmem:[%s6669_s7 + $0x58] sm:$0xf0]  ;;  %v1185_v48 = vmul.f32 %v4976_v3, %v4692_v50 }
 0x1dd   :  { %v1189_v8 = vadd.f32 %v4978_v24, %v1178_v12  ;;  %v1190_v15 = vadd.f32 %v4978_v24, %v1179_v13  ;;  %v1191_v7 = vadd.f32 %v4978_v24, %v1180_v9  ;;  %v1192_v60 = vadd.f32 %v4978_v24, %v1181_v10  ;;  %v3924_v9 = vld [vmem:[%s6669_s7 + $0x54] sm:$0xf0]  ;;  %v3922_v10 = vld [vmem:[%s6669_s7 + $0x4c] sm:$0xf]  ;;  %v3917_v31 = vld [vmem:[%s6669_s7 + $0x24] sm:$0xf] }
 0x1de   :  { %1801 = vmatpush.bf16.msra.mxu3 %v3802_v62  ;;  %v3758_v13 = vor.u32 %v3931_v54, %v3757_v44  ;;  %v3750_v45 = vor.u32 %v3928_v52, %v3749_v46  ;;  %v3726_v30 = vor.u32 %v3923_v28, %v3725_v47  ;;  %v3734_v4 = vor.u32 %v3924_v9, %v3733_v29  ;;  %v3915_v44 = vld [vmem:[%s6669_s7 + $0xc] sm:$0xf0]  ;;  %v1969_v50 = vld [vmem:[%s6671_s9 + $0x1e0] sm:$0xff]  ;;  %v1962_v47 = vld [vmem:[%s6671_s9 + $0x1a8] sm:$0xff] }
 0x1df   :  { %v1197_v18 = vmax.f32 %v1189_v8, 0.0  ;;  %v1198_v23 = vmax.f32 %v1190_v15, 0.0  ;;  %1714 = vmatpush.bf16.msra.mxu0 %v3790_v16  ;;  %v1199_v5 = vmax.f32 %v1191_v7, 0.0  ;;  %v1200_v12 = vmax.f32 %v1192_v60, 0.0  ;;  %v3921_v16 = vld [vmem:[%s6669_s7 + $0x44] sm:$0xf] }
 0x1e0   :  { %1743 = vmatpush.bf16.msra.mxu1 %v3794_v40  ;;  %v3762_v8 = vor.u32 %v3929_v56, %v3759_v63  ;;  %v3766_v15 = vor.u32 %v3932_v2, %v3765_v0  ;;  %v3727_v40 = vld [vmem:[%s6669_s7 + $0x50] sm:$0xf0]  ;;  %v1193_v59 = vadd.f32 %v4978_v24, %v1182_v41  ;;  %v1194_v62 = vadd.f32 %v4978_v24, %v1183_v21  ;;  %v3717_v7 = vld [vmem:[%s6669_s7 + $0x28] sm:$0xf]  ;;  %v3913_v63 = vld [vmem:[%s6669_s7 + $0x4] sm:$0xf] }
 0x1e1   :  { %v1241_v42 = vpack.c.bf16 %v1198_v23, %v1197_v18  ;;  %v3930_v18 = vld [vmem:[%s6669_s7 + $0x8c] sm:$0xf]  ;;  %v3767_v23 = vld [vmem:[%s6669_s7 + $0x98] sm:$0xf0]  ;;  %v3730_v14 = vor.u32 %v3921_v16, %v3727_v40  ;;  %v3738_v35 = vor.u32 %v3922_v10, %v3735_v33  ;;  %v3710_v60 = vor.u32 %v3919_v1, %v3709_v25  ;;  %v3695_v2 = vld [vmem:[%s6669_s7 + $0x10] sm:$0xf0] }
 0x1e2   :  { %1802 = vmatpush.bf16.msra.mxu3 %v3786_v61  ;;  %v3770_v17 = vor.u32 %v3930_v18, %v3767_v23  ;;  %1774 = vmatpush.bf16.msra.mxu2 %v3766_v15  ;;  %v3714_v36 = vor.u32 %v3917_v31, %v3711_v26  ;;  %v1201_v54 = vmax.f32 %v1193_v59, 0.0  ;;  %v1202_v56 = vmax.f32 %v1194_v62, 0.0  ;;  %v1965_v52 = vld [vmem:[%s6671_s9 + $0x1c0] sm:$0xff]  ;;  %v1963_v41 = vld [vmem:[%s6671_s9 + $0x1b0] sm:$0xff]  ;;  %v1958_v16 = vld [vmem:[%s6671_s9 + $0x188] sm:$0xff] }
 0x1e3   :  { %1445 = vmatmul.bf16.vlgmr.msrb.gmra.mxu0 %v1241_v42  ;;  %1474 = vmatmul.bf16.vlgmr.msrb.gmra.mxu1 %v1241_v42  ;;  %v3722_v61 = vor.u32 %v3918_v27, %v3719_v20  ;;  %v3694_v0 = vor.u32 %v3915_v44, %v3693_v43  ;;  %v3698_v18 = vor.u32 %v3913_v63, %v3695_v2  ;;  %v1961_v39 = vld [vmem:[%s6671_s9 + $0x1a0] sm:$0xff]  ;;  %v1959_v40 = vld [vmem:[%s6671_s9 + $0x190] sm:$0xff]  ;;  %v1960_v21 = vld [vmem:[%s6671_s9 + $0x198] sm:$0xff] }
 0x1e4   :  { %1503 = vmatmul.bf16.vlgmr.msrb.gmra.mxu2 %v1241_v42  ;;  %1532 = vmatmul.bf16.vlgmr.msrb.gmra.mxu3 %v1241_v42  ;;  %v1242_v42 = vpack.c.bf16 %v1200_v12, %v1199_v5  ;;  %v3701_v5 = vld [vmem:[%s6669_s7 + $0x8] sm:$0xf]  ;;  %v3916_v12 = vld [vmem:[%s6669_s7 + $0x14] sm:$0xf0]  ;;  %v1243_v15 = vpack.c.bf16 %v1202_v56, %v1201_v54  ;;  %v1196_v19 = vadd.f32 %v4978_v24, %v1185_v48  ;;  %v1957_v28 = vld [vmem:[%s6671_s9 + $0x180] sm:$0xff] }
 0x1e5   :  { %1715 = vmatpush.bf16.msra.mxu0 %v3774_v32  ;;  %1744 = vmatpush.bf16.msra.mxu1 %v3778_v38  ;;  %v3920_v32 = vld [vmem:[%s6669_s7 + $0x34] sm:$0xf0]  ;;  %v3702_v23 = vor.u32 %v3916_v12, %v3701_v5  ;;  %v1955_v29 = vld [vmem:[%s6671_s9 + $0x170] sm:$0xff]  ;;  %v1949_v10 = vld [vmem:[%s6671_s9 + $0x140] sm:$0xff] }
 0x1e6   :  { %1803 = vmatpush.bf16.msra.mxu3 %v3770_v17  ;;  %1775 = vmatpush.bf16.msra.mxu2 %v3750_v45  ;;  %v3718_v38 = vor.u32 %v3920_v32, %v3717_v7  ;;  %v1184_v17 = vmul.f32 %v4976_v3, %v4690_v34  ;;  %v1204_v49 = vmax.f32 %v1196_v19, 0.0  ;;  %v5203_v34 = vld [vmem:[%s6662_s0] sm:$0xff]  ;;  %v1970_v3 = vld [vmem:[%s6671_s9 + $0x1e8] sm:$0xff]  ;;  %v1967_v45 = vld [vmem:[%s6671_s9 + $0x1d0] sm:$0xff] }
 0x1e7   :  { %v1956_v9 = vld [vmem:[%s6671_s9 + $0x178] sm:$0xff]  ;;  %v1951_v33 = vld [vmem:[%s6671_s9 + $0x150] sm:$0xff]  ;;  %v1945_v1 = vld [vmem:[%s6671_s9 + $0x120] sm:$0xff] }
 0x1e8   :  { %v1195_v6 = vadd.f32 %v4978_v24, %v1184_v17  ;;  %v1971_v24 = vld [vmem:[%s6671_s9 + $0x1f0] sm:$0xff]  ;;  %v1952_v25 = vld [vmem:[%s6671_s9 + $0x158] sm:$0xff]  ;;  %v1946_v59 = vld [vmem:[%s6671_s9 + $0x128] sm:$0xff] }
 0x1e9   :  { %1716 = vmatpush.bf16.msra.mxu0 %v3758_v13  ;;  %1745 = vmatpush.bf16.msra.mxu1 %v3762_v8  ;;  %v3914_v13 = vld [vmem:[%s6669_s7 + $0xc] sm:$0xf]  ;;  %v3703_v8 = vld [vmem:[%s6669_s7 + $0x18] sm:$0xf0]  ;;  %v1947_v62 = vld [vmem:[%s6671_s9 + $0x130] sm:$0xff] }
 0x1ea   :  { %1804 = vmatpush.bf16.msra.mxu3 %v3754_v37  ;;  %1776 = vmatpush.bf16.msra.mxu2 %v3734_v4  ;;  %v1964_v37 = vld [vmem:[%s6671_s9 + $0x1b8] sm:$0xff]  ;;  %v1950_v4 = vld [vmem:[%s6671_s9 + $0x148] sm:$0xff]  ;;  %v1941_v31 = vld [vmem:[%s6671_s9 + $0x100] sm:$0xff] }
 0x1eb   :  { %v1942_v26 = vld [vmem:[%s6671_s9 + $0x108] sm:$0xff]  ;;  %v1943_v7 = vld [vmem:[%s6671_s9 + $0x110] sm:$0xff]  ;;  %v1937_v32 = vld [vmem:[%s6671_s9 + $0xe0] sm:$0xff] }
 0x1ec   :  { %v1938_v27 = vld [vmem:[%s6671_s9 + $0xe8] sm:$0xff]  ;;  %v1939_v20 = vld [vmem:[%s6671_s9 + $0xf0] sm:$0xff]  ;;  %v1936_v44 = vld [vmem:[%s6671_s9 + $0xd8] sm:$0xff] }
 0x1ed   :  { %1717 = vmatpush.bf16.msra.mxu0 %v3742_v51  ;;  %1746 = vmatpush.bf16.msra.mxu1 %v3746_v53  ;;  %v1203_v51 = vmax.f32 %v1195_v6, 0.0  ;;  %v1966_v53 = vld [vmem:[%s6671_s9 + $0x1c8] sm:$0xff]  ;;  %v1935_v43 = vld [vmem:[%s6671_s9 + $0xd0] sm:$0xff]  ;;  %v1929_v54 = vld [vmem:[%s6671_s9 + $0xa0] sm:$0xff] }
 0x1ee   :  { %1805 = vmatpush.bf16.msra.mxu3 %v3738_v35  ;;  %1777 = vmatpush.bf16.msra.mxu2 %v3718_v38  ;;  %v1948_v35 = vld [vmem:[%s6671_s9 + $0x138] sm:$0xff]  ;;  %v1934_v38 = vld [vmem:[%s6671_s9 + $0xc8] sm:$0xff]  ;;  %v1927_v5 = vld [vmem:[%s6671_s9 + $0x90] sm:$0xff] }
 0x1ef   :  { %v1244_v46 = vpack.c.bf16 %v1204_v49, %v1203_v51  ;;  %v1930_v56 = vld [vmem:[%s6671_s9 + $0xa8] sm:$0xff]  ;;  %v1932_v63 = vld [vmem:[%s6671_s9 + $0xb8] sm:$0xff]  ;;  %v1919_v17 = vld [vmem:[%s6671_s9 + $0x50] sm:$0xff] }
 0x1f0   :  { %v1926_v2 = vld [vmem:[%s6671_s9 + $0x88] sm:$0xff]  ;;  %v1928_v12 = vld [vmem:[%s6671_s9 + $0x98] sm:$0xff]  ;;  %v1913_v6 = vld [vmem:[%s6671_s9 + $0x20] sm:$0xff] }
 0x1f1   :  { %1718 = vmatpush.bf16.msra.mxu0 %v3726_v30  ;;  %1747 = vmatpush.bf16.msra.mxu1 %v3730_v14  ;;  %v1953_v30 = vld [vmem:[%s6671_s9 + $0x160] sm:$0xff]  ;;  %v1954_v14 = vld [vmem:[%s6671_s9 + $0x168] sm:$0xff]  ;;  %v1920_v48 = vld [vmem:[%s6671_s9 + $0x58] sm:$0xff] }
 0x1f2   :  { %1806 = vmatpush.bf16.msra.mxu3 %v3722_v61  ;;  %1778 = vmatpush.bf16.msra.mxu2 %v3702_v23  ;;  %v1931_v61 = vld [vmem:[%s6671_s9 + $0xb0] sm:$0xff]  ;;  %v1917_v23 = vld [vmem:[%s6671_s9 + $0x40] sm:$0xff]  ;;  %v1914_v19 = vld [vmem:[%s6671_s9 + $0x28] sm:$0xff] }
 0x1f3   :  { %1450 = vmatmul.bf16.gmra.mxu0 %v1242_v42  ;;  %1479 = vmatmul.bf16.gmra.mxu1 %v1242_v42  ;;  %v1915_v51 = vld [vmem:[%s6671_s9 + $0x30] sm:$0xff]  ;;  %v1916_v49 = vld [vmem:[%s6671_s9 + $0x38] sm:$0xff] }
 0x1f4   :  { %1508 = vmatmul.bf16.gmra.mxu2 %v1242_v42  ;;  %1537 = vmatmul.bf16.gmra.mxu3 %v1242_v42  ;;  %v3706_v42 = vor.u32 %v3914_v13, %v3703_v8  ;;  %v1921_v13 = vld [vmem:[%s6671_s9 + $0x60] sm:$0xff]  ;;  %v1922_v8 = vld [vmem:[%s6671_s9 + $0x68] sm:$0xff] }
 0x1f5   :  { %1719 = vmatpush.bf16.msra.mxu0 %v3710_v60  ;;  %1748 = vmatpush.bf16.msra.mxu1 %v3714_v36  ;;  %v1944_v60 = vld [vmem:[%s6671_s9 + $0x118] sm:$0xff] }
 0x1f6   :  { %1807 = vmatpush.bf16.msra.mxu3 %v3706_v42  ;;  %2013 = vmatpush.msrb.mxu2 %v1971_v24  ;;  %v1940_v36 = vld [vmem:[%s6671_s9 + $0xf8] sm:$0xff]  ;;  %v1918_v42 = vld [vmem:[%s6671_s9 + $0x48] sm:$0xff] }
 0x1f7   :  { %v1912_v24 = vld [vmem:[%s6671_s9 + $0x18] sm:$0xff] }
 0x1f8   :  { %2014 = vmatpush.msrb.mxu2 %v1967_v45 }
 0x1f9   :  { %1720 = vmatpush.bf16.msra.mxu0 %v3694_v0  ;;  %1749 = vmatpush.bf16.msra.mxu1 %v3698_v18  ;;  %v1925_v0 = vld [vmem:[%s6671_s9 + $0x80] sm:$0xff]  ;;  %v1924_v18 = vld [vmem:[%s6671_s9 + $0x78] sm:$0xff] }
 0x1fa   :  { %2015 = vmatpush.msrb.mxu2 %v1963_v41 }
 0x1fc   :  { %2016 = vmatpush.msrb.mxu2 %v1959_v40 }
 0x1fd   :  { %1973 = vmatpush.msrb.mxu0 %v1969_v50  ;;  %1993 = vmatpush.msrb.mxu1 %v1970_v3  ;;  %v1910_v50 = vld [vmem:[%s6671_s9 + $0x8] sm:$0xff]  ;;  %v1911_v3 = vld [vmem:[%s6671_s9 + $0x10] sm:$0xff] }
 0x1fe   :  { %2017 = vmatpush.msrb.mxu2 %v1955_v29 }
 0x1ff   :  { %1974 = vmatpush.msrb.mxu0 %v1965_v52  ;;  %1994 = vmatpush.msrb.mxu1 %v1966_v53  ;;  %v4243_v52 = vmov 0.0  }
 0x200   :  { %2018 = vmatpush.msrb.mxu2 %v1951_v33 }
 0x201   :  { %1975 = vmatpush.msrb.mxu0 %v1961_v39  ;;  %1995 = vmatpush.msrb.mxu1 %v1962_v47 }
 0x202   :  { %2019 = vmatpush.msrb.mxu2 %v1947_v62 }
 0x203   :  { %1455 = vmatmul.bf16.gmra.mxu0 %v1243_v15  ;;  %1484 = vmatmul.bf16.gmra.mxu1 %v1243_v15 }
 0x204   :  { %1513 = vmatmul.bf16.gmra.mxu2 %v1243_v15  ;;  %1542 = vmatmul.bf16.gmra.mxu3 %v1243_v15  ;;  %v1923_v15 = vld [vmem:[%s6671_s9 + $0x70] sm:$0xff] }
 0x205   :  { %1976 = vmatpush.msrb.mxu0 %v1957_v28  ;;  %1996 = vmatpush.msrb.mxu1 %v1958_v16 }
 0x206   :  { %2020 = vmatpush.msrb.mxu2 %v1943_v7 }
 0x207   :  { %1977 = vmatpush.msrb.mxu0 %v1953_v30  ;;  %1997 = vmatpush.msrb.mxu1 %v1954_v14 }
 0x208   :  { %2021 = vmatpush.msrb.mxu2 %v1939_v20 }
 0x209   :  { %1978 = vmatpush.msrb.mxu0 %v1949_v10  ;;  %1998 = vmatpush.msrb.mxu1 %v1950_v4 }
 0x20a   :  { %2022 = vmatpush.msrb.mxu2 %v1935_v43 }
 0x20b   :  { %1979 = vmatpush.msrb.mxu0 %v1945_v1  ;;  %1999 = vmatpush.msrb.mxu1 %v1946_v59 }
 0x20c   :  { %2023 = vmatpush.msrb.mxu2 %v1931_v61 }
 0x20d   :  { %1980 = vmatpush.msrb.mxu0 %v1941_v31  ;;  %2000 = vmatpush.msrb.mxu1 %v1942_v26 }
 0x20e   :  { %2024 = vmatpush.msrb.mxu2 %v1927_v5 }
 0x20f   :  { %1981 = vmatpush.msrb.mxu0 %v1937_v32  ;;  %2001 = vmatpush.msrb.mxu1 %v1938_v27  ;;  %v1829_v32 = vld [vmem:[%s6670_s8] sm:$0xf]  ;;  %s5549_s8 = smov (!%p3822_p0), 1  }
 0x210   :  { %2025 = vmatpush.msrb.mxu2 %v1923_v15 }
 0x211   :  { %2002 = vmatpush.msrb.mxu1 %v1934_v38 }
 0x212   :  { %2026 = vmatpush.msrb.mxu2 %v1919_v17 }
 0x213   :  { %1460 = vmatmul.bf16.gmra.mxu0 %v1244_v46  ;;  %1489 = vmatmul.bf16.gmra.mxu1 %v1244_v46 }
 0x214   :  { %1518 = vmatmul.bf16.gmra.mxu2 %v1244_v46  ;;  %1547 = vmatmul.bf16.gmra.mxu3 %v1244_v46  ;;  %v1909_v46 = vld [vmem:[%s6671_s9] sm:$0xff] }
 0x215   :  { %2003 = vmatpush.msrb.mxu1 %v1930_v56  ;;  %2027 = vmatpush.msrb.mxu2 %v1915_v51 }
 0x217   :  { %2004 = vmatpush.msrb.mxu1 %v1926_v2  ;;  %2028 = vmatpush.msrb.mxu2 %v1911_v3 }
 0x219   :  { %2005 = vmatpush.msrb.mxu1 %v1922_v8 }
 0x21b   :  { %2006 = vmatpush.msrb.mxu1 %v1918_v42 }
 0x21d   :  { %2007 = vmatpush.msrb.mxu1 %v1914_v19 }
 0x21f   :  { %2008 = vmatpush.msrb.mxu1 %v1910_v50 }
 0x223   :  { %1721 = vmatmul.bf16.vlgmr.msra.gmra.mxu0 %v4770_v22  ;;  %1750 = vmatmul.bf16.vlgmr.msra.gmra.mxu1 %v4770_v22 }
 0x224   :  { %1779 = vmatmul.bf16.vlgmr.msra.gmra.mxu2 %v4770_v22  ;;  %1808 = vmatmul.bf16.vlgmr.msra.gmra.mxu3 %v4770_v22  ;;  %v1972_v22 = vld [vmem:[%s6671_s9 + $0x1f8] sm:$0xff] }
 0x225   :  { %2033 = vmatpush.msrb.mxu3 %v1972_v22 }
 0x227   :  { %2034 = vmatpush.msrb.mxu3 %v1968_v55 }
 0x229   :  { %2035 = vmatpush.msrb.mxu3 %v1964_v37 }
 0x22b   :  { %2036 = vmatpush.msrb.mxu3 %v1960_v21 }
 0x22d   :  { %2037 = vmatpush.msrb.mxu3 %v1956_v9 }
 0x22f   :  { %2038 = vmatpush.msrb.mxu3 %v1952_v25 }
 0x231   :  { %2039 = vmatpush.msrb.mxu3 %v1948_v35 }
 0x233   :  { %1726 = vmatmul.bf16.gmra.mxu0 %v4772_v57  ;;  %1755 = vmatmul.bf16.gmra.mxu1 %v4772_v57 }
 0x234   :  { %1784 = vmatmul.bf16.gmra.mxu2 %v4772_v57  ;;  %1813 = vmatmul.bf16.gmra.mxu3 %v4772_v57  ;;  %v1933_v57 = vld [vmem:[%s6671_s9 + $0xc0] sm:$0xff] }
 0x235   :  { %2040 = vmatpush.msrb.mxu3 %v1944_v60  ;;  %1982 = vmatpush.msrb.mxu0 %v1933_v57  ;;  %v5458_v57 = vperm.slane %v1829_v32, 1 }
 0x237   :  { %2041 = vmatpush.msrb.mxu3 %v1940_v36  ;;  %1983 = vmatpush.msrb.mxu0 %v1929_v54  ;;  %v5456_v36 = vperm.slane %v1829_v32, 0 }
 0x239   :  { %2042 = vmatpush.msrb.mxu3 %v1936_v44  ;;  %1984 = vmatpush.msrb.mxu0 %v1925_v0  ;;  %v5470_v0 = vperm.slane %v1829_v32, 3 }
 0x23b   :  { %2043 = vmatpush.msrb.mxu3 %v1932_v63  ;;  %1985 = vmatpush.msrb.mxu0 %v1921_v13  ;;  %v5468_v63 = vperm.slane %v1829_v32, 2 }
 0x23d   :  { %2044 = vmatpush.msrb.mxu3 %v1928_v12  ;;  %1986 = vmatpush.msrb.mxu0 %v1917_v23 }
 0x23f   :  { %2045 = vmatpush.msrb.mxu3 %v1924_v18  ;;  %1987 = vmatpush.msrb.mxu0 %v1913_v6 }
 0x241   :  { %2046 = vmatpush.msrb.mxu3 %v1920_v48  ;;  %1988 = vmatpush.msrb.mxu0 %v1909_v46 }
 0x243   :  { %1731 = vmatmul.bf16.gmra.mxu0 %v4774_v58  ;;  %1760 = vmatmul.bf16.gmra.mxu1 %v4774_v58 }
 0x244   :  { %1789 = vmatmul.bf16.gmra.mxu2 %v4774_v58  ;;  %1818 = vmatmul.bf16.gmra.mxu3 %v4774_v58 }
 0x245   :  { %2047 = vmatpush.msrb.mxu3 %v1916_v49 }
 0x247   :  { %2048 = vmatpush.msrb.mxu3 %v1912_v24 }
 0x253   :  { %1736 = vmatmul.bf16.gmra.mxu0 %v4776_v11  ;;  %1765 = vmatmul.bf16.gmra.mxu1 %v4776_v11 }
 0x254   :  { %1794 = vmatmul.bf16.gmra.mxu2 %v4776_v11  ;;  %1823 = vmatmul.bf16.gmra.mxu3 %v4776_v11 }
 0x260   :  { %v1446_v58 = vpop.f32.mrf.mxu0  ;;  %v1475_v22 = vpop.f32.mrf.mxu1 }
 0x263   :  { %1989 = vmatmul.f32.vlgmr.msrb.gmra.mxu0 %v4243_v52  ;;  %2009 = vmatmul.f32.vlgmr.msrb.gmra.mxu1 %v4243_v52 }
 0x264   :  { %2029 = vmatmul.f32.vlgmr.msrb.gmra.mxu2 %v4243_v52  ;;  %2049 = vmatmul.f32.vlgmr.msrb.gmra.mxu3 %v4243_v52 }
 0x267   :  { %v1504_v53 = vpop.f32.mrf.mxu2  ;;  %v1533_v45 = vpop.f32.mrf.mxu3 }
 0x268   :  { %v1448_v55 = vpop.f32.mrf.mxu0  ;;  %v1477_v39 = vpop.f32.mrf.mxu1 }
 0x26f   :  { %v1506_v47 = vpop.f32.mrf.mxu2  ;;  %v1535_v41 = vpop.f32.mrf.mxu3 }
 0x270   :  { %v1451_v37 = vpop.f32.mrf.mxu0  ;;  %v1480_v28 = vpop.f32.mrf.mxu1 }
 0x277   :  { %v5409_v16 = vpop.f32.mrf.mxu2  ;;  %v5411_v40 = vpop.f32.mrf.mxu3 }
 0x278   :  { %v5413_v11 = vpop.f32.mrf.mxu0  ;;  %v5415_v21 = vpop.f32.mrf.mxu1 }
 0x27f   :  { %v5417_v30 = vpop.f32.mrf.mxu2  ;;  %v5419_v14 = vpop.f32.mrf.mxu3 }
 0x280   :  { %v5421_v29 = vpop.f32.mrf.mxu0  ;;  %v5423_v9 = vpop.f32.mrf.mxu1 }
 0x287   :  { %v5425_v10 = vpop.f32.mrf.mxu2  ;;  %v5427_v4 = vpop.f32.mrf.mxu3 }
 0x288   :  { %v5429_v33 = vpop.f32.mrf.mxu0  ;;  %v5431_v25 = vpop.f32.mrf.mxu1 }
 0x28f   :  { %v5433_v1 = vpop.f32.mrf.mxu2  ;;  %v5435_v59 = vpop.f32.mrf.mxu3 }
 0x290   :  { %v5437_v62 = vpop.f32.mrf.mxu0  ;;  %v5439_v35 = vpop.f32.mrf.mxu1 }
 0x297   :  { %v5441_v31 = vpop.f32.mrf.mxu2  ;;  %v5443_v26 = vpop.f32.mrf.mxu3 }
 0x298   :  { %v5445_v7 = vpop.f32.mrf.mxu0  ;;  %v5447_v60 = vpop.f32.mrf.mxu1 }
 0x29f   :  { %v5452_v27 = vpop.f32.mrf.mxu2  ;;  %v5454_v20 = vpop.f32.mrf.mxu3 }
 0x2a0   :  { %v1722_v38 = vpop.f32.mrf.mxu0  ;;  %v1751_v43 = vpop.f32.mrf.mxu1 }
 0x2a1   :  { %v1723_v44 = vadd.f32 %v1722_v38, %v1446_v58  ;;  %v1752_v54 = vadd.f32 %v1751_v43, %v1475_v22 }
 0x2a3   :  { %v5461_v56 = vadd.f32 %v5456_v36, %v1723_v44  ;;  %v5464_v61 = vadd.f32 %v5458_v57, %v1752_v54 }
 0x2a5   :  { %1871 = vst [vmem:[#allocation2] sm:$0xff] %v5461_v56 }
 0x2a6   :  { %1872 = vst [vmem:[#allocation2 + $0x8] sm:$0xff] %v5464_v61 }
 0x2a7   :  { %v1780_v2 = vpop.f32.mrf.mxu2  ;;  %v1809_v5 = vpop.f32.mrf.mxu3 }
 0x2a8   :  { %v1781_v12 = vadd.f32 %v1780_v2, %v1504_v53  ;;  %v1810_v13 = vadd.f32 %v1809_v5, %v1533_v45  ;;  %v1724_v8 = vpop.f32.mrf.mxu0  ;;  %v1753_v15 = vpop.f32.mrf.mxu1 }
 0x2a9   :  { %v1725_v18 = vadd.f32 %v1724_v8, %v1448_v55  ;;  %v1754_v23 = vadd.f32 %v1753_v15, %v1477_v39 }
 0x2aa   :  { %v5473_v42 = vadd.f32 %v5468_v63, %v1781_v12  ;;  %v5476_v17 = vadd.f32 %v5470_v0, %v1810_v13 }
 0x2ab   :  { %v1843_v48 = vadd.f32 %v5456_v36, %v1725_v18  ;;  %v1844_v6 = vadd.f32 %v5458_v57, %v1754_v23 }
 0x2ac   :  { %1873 = vst [vmem:[#allocation2 + $0x10] sm:$0xff] %v5473_v42 }
 0x2ad   :  { %1874 = vst [vmem:[#allocation2 + $0x18] sm:$0xff] %v5476_v17 }
 0x2ae   :  { %1875 = vst [vmem:[#allocation2 + $0x20] sm:$0xff] %v1843_v48 }
 0x2af   :  { %1876 = vst [vmem:[#allocation2 + $0x28] sm:$0xff] %v1844_v6  ;;  %v1782_v19 = vpop.f32.mrf.mxu2  ;;  %v1811_v51 = vpop.f32.mrf.mxu3 }
 0x2b0   :  { %v1783_v49 = vadd.f32 %v1782_v19, %v1506_v47  ;;  %v1812_v46 = vadd.f32 %v1811_v51, %v1535_v41  ;;  %v1727_v50 = vpop.f32.mrf.mxu0  ;;  %v1756_v3 = vpop.f32.mrf.mxu1 }
 0x2b1   :  { %v1728_v24 = vadd.f32 %v1727_v50, %v1451_v37  ;;  %v1757_v58 = vadd.f32 %v1756_v3, %v1480_v28 }
 0x2b2   :  { %v1845_v22 = vadd.f32 %v5468_v63, %v1783_v49  ;;  %v1846_v52 = vadd.f32 %v5470_v0, %v1812_v46 }
 0x2b3   :  { %v1847_v53 = vadd.f32 %v5456_v36, %v1728_v24  ;;  %v1848_v45 = vadd.f32 %v5458_v57, %v1757_v58 }
 0x2b4   :  { %1877 = vst [vmem:[#allocation2 + $0x30] sm:$0xff] %v1845_v22 }
 0x2b5   :  { %1878 = vst [vmem:[#allocation2 + $0x38] sm:$0xff] %v1846_v52 }
 0x2b6   :  { %1879 = vst [vmem:[#allocation2 + $0x40] sm:$0xff] %v1847_v53 }
 0x2b7   :  { %1880 = vst [vmem:[#allocation2 + $0x48] sm:$0xff] %v1848_v45  ;;  %v1785_v55 = vpop.f32.mrf.mxu2  ;;  %v1814_v39 = vpop.f32.mrf.mxu3 }
 0x2b8   :  { %v1786_v47 = vadd.f32 %v1785_v55, %v5409_v16  ;;  %v1815_v41 = vadd.f32 %v1814_v39, %v5411_v40  ;;  %v1729_v37 = vpop.f32.mrf.mxu0  ;;  %v1758_v28 = vpop.f32.mrf.mxu1 }
 0x2b9   :  { %v1730_v32 = vadd.f32 %v1729_v37, %v5413_v11  ;;  %v1759_v38 = vadd.f32 %v1758_v28, %v5415_v21 }
 0x2ba   :  { %v1849_v43 = vadd.f32 %v5468_v63, %v1786_v47  ;;  %v1850_v44 = vadd.f32 %v5470_v0, %v1815_v41 }
 0x2bb   :  { %v1851_v54 = vadd.f32 %v5456_v36, %v1730_v32  ;;  %v1852_v2 = vadd.f32 %v5458_v57, %v1759_v38 }
 0x2bc   :  { %1881 = vst [vmem:[#allocation2 + $0x50] sm:$0xff] %v1849_v43 }
 0x2bd   :  { %1882 = vst [vmem:[#allocation2 + $0x58] sm:$0xff] %v1850_v44 }
 0x2be   :  { %1883 = vst [vmem:[#allocation2 + $0x60] sm:$0xff] %v1851_v54 }
 0x2bf   :  { %1884 = vst [vmem:[#allocation2 + $0x68] sm:$0xff] %v1852_v2  ;;  %v1787_v16 = vpop.f32.mrf.mxu2  ;;  %v1816_v40 = vpop.f32.mrf.mxu3 }
 0x2c0   :  { %v1788_v5 = vadd.f32 %v1787_v16, %v5417_v30  ;;  %v1817_v11 = vadd.f32 %v1816_v40, %v5419_v14  ;;  %v1732_v12 = vpop.f32.mrf.mxu0  ;;  %v1761_v21 = vpop.f32.mrf.mxu1 }
 0x2c1   :  { %v1733_v13 = vadd.f32 %v1732_v12, %v5421_v29  ;;  %v1762_v8 = vadd.f32 %v1761_v21, %v5423_v9 }
 0x2c2   :  { %v1853_v15 = vadd.f32 %v5468_v63, %v1788_v5  ;;  %v1854_v18 = vadd.f32 %v5470_v0, %v1817_v11 }
 0x2c3   :  { %v1855_v23 = vadd.f32 %v5456_v36, %v1733_v13  ;;  %v1856_v48 = vadd.f32 %v5458_v57, %v1762_v8 }
 0x2c4   :  { %1885 = vst [vmem:[#allocation2 + $0x70] sm:$0xff] %v1853_v15 }
 0x2c5   :  { %1886 = vst [vmem:[#allocation2 + $0x78] sm:$0xff] %v1854_v18 }
 0x2c6   :  { %1887 = vst [vmem:[#allocation2 + $0x80] sm:$0xff] %v1855_v23 }
 0x2c7   :  { %1888 = vst [vmem:[#allocation2 + $0x88] sm:$0xff] %v1856_v48  ;;  %v1790_v30 = vpop.f32.mrf.mxu2  ;;  %v1819_v14 = vpop.f32.mrf.mxu3 }
 0x2c8   :  { %v1791_v6 = vadd.f32 %v1790_v30, %v5425_v10  ;;  %v1820_v29 = vadd.f32 %v1819_v14, %v5427_v4  ;;  %v1734_v19 = vpop.f32.mrf.mxu0  ;;  %v1763_v9 = vpop.f32.mrf.mxu1 }
 0x2c9   :  { %v1735_v51 = vadd.f32 %v1734_v19, %v5429_v33  ;;  %v1764_v49 = vadd.f32 %v1763_v9, %v5431_v25 }
 0x2ca   :  { %v1857_v46 = vadd.f32 %v5468_v63, %v1791_v6  ;;  %v1858_v50 = vadd.f32 %v5470_v0, %v1820_v29 }
 0x2cb   :  { %v1859_v3 = vadd.f32 %v5456_v36, %v1735_v51  ;;  %v1860_v24 = vadd.f32 %v5458_v57, %v1764_v49 }
 0x2cc   :  { %1889 = vst [vmem:[#allocation2 + $0x90] sm:$0xff] %v1857_v46 }
 0x2cd   :  { %1890 = vst [vmem:[#allocation2 + $0x98] sm:$0xff] %v1858_v50 }
 0x2ce   :  { %1891 = vst [vmem:[#allocation2 + $0xa0] sm:$0xff] %v1859_v3 }
 0x2cf   :  { %1892 = vst [vmem:[#allocation2 + $0xa8] sm:$0xff] %v1860_v24  ;;  %v1792_v10 = vpop.f32.mrf.mxu2  ;;  %v1821_v4 = vpop.f32.mrf.mxu3 }
 0x2d0   :  { %v1793_v58 = vadd.f32 %v1792_v10, %v5433_v1  ;;  %v1822_v33 = vadd.f32 %v1821_v4, %v5435_v59  ;;  %v1737_v22 = vpop.f32.mrf.mxu0  ;;  %v1766_v25 = vpop.f32.mrf.mxu1 }
 0x2d1   :  { %v1738_v52 = vadd.f32 %v1737_v22, %v5437_v62  ;;  %v1767_v53 = vadd.f32 %v1766_v25, %v5439_v35 }
 0x2d2   :  { %v1861_v45 = vadd.f32 %v5468_v63, %v1793_v58  ;;  %v1862_v55 = vadd.f32 %v5470_v0, %v1822_v33 }
 0x2d3   :  { %v1863_v39 = vadd.f32 %v5456_v36, %v1738_v52  ;;  %v1864_v47 = vadd.f32 %v5458_v57, %v1767_v53 }
 0x2d4   :  { %1893 = vst [vmem:[#allocation2 + $0xb0] sm:$0xff] %v1861_v45 }
 0x2d5   :  { %1894 = vst [vmem:[#allocation2 + $0xb8] sm:$0xff] %v1862_v55 }
 0x2d6   :  { %1895 = vst [vmem:[#allocation2 + $0xc0] sm:$0xff] %v1863_v39 }
 0x2d7   :  { %1896 = vst [vmem:[#allocation2 + $0xc8] sm:$0xff] %v1864_v47  ;;  %v1795_v1 = vpop.f32.mrf.mxu2  ;;  %v1824_v59 = vpop.f32.mrf.mxu3 }
 0x2d8   :  { %v1796_v41 = vadd.f32 %v1795_v1, %v5441_v31  ;;  %v1825_v62 = vadd.f32 %v1824_v59, %v5443_v26  ;;  %v1739_v37 = vpop.f32.mrf.mxu0  ;;  %v1768_v35 = vpop.f32.mrf.mxu1 }
 0x2d9   :  { %v1740_v28 = vadd.f32 %v1739_v37, %v5445_v7  ;;  %v1769_v32 = vadd.f32 %v1768_v35, %v5447_v60 }
 0x2da   :  { %v1865_v38 = vadd.f32 %v5468_v63, %v1796_v41  ;;  %v1866_v43 = vadd.f32 %v5470_v0, %v1825_v62 }
 0x2db   :  { %v1867_v44 = vadd.f32 %v5456_v36, %v1740_v28  ;;  %v1868_v54 = vadd.f32 %v5458_v57, %v1769_v32 }
 0x2dc   :  { %1897 = vst [vmem:[#allocation2 + $0xd0] sm:$0xff] %v1865_v38  ;;  %v5535_v38 = vmov 0.0  }
 0x2dd   :  { %1898 = vst [vmem:[#allocation2 + $0xd8] sm:$0xff] %v1866_v43  ;;  %v5537_v43 = vmov 0.0  }
 0x2de   :  { %1899 = vst [vmem:[#allocation2 + $0xe0] sm:$0xff] %v1867_v44 }
 0x2df   :  { %1900 = vst [vmem:[#allocation2 + $0xe8] sm:$0xff] %v1868_v54  ;;  %v1797_v31 = vpop.f32.mrf.mxu2  ;;  %v1826_v26 = vpop.f32.mrf.mxu3 }
 0x2e0   :  { %v1798_v2 = vadd.f32 %v1797_v31, %v5452_v27  ;;  %v1827_v7 = vadd.f32 %v1826_v26, %v5454_v20  ;;  %v1990_v16 = vpop.f32.mrf.mxu0  ;;  %v2010_v60 = vpop.f32.mrf.mxu1 }
 0x2e1   :  { %v2053_v40 = vadd.f32 %v1990_v16, %v5461_v56  ;;  %v2054_v5 = vadd.f32 %v2010_v60, %v5464_v61 }
 0x2e2   :  { %v1869_v36 = vadd.f32 %v5468_v63, %v1798_v2  ;;  %v1870_v57 = vadd.f32 %v5470_v0, %v1827_v7 }
 0x2e3   :  { %v3819_v11 = vmul.f32 -1.442695, %v2053_v40  ;;  %v3820_v12 = vmul.f32 -1.442695, %v2054_v5 }
 0x2e4   :  { %1901 = vst [vmem:[#allocation2 + $0xf0] sm:$0xff] %v1869_v36 }
 0x2e5   :  { %1902 = vst [vmem:[#allocation2 + $0xf8] sm:$0xff] %v1870_v57  ;;  %4089 = vpow2.f32 %v3819_v11 }
 0x2e6   :  { %4091 = vpow2.f32 %v3820_v12 }
 0x2e7   :  { %v2050_v21 = vpop.f32.mrf.mxu3  ;;  %v2030_v61 = vpop.f32.mrf.mxu2 }
 0x2e8   :  { %v2056_v27 = vadd.f32 %v2050_v21, %v5476_v17  ;;  %v2055_v23 = vadd.f32 %v2030_v61, %v5473_v42 }
 0x2ea   :  { %v3821_v20 = vmul.f32 -1.442695, %v2056_v27 }
 0x2eb   :  { %v4090_v13 = vpop.eup %4089 }
 0x2ec   :  { %v4092_v8 = vpop.eup %4091  ;;  %v2060_v15 = vadd.f32 1.0, %v4090_v13  ;;  %4093 = vpow2.f32 %v3821_v20 }
 0x2ed   :  { %v2079_v56 = vadd.f32 1.0, %v4092_v8 }
 0x2ee   :  { %4095 = vrcp.f32 %v2060_v15  ;;  %v2072_v29 = vand.u32 2147483648, %v2060_v15  ;;  %v2070_v51 = vand.u32 2147483647, %v2060_v15  ;;  %vm2066_vm13 = vweird.f32 %v2060_v15 }
 0x2ef   :  { %4097 = vrcp.f32 %v2079_v56  ;;  %v2091_v19 = vand.u32 2147483648, %v2079_v56  ;;  %v2089_v46 = vand.u32 2147483647, %v2079_v56  ;;  %vm2085_vm14 = vweird.f32 %v2079_v56 }
 0x2f0   :  { %v2073_v42 = vor.u32 1.1754944e-38, %v2072_v29  ;;  %vm2071_vm0 = vcmp.eq.f32.partialorder %v2070_v51, 8.507059e+37 }
 0x2f1   :  { %v2092_v4 = vor.u32 1.1754944e-38, %v2091_v19  ;;  %vm2090_vm2 = vcmp.eq.f32.partialorder %v2089_v46, 8.507059e+37 }
 0x2f2   :  { %v4094_v63 = vpop.eup %4093 }
 0x2f3   :  { %v2099_v0 = vadd.f32 1.0, %v4094_v63 }
 0x2f4   :  { %v4096_v18 = vpop.eup %4095 }
 0x2f5   :  { %v4098_v48 = vpop.eup %4097  ;;  %v2062_v30 = vmul.f32 %v4096_v18, %v2060_v15  ;;  %4099 = vrcp.f32 %v2099_v0  ;;  %vm2067_vm11 = vweird.f32 %v4096_v18  ;;  %v2111_v59 = vand.u32 2147483648, %v2099_v0 }
 0x2f6   :  { %v2081_v14 = vmul.f32 %v4098_v48, %v2079_v56  ;;  %4101 = vtanh.f32 %v2055_v23  ;;  %vm2086_vm12 = vweird.f32 %v4098_v48  ;;  %vm2068_vm15 = vmor %vm2066_vm13, %vm2067_vm11  ;;  %vm2105_vm4 = vweird.f32 %v2099_v0 }
 0x2f7   :  { %v2063_v6 = vsub.f32 1.0, %v2062_v30  ;;  %vm2087_vm1 = vmor %vm2085_vm14, %vm2086_vm12  ;;  %v2109_v41 = vand.u32 2147483647, %v2099_v0  ;;  %v2112_v37 = vor.u32 1.1754944e-38, %v2111_v59 }
 0x2f8   :  { %v2082_v17 = vsub.f32 1.0, %v2081_v14 }
 0x2f9   :  { %v2064_v9 = vmul.f32 %v4096_v18, %v2063_v6  ;;  %vm2110_vm6 = vcmp.eq.f32.partialorder %v2109_v41, 8.507059e+37 }
 0x2fa   :  { %v2083_v49 = vmul.f32 %v4098_v48, %v2082_v17 }
 0x2fb   :  { %v4100_v50 = vpop.eup %4099  ;;  %v2065_v3 = vadd.f32 %v4096_v18, %v2064_v9 }
 0x2fc   :  { %v2084_v24 = vadd.f32 %v4098_v48, %v2083_v49  ;;  %v2101_v10 = vmul.f32 %v4100_v50, %v2099_v0  ;;  %v4102_v33 = vpop.eup %4101  ;;  %vm2106_vm3 = vweird.f32 %v4100_v50 }
 0x2fd   :  { %v2069_v58 = vsel %vm2068_vm15, %v4096_v18, %v2065_v3  ;;  %vm2107_vm5 = vmor %vm2105_vm4, %vm2106_vm3 }
 0x2fe   :  { %v2074_v22 = vsel %vm2071_vm0, %v2073_v42, %v2069_v58  ;;  %v2088_v25 = vsel %vm2087_vm1, %v4098_v48, %v2084_v24  ;;  %v2102_v52 = vsub.f32 1.0, %v2101_v10 }
 0x2ff   :  { %v2093_v53 = vsel %vm2090_vm2, %v2092_v4, %v2088_v25  ;;  %v2116_v45 = vmul.f32 %v4102_v33, %v2074_v22 }
 0x300   :  { %v2115_v55 = vmul.f32 0.0, %v2093_v53  ;;  %v2103_v39 = vmul.f32 %v4100_v50, %v2102_v52 }
 0x302   :  { %v2117_v47 = vadd.f32 %v2116_v45, %v2115_v55   ;;  %v2104_v1 = vadd.f32 %v4100_v50, %v2103_v39 }
 0x304   :  { %4103 = vtanh.f32 %v2117_v47  ;;  %v2108_v62 = vsel %vm2107_vm5, %v4100_v50, %v2104_v1 }
 0x305   :  { %v2113_v28 = vsel %vm2110_vm6, %v2112_v37, %v2108_v62 }
 0x309   :  { %3146 = sbr.rel (%p3822_p0) target bundleno = 1053 (0x41d), region = 88 }
 0x30a   :  { %v4104_v35 = vpop.eup %4103 }
 0x30b   :  { %v2119_v32 = vmul.f32 %v4104_v35, %v2113_v28  }
 0x30d   :  { %v6677_v44 = vmov %v2119_v32 }
 0x30e   :  { %v5541_v54 = vmov 0.0   ;;  %v5543_v31 = vmov 0.0  }
 0x30f LB: > { %v2191_v26 = vld [vmem:[%s6672_s10 + $0x1e0] sm:$0xff]  ;;  %v2192_v7 = vld [vmem:[%s6672_s10 + $0x1e8] sm:$0xff]  ;;  %s3823_s3 = sadd.s32 4294967295, %s4227_s8  ;;  %s3827_s23 = sshll.u32 %s4227_s8, 3  ;;  %s4227_s8 = sphi %s5549_s8, %s2123_s8   ;;  %v4223_v32 = vphi %v2119_v32, %v6682_v32   ;;  %v4219_v47 = vphi %v2117_v47, %v2719_v47   ;;  %v4215_v31 = vphi %v5543_v31, %v6681_v31   ;;  %v4211_v54 = vphi %v5541_v54, %v6680_v54  }
 0x310   : > { %v2255_v2 = vld [vmem:[%s6672_s10 + $0x3e0] sm:$0xff]  ;;  %2269 = vmatpush.msra.mxu0 %v2191_v26  ;;  %v2256_v16 = vld [vmem:[%s6672_s10 + $0x3e8] sm:$0xff]  ;;  %2309 = vmatpush.msra.mxu2 %v2192_v7  ;;  %s2502_s4 = sshra.s32 %s3827_s23, 3  ;;  %s2123_s8 = sadd.s32 1, %s4227_s8  }
 0x311   : > { %2289 = vmatpush.msra.mxu1 %v2255_v2  ;;  %v2187_v60 = vld [vmem:[%s6672_s10 + $0x1c0] sm:$0xff]  ;;  %2329 = vmatpush.msra.mxu3 %v2256_v16  ;;  %v2188_v5 = vld [vmem:[%s6672_s10 + $0x1c8] sm:$0xff]  ;;  %s3977_s1 = sshll.u32 %s2502_s4, 5  ;;  %p2122_p1 = scmp.ge.s32.totalorder %s2123_s8, %s4972_s28 }
 0x312   : > { %v2251_v40 = vld [vmem:[%s6672_s10 + $0x3c0] sm:$0xff]  ;;  %v2252_v36 = vld [vmem:[%s6672_s10 + $0x3c8] sm:$0xff]  ;;  %2270 = vmatpush.msra.mxu0 %v2187_v60  ;;  %2310 = vmatpush.msra.mxu2 %v2188_v5  ;;  %v2257_v5 = vld [vmem:[%s6672_s10 + $0x3f0] sm:$0xff]  ;;  %s6167_s24 = scalar_lea.vmem [#allocation2], %s3977_s1 }
 0x313   : > { %v2183_v57 = vld [vmem:[%s6672_s10 + $0x1a0] sm:$0xff]  ;;  %2290 = vmatpush.msra.mxu1 %v2251_v40  ;;  %v2184_v12 = vld [vmem:[%s6672_s10 + $0x1a8] sm:$0xff]  ;;  %2330 = vmatpush.msra.mxu3 %v2252_v36  ;;  %v2193_v40 = vld [vmem:[%s6672_s10 + $0x1f0] sm:$0xff] }
 0x314   : > { %v2247_v11 = vld [vmem:[%s6672_s10 + $0x3a0] sm:$0xff]  ;;  %v2248_v21 = vld [vmem:[%s6672_s10 + $0x3a8] sm:$0xff]  ;;  %2271 = vmatpush.msra.mxu0 %v2183_v57  ;;  %2311 = vmatpush.msra.mxu2 %v2184_v12  ;;  %v2194_v36 = vld [vmem:[%s6672_s10 + $0x1f8] sm:$0xff] }
 0x315   : > { %v2179_v27 = vld [vmem:[%s6672_s10 + $0x180] sm:$0xff]  ;;  %2291 = vmatpush.msra.mxu1 %v2247_v11  ;;  %v2180_v13 = vld [vmem:[%s6672_s10 + $0x188] sm:$0xff]  ;;  %2331 = vmatpush.msra.mxu3 %v2248_v21  ;;  %v2258_v57 = vld [vmem:[%s6672_s10 + $0x3f8] sm:$0xff] }
 0x316   : > { %v2243_v20 = vld [vmem:[%s6672_s10 + $0x380] sm:$0xff]  ;;  %v2244_v8 = vld [vmem:[%s6672_s10 + $0x388] sm:$0xff]  ;;  %2272 = vmatpush.msra.mxu0 %v2179_v27  ;;  %2312 = vmatpush.msra.mxu2 %v2180_v13  ;;  %v2189_v11 = vld [vmem:[%s6672_s10 + $0x1d0] sm:$0xff] }
 0x317   : > { %v2175_v15 = vld [vmem:[%s6672_s10 + $0x160] sm:$0xff]  ;;  %2292 = vmatpush.msra.mxu1 %v2243_v20  ;;  %v2176_v61 = vld [vmem:[%s6672_s10 + $0x168] sm:$0xff]  ;;  %2332 = vmatpush.msra.mxu3 %v2244_v8  ;;  %v2253_v12 = vld [vmem:[%s6672_s10 + $0x3d0] sm:$0xff] }
 0x318   : > { %v2239_v56 = vld [vmem:[%s6672_s10 + $0x360] sm:$0xff]  ;;  %v2240_v63 = vld [vmem:[%s6672_s10 + $0x368] sm:$0xff]  ;;  %2273 = vmatpush.msra.mxu0 %v2175_v15  ;;  %2313 = vmatpush.msra.mxu2 %v2176_v61  ;;  %v2190_v21 = vld [vmem:[%s6672_s10 + $0x1d8] sm:$0xff] }
 0x319   : > { %v2171_v0 = vld [vmem:[%s6672_s10 + $0x140] sm:$0xff]  ;;  %2293 = vmatpush.msra.mxu1 %v2239_v56  ;;  %v2172_v23 = vld [vmem:[%s6672_s10 + $0x148] sm:$0xff]  ;;  %2333 = vmatpush.msra.mxu3 %v2240_v63  ;;  %v2254_v27 = vld [vmem:[%s6672_s10 + $0x3d8] sm:$0xff] }
 0x31a   : > { %v2235_v18 = vld [vmem:[%s6672_s10 + $0x340] sm:$0xff]  ;;  %v2236_v48 = vld [vmem:[%s6672_s10 + $0x348] sm:$0xff]  ;;  %2274 = vmatpush.msra.mxu0 %v2171_v0  ;;  %2314 = vmatpush.msra.mxu2 %v2172_v23  ;;  %v2185_v20 = vld [vmem:[%s6672_s10 + $0x1b0] sm:$0xff] }
 0x31b   : > { %v2167_v30 = vld [vmem:[%s6672_s10 + $0x120] sm:$0xff]  ;;  %2294 = vmatpush.msra.mxu1 %v2235_v18  ;;  %v2168_v6 = vld [vmem:[%s6672_s10 + $0x128] sm:$0xff]  ;;  %2334 = vmatpush.msra.mxu3 %v2236_v48  ;;  %v2249_v13 = vld [vmem:[%s6672_s10 + $0x3b0] sm:$0xff] }
 0x31c   : > { %v2231_v14 = vld [vmem:[%s6672_s10 + $0x320] sm:$0xff]  ;;  %v2232_v17 = vld [vmem:[%s6672_s10 + $0x328] sm:$0xff]  ;;  %2275 = vmatpush.msra.mxu0 %v2167_v30  ;;  %2315 = vmatpush.msra.mxu2 %v2168_v6  ;;  %v2186_v8 = vld [vmem:[%s6672_s10 + $0x1b8] sm:$0xff] }
 0x31d   : > { %v2163_v29 = vld [vmem:[%s6672_s10 + $0x100] sm:$0xff]  ;;  %2295 = vmatpush.msra.mxu1 %v2231_v14  ;;  %v2164_v9 = vld [vmem:[%s6672_s10 + $0x108] sm:$0xff]  ;;  %2335 = vmatpush.msra.mxu3 %v2232_v17  ;;  %v2250_v15 = vld [vmem:[%s6672_s10 + $0x3b8] sm:$0xff] }
 0x31e   : > { %v2227_v19 = vld [vmem:[%s6672_s10 + $0x300] sm:$0xff]  ;;  %v2228_v51 = vld [vmem:[%s6672_s10 + $0x308] sm:$0xff]  ;;  %2276 = vmatpush.msra.mxu0 %v2163_v29  ;;  %2316 = vmatpush.msra.mxu2 %v2164_v9  ;;  %v2181_v56 = vld [vmem:[%s6672_s10 + $0x190] sm:$0xff] }
 0x31f   : > { %v2159_v49 = vld [vmem:[%s6672_s10 + $0xe0] sm:$0xff]  ;;  %2296 = vmatpush.msra.mxu1 %v2227_v19  ;;  %v2160_v50 = vld [vmem:[%s6672_s10 + $0xe8] sm:$0xff]  ;;  %2336 = vmatpush.msra.mxu3 %v2228_v51  ;;  %v2245_v61 = vld [vmem:[%s6672_s10 + $0x390] sm:$0xff] }
 0x320   : > { %v2223_v46 = vld [vmem:[%s6672_s10 + $0x2e0] sm:$0xff]  ;;  %v2224_v3 = vld [vmem:[%s6672_s10 + $0x2e8] sm:$0xff]  ;;  %2277 = vmatpush.msra.mxu0 %v2159_v49  ;;  %2317 = vmatpush.msra.mxu2 %v2160_v50  ;;  %v2182_v63 = vld [vmem:[%s6672_s10 + $0x198] sm:$0xff] }
 0x321   : > { %v2155_v42 = vld [vmem:[%s6672_s10 + $0xc0] sm:$0xff]  ;;  %2297 = vmatpush.msra.mxu1 %v2223_v46  ;;  %v2156_v10 = vld [vmem:[%s6672_s10 + $0xc8] sm:$0xff]  ;;  %2337 = vmatpush.msra.mxu3 %v2224_v3  ;;  %v2246_v0 = vld [vmem:[%s6672_s10 + $0x398] sm:$0xff] }
 0x322   : > { %v2219_v24 = vld [vmem:[%s6672_s10 + $0x2c0] sm:$0xff]  ;;  %v2220_v4 = vld [vmem:[%s6672_s10 + $0x2c8] sm:$0xff]  ;;  %2278 = vmatpush.msra.mxu0 %v2155_v42  ;;  %2318 = vmatpush.msra.mxu2 %v2156_v10  ;;  %v2177_v18 = vld [vmem:[%s6672_s10 + $0x170] sm:$0xff] }
 0x323   : > { %v2151_v58 = vld [vmem:[%s6672_s10 + $0xa0] sm:$0xff]  ;;  %2298 = vmatpush.msra.mxu1 %v2219_v24  ;;  %v2152_v22 = vld [vmem:[%s6672_s10 + $0xa8] sm:$0xff]  ;;  %2338 = vmatpush.msra.mxu3 %v2220_v4  ;;  %v2241_v23 = vld [vmem:[%s6672_s10 + $0x370] sm:$0xff] }
 0x324   : > { %v2215_v33 = vld [vmem:[%s6672_s10 + $0x2a0] sm:$0xff]  ;;  %v2216_v25 = vld [vmem:[%s6672_s10 + $0x2a8] sm:$0xff]  ;;  %2279 = vmatpush.msra.mxu0 %v2151_v58  ;;  %2319 = vmatpush.msra.mxu2 %v2152_v22  ;;  %v2178_v48 = vld [vmem:[%s6672_s10 + $0x178] sm:$0xff] }
 0x325   : > { %v2147_v52 = vld [vmem:[%s6672_s10 + $0x80] sm:$0xff]  ;;  %2299 = vmatpush.msra.mxu1 %v2215_v33  ;;  %v2148_v45 = vld [vmem:[%s6672_s10 + $0x88] sm:$0xff]  ;;  %2339 = vmatpush.msra.mxu3 %v2216_v25  ;;  %v2242_v30 = vld [vmem:[%s6672_s10 + $0x378] sm:$0xff] }
 0x326   : > { %v2211_v53 = vld [vmem:[%s6672_s10 + $0x280] sm:$0xff]  ;;  %v2212_v55 = vld [vmem:[%s6672_s10 + $0x288] sm:$0xff]  ;;  %2280 = vmatpush.msra.mxu0 %v2147_v52  ;;  %2320 = vmatpush.msra.mxu2 %v2148_v45  ;;  %v2173_v14 = vld [vmem:[%s6672_s10 + $0x150] sm:$0xff] }
 0x327   : > { %v2143_v39 = vld [vmem:[%s6672_s10 + $0x60] sm:$0xff]  ;;  %2300 = vmatpush.msra.mxu1 %v2211_v53  ;;  %v2144_v59 = vld [vmem:[%s6672_s10 + $0x68] sm:$0xff]  ;;  %2340 = vmatpush.msra.mxu3 %v2212_v55  ;;  %v2237_v6 = vld [vmem:[%s6672_s10 + $0x350] sm:$0xff] }
 0x328   : > { %v2207_v1 = vld [vmem:[%s6672_s10 + $0x260] sm:$0xff]  ;;  %v2208_v41 = vld [vmem:[%s6672_s10 + $0x268] sm:$0xff]  ;;  %2281 = vmatpush.msra.mxu0 %v2143_v39  ;;  %2321 = vmatpush.msra.mxu2 %v2144_v59  ;;  %v2174_v17 = vld [vmem:[%s6672_s10 + $0x158] sm:$0xff] }
 0x329   : > { %v2139_v62 = vld [vmem:[%s6672_s10 + $0x40] sm:$0xff]  ;;  %2301 = vmatpush.msra.mxu1 %v2207_v1  ;;  %v2140_v35 = vld [vmem:[%s6672_s10 + $0x48] sm:$0xff]  ;;  %2341 = vmatpush.msra.mxu3 %v2208_v41  ;;  %v2238_v29 = vld [vmem:[%s6672_s10 + $0x358] sm:$0xff] }
 0x32a   : > { %v2203_v37 = vld [vmem:[%s6672_s10 + $0x240] sm:$0xff]  ;;  %v2204_v28 = vld [vmem:[%s6672_s10 + $0x248] sm:$0xff]  ;;  %2282 = vmatpush.msra.mxu0 %v2139_v62  ;;  %2322 = vmatpush.msra.mxu2 %v2140_v35  ;;  %v2169_v19 = vld [vmem:[%s6672_s10 + $0x130] sm:$0xff] }
 0x32b   : > { %v2135_v38 = vld [vmem:[%s6672_s10 + $0x20] sm:$0xff]  ;;  %2302 = vmatpush.msra.mxu1 %v2203_v37  ;;  %v2136_v44 = vld [vmem:[%s6672_s10 + $0x28] sm:$0xff]  ;;  %2342 = vmatpush.msra.mxu3 %v2204_v28  ;;  %v2233_v9 = vld [vmem:[%s6672_s10 + $0x330] sm:$0xff] }
 0x32c   : > { %v2199_v43 = vld [vmem:[%s6672_s10 + $0x220] sm:$0xff]  ;;  %v2200_v26 = vld [vmem:[%s6672_s10 + $0x228] sm:$0xff]  ;;  %2283 = vmatpush.msra.mxu0 %v2135_v38  ;;  %2323 = vmatpush.msra.mxu2 %v2136_v44  ;;  %v2170_v51 = vld [vmem:[%s6672_s10 + $0x138] sm:$0xff] }
 0x32d   : > { %v2131_v2 = vld [vmem:[%s6672_s10] sm:$0xff]  ;;  %2303 = vmatpush.msra.mxu1 %v2199_v43  ;;  %v2132_v16 = vld [vmem:[%s6672_s10 + $0x8] sm:$0xff]  ;;  %2343 = vmatpush.msra.mxu3 %v2200_v26  ;;  %v2234_v49 = vld [vmem:[%s6672_s10 + $0x338] sm:$0xff] }
 0x32e   : > { %v2195_v7 = vld [vmem:[%s6672_s10 + $0x200] sm:$0xff]  ;;  %v2196_v60 = vld [vmem:[%s6672_s10 + $0x208] sm:$0xff]  ;;  %2284 = vmatpush.msra.mxu0 %v2131_v2  ;;  %2324 = vmatpush.msra.mxu2 %v2132_v16  ;;  %v2165_v46 = vld [vmem:[%s6672_s10 + $0x110] sm:$0xff] }
 0x32f   : > { %2304 = vmatpush.msra.mxu1 %v2195_v7  ;;  %2344 = vmatpush.msra.mxu3 %v2196_v60  ;;  %v2229_v50 = vld [vmem:[%s6672_s10 + $0x310] sm:$0xff]  ;;  %v2166_v3 = vld [vmem:[%s6672_s10 + $0x118] sm:$0xff] }
 0x330   : > { %2349 = vmatpush.msrb.mxu0 %v2193_v40  ;;  %2389 = vmatpush.msrb.mxu2 %v2194_v36  ;;  %v2230_v42 = vld [vmem:[%s6672_s10 + $0x318] sm:$0xff]  ;;  %v2225_v24 = vld [vmem:[%s6672_s10 + $0x2f0] sm:$0xff] }
 0x331   : > { %2369 = vmatpush.msrb.mxu1 %v2257_v5  ;;  %2409 = vmatpush.msrb.mxu3 %v2258_v57  ;;  %v2161_v10 = vld [vmem:[%s6672_s10 + $0xf0] sm:$0xff]  ;;  %v2162_v4 = vld [vmem:[%s6672_s10 + $0xf8] sm:$0xff] }
 0x332   : > { %2350 = vmatpush.msrb.mxu0 %v2189_v11  ;;  %2390 = vmatpush.msrb.mxu2 %v2190_v21  ;;  %v2226_v58 = vld [vmem:[%s6672_s10 + $0x2f8] sm:$0xff]  ;;  %v2157_v33 = vld [vmem:[%s6672_s10 + $0xd0] sm:$0xff]  ;;  %v2572_v21 = vld [vmem:[%s6671_s9 + $0x1e8] sm:$0xff] }
 0x333   : > { %2370 = vmatpush.msrb.mxu1 %v2253_v12  ;;  %2410 = vmatpush.msrb.mxu3 %v2254_v27  ;;  %v2221_v22 = vld [vmem:[%s6672_s10 + $0x2d0] sm:$0xff]  ;;  %v2158_v25 = vld [vmem:[%s6672_s10 + $0xd8] sm:$0xff]  ;;  %v2571_v12 = vld [vmem:[%s6671_s9 + $0x1e0] sm:$0xff] }
 0x334   : > { %2351 = vmatpush.msrb.mxu0 %v2185_v20  ;;  %2391 = vmatpush.msrb.mxu2 %v2186_v8  ;;  %v2222_v52 = vld [vmem:[%s6672_s10 + $0x2d8] sm:$0xff]  ;;  %v2153_v53 = vld [vmem:[%s6672_s10 + $0xb0] sm:$0xff]  ;;  %v2567_v20 = vld [vmem:[%s6671_s9 + $0x1c0] sm:$0xff] }
 0x335   : > { %2371 = vmatpush.msrb.mxu1 %v2249_v13  ;;  %2411 = vmatpush.msrb.mxu3 %v2250_v15  ;;  %v2217_v45 = vld [vmem:[%s6672_s10 + $0x2b0] sm:$0xff]  ;;  %v2154_v55 = vld [vmem:[%s6672_s10 + $0xb8] sm:$0xff]  ;;  %v2568_v13 = vld [vmem:[%s6671_s9 + $0x1c8] sm:$0xff] }
 0x336   : > { %2352 = vmatpush.msrb.mxu0 %v2181_v56  ;;  %2392 = vmatpush.msrb.mxu2 %v2182_v63  ;;  %v2218_v39 = vld [vmem:[%s6672_s10 + $0x2b8] sm:$0xff]  ;;  %v2149_v1 = vld [vmem:[%s6672_s10 + $0x90] sm:$0xff]  ;;  %v2563_v15 = vld [vmem:[%s6671_s9 + $0x1a0] sm:$0xff] }
 0x337   : > { %2372 = vmatpush.msrb.mxu1 %v2245_v61  ;;  %2412 = vmatpush.msrb.mxu3 %v2246_v0  ;;  %v2213_v59 = vld [vmem:[%s6672_s10 + $0x290] sm:$0xff]  ;;  %v2150_v41 = vld [vmem:[%s6672_s10 + $0x98] sm:$0xff]  ;;  %v2564_v56 = vld [vmem:[%s6671_s9 + $0x1a8] sm:$0xff] }
 0x338   : > { %2353 = vmatpush.msrb.mxu0 %v2177_v18  ;;  %2393 = vmatpush.msrb.mxu2 %v2178_v48  ;;  %v2214_v62 = vld [vmem:[%s6672_s10 + $0x298] sm:$0xff]  ;;  %v2145_v37 = vld [vmem:[%s6672_s10 + $0x70] sm:$0xff]  ;;  %v2559_v0 = vld [vmem:[%s6671_s9 + $0x180] sm:$0xff] }
 0x339   : > { %2373 = vmatpush.msrb.mxu1 %v2241_v23  ;;  %2413 = vmatpush.msrb.mxu3 %v2242_v30  ;;  %v2209_v35 = vld [vmem:[%s6672_s10 + $0x270] sm:$0xff]  ;;  %v2146_v28 = vld [vmem:[%s6672_s10 + $0x78] sm:$0xff]  ;;  %v2560_v18 = vld [vmem:[%s6671_s9 + $0x188] sm:$0xff] }
 0x33a   : > { %2325 = vmatmul.f32.vlgmr.msra.gmra.mxu2 %v4223_v32  ;;  %2354 = vmatpush.msrb.mxu0 %v2173_v14  ;;  %v2210_v38 = vld [vmem:[%s6672_s10 + $0x278] sm:$0xff]  ;;  %v2141_v43 = vld [vmem:[%s6672_s10 + $0x50] sm:$0xff]  ;;  %v2555_v30 = vld [vmem:[%s6671_s9 + $0x160] sm:$0xff] }
 0x33b   : > { %2374 = vmatpush.msrb.mxu1 %v2237_v6  ;;  %2394 = vmatpush.msrb.mxu2 %v2174_v17  ;;  %v2205_v44 = vld [vmem:[%s6672_s10 + $0x250] sm:$0xff]  ;;  %v2142_v26 = vld [vmem:[%s6672_s10 + $0x58] sm:$0xff]  ;;  %v2556_v14 = vld [vmem:[%s6671_s9 + $0x168] sm:$0xff] }
 0x33c   : > { %2414 = vmatpush.msrb.mxu3 %v2238_v29  ;;  %2355 = vmatpush.msrb.mxu0 %v2169_v19  ;;  %v2206_v2 = vld [vmem:[%s6672_s10 + $0x258] sm:$0xff]  ;;  %v2137_v7 = vld [vmem:[%s6672_s10 + $0x30] sm:$0xff]  ;;  %v2551_v29 = vld [vmem:[%s6671_s9 + $0x140] sm:$0xff] }
 0x33d   : > { %2345 = vmatmul.f32.vlgmr.msra.gmra.mxu3 %v4215_v31  ;;  %2375 = vmatpush.msrb.mxu1 %v2233_v9  ;;  %v2201_v16 = vld [vmem:[%s6672_s10 + $0x230] sm:$0xff]  ;;  %v2138_v60 = vld [vmem:[%s6672_s10 + $0x38] sm:$0xff]  ;;  %v2552_v19 = vld [vmem:[%s6671_s9 + $0x148] sm:$0xff] }
 0x33e   : > { %2395 = vmatpush.msrb.mxu2 %v2170_v51  ;;  %2415 = vmatpush.msrb.mxu3 %v2234_v49  ;;  %v2202_v40 = vld [vmem:[%s6672_s10 + $0x238] sm:$0xff]  ;;  %v2133_v5 = vld [vmem:[%s6672_s10 + $0x10] sm:$0xff]  ;;  %v2547_v49 = vld [vmem:[%s6671_s9 + $0x120] sm:$0xff] }
 0x33f   : > { %2356 = vmatpush.msrb.mxu0 %v2165_v46  ;;  %2376 = vmatpush.msrb.mxu1 %v2229_v50  ;;  %v2197_v36 = vld [vmem:[%s6672_s10 + $0x210] sm:$0xff]  ;;  %v2134_v57 = vld [vmem:[%s6672_s10 + $0x18] sm:$0xff]  ;;  %v2548_v46 = vld [vmem:[%s6671_s9 + $0x128] sm:$0xff] }
 0x340   : > { %2396 = vmatpush.msrb.mxu2 %v2166_v3  ;;  %2416 = vmatpush.msrb.mxu3 %v2230_v42  ;;  %v2198_v11 = vld [vmem:[%s6672_s10 + $0x218] sm:$0xff]  ;;  %v2573_v63 = vld [vmem:[%s6671_s9 + $0x1f0] sm:$0xff]  ;;  %v2543_v42 = vld [vmem:[%s6671_s9 + $0x100] sm:$0xff] }
 0x341   : > { %2285 = vmatmul.f32.vlgmr.msra.gmra.mxu0 %v4223_v32  ;;  %2377 = vmatpush.msrb.mxu1 %v2225_v24  ;;  %v2574_v27 = vld [vmem:[%s6671_s9 + $0x1f8] sm:$0xff]  ;;  %v2569_v48 = vld [vmem:[%s6671_s9 + $0x1d0] sm:$0xff]  ;;  %v2544_v24 = vld [vmem:[%s6671_s9 + $0x108] sm:$0xff] }
 0x342   : > { %2357 = vmatpush.msrb.mxu0 %v2161_v10  ;;  %2397 = vmatpush.msrb.mxu2 %v2162_v4  ;;  %v2570_v8 = vld [vmem:[%s6671_s9 + $0x1d8] sm:$0xff]  ;;  %v2565_v17 = vld [vmem:[%s6671_s9 + $0x1b0] sm:$0xff] }
 0x343   : > { %2417 = vmatpush.msrb.mxu3 %v2226_v58  ;;  %2305 = vmatmul.f32.vlgmr.msra.gmra.mxu1 %v4215_v31  ;;  %v2566_v61 = vld [vmem:[%s6671_s9 + $0x1b8] sm:$0xff]  ;;  %v2561_v51 = vld [vmem:[%s6671_s9 + $0x190] sm:$0xff]  ;;  %v2539_v58 = vld [vmem:[%s6671_s9 + $0xe0] sm:$0xff] }
 0x344   : > { %2358 = vmatpush.msrb.mxu0 %v2157_v33  ;;  %2378 = vmatpush.msrb.mxu1 %v2221_v22  ;;  %v2562_v23 = vld [vmem:[%s6671_s9 + $0x198] sm:$0xff]  ;;  %v2557_v3 = vld [vmem:[%s6671_s9 + $0x170] sm:$0xff]  ;;  %v2540_v33 = vld [vmem:[%s6671_s9 + $0xe8] sm:$0xff] }
 0x345   : > { %2398 = vmatpush.msrb.mxu2 %v2158_v25  ;;  %2418 = vmatpush.msrb.mxu3 %v2222_v52  ;;  %v2558_v6 = vld [vmem:[%s6671_s9 + $0x178] sm:$0xff]  ;;  %v2553_v4 = vld [vmem:[%s6671_s9 + $0x150] sm:$0xff]  ;;  %v2492_v52 = vstv %s3823_s3 }
 0x346   : > { %2359 = vmatpush.msrb.mxu0 %v2153_v53  ;;  %2379 = vmatpush.msrb.mxu1 %v2217_v45  ;;  %v2554_v9 = vld [vmem:[%s6671_s9 + $0x158] sm:$0xff]  ;;  %v2549_v25 = vld [vmem:[%s6671_s9 + $0x130] sm:$0xff]  ;;  %v2535_v53 = vld [vmem:[%s6671_s9 + $0xc0] sm:$0xff]  ;;  %vm2493_vm7 = vcmp.gt.s32.totalorder %v5203_v34, %v2492_v52 }
 0x347   : > { %2399 = vmatpush.msrb.mxu2 %v2154_v55  ;;  %2419 = vmatpush.msrb.mxu3 %v2218_v39  ;;  %v2550_v50 = vld [vmem:[%s6671_s9 + $0x138] sm:$0xff]  ;;  %v2536_v45 = vld [vmem:[%s6671_s9 + $0xc8] sm:$0xff]  ;;  %v2545_v39 = vld [vmem:[%s6671_s9 + $0x110] sm:$0xff] }
 0x348   : > { %2360 = vmatpush.msrb.mxu0 %v2149_v1  ;;  %2380 = vmatpush.msrb.mxu1 %v2213_v59  ;;  %v2546_v10 = vld [vmem:[%s6671_s9 + $0x118] sm:$0xff]  ;;  %v2531_v1 = vld [vmem:[%s6671_s9 + $0xa0] sm:$0xff]  ;;  %v2532_v59 = vld [vmem:[%s6671_s9 + $0xa8] sm:$0xff] }
 0x349   : > { %2400 = vmatpush.msrb.mxu2 %v2150_v41  ;;  %2420 = vmatpush.msrb.mxu3 %v2214_v62  ;;  %v2542_v22 = vld [vmem:[%s6671_s9 + $0xf8] sm:$0xff]  ;;  %v2527_v62 = vld [vmem:[%s6671_s9 + $0x80] sm:$0xff] }
 0x34a   : > { %2361 = vmatpush.msrb.mxu0 %v2145_v37  ;;  %2381 = vmatpush.msrb.mxu1 %v2209_v35  ;;  %v2538_v55 = vld [vmem:[%s6671_s9 + $0xd8] sm:$0xff]  ;;  %v2528_v37 = vld [vmem:[%s6671_s9 + $0x88] sm:$0xff] }
 0x34b   : > { %2401 = vmatpush.msrb.mxu2 %v2146_v28  ;;  %2421 = vmatpush.msrb.mxu3 %v2210_v38  ;;  %v2534_v41 = vld [vmem:[%s6671_s9 + $0xb8] sm:$0xff]  ;;  %v4244_v28 = vmov 0  }
 0x34c   : > { %2362 = vmatpush.msrb.mxu0 %v2141_v43  ;;  %2382 = vmatpush.msrb.mxu1 %v2205_v44  ;;  %v2530_v35 = vld [vmem:[%s6671_s9 + $0x98] sm:$0xff]  ;;  %v2494_v38 = vsel %vm2493_vm7, 1, %v4244_v28  ;;  %v2523_v43 = vld [vmem:[%s6671_s9 + $0x60] sm:$0xff]  ;;  %v2524_v44 = vld [vmem:[%s6671_s9 + $0x68] sm:$0xff] }
 0x34d   : > { %2402 = vmatpush.msrb.mxu2 %v2142_v26  ;;  %2422 = vmatpush.msrb.mxu3 %v2206_v2  ;;  %v2526_v26 = vld [vmem:[%s6671_s9 + $0x78] sm:$0xff]  ;;  %v2541_v2 = vld [vmem:[%s6671_s9 + $0xf0] sm:$0xff] }
 0x34e   : > { %2363 = vmatpush.msrb.mxu0 %v2137_v7  ;;  %2383 = vmatpush.msrb.mxu1 %v2201_v16  ;;  %v2519_v7 = vld [vmem:[%s6671_s9 + $0x40] sm:$0xff]  ;;  %v2520_v16 = vld [vmem:[%s6671_s9 + $0x48] sm:$0xff] }
 0x34f   : > { %2403 = vmatpush.msrb.mxu2 %v2138_v60  ;;  %2423 = vmatpush.msrb.mxu3 %v2202_v40  ;;  %v2522_v60 = vld [vmem:[%s6671_s9 + $0x58] sm:$0xff]  ;;  %v2537_v40 = vld [vmem:[%s6671_s9 + $0xd0] sm:$0xff] }
 0x350   : > { %2364 = vmatpush.msrb.mxu0 %v2133_v5  ;;  %2384 = vmatpush.msrb.mxu1 %v2197_v36  ;;  %v2515_v5 = vld [vmem:[%s6671_s9 + $0x20] sm:$0xff]  ;;  %v2516_v36 = vld [vmem:[%s6671_s9 + $0x28] sm:$0xff] }
 0x351   : > { %2404 = vmatpush.msrb.mxu2 %v2134_v57  ;;  %2424 = vmatpush.msrb.mxu3 %v2198_v11  ;;  %v2518_v57 = vld [vmem:[%s6671_s9 + $0x38] sm:$0xff]  ;;  %v2533_v11 = vld [vmem:[%s6671_s9 + $0xb0] sm:$0xff] }
 0x352   : > { %2405 = vmatmul.f32.vlgmr.msrb.gmra.mxu2 %v4223_v32  ;;  %2575 = vmatpush.msra.mxu0 %v2571_v12  ;;  %v2511_v12 = vld [vmem:[%s6671_s9] sm:$0xff] }
 0x353   : > { %2595 = vmatpush.msra.mxu1 %v2572_v21  ;;  %2635 = vmatpush.msra.mxu3 %v2574_v27  ;;  %v2512_v21 = vld [vmem:[%s6671_s9 + $0x8] sm:$0xff]  ;;  %v2514_v27 = vld [vmem:[%s6671_s9 + $0x18] sm:$0xff] }
 0x354   : > { %2425 = vmatmul.f32.vlgmr.msrb.gmra.mxu3 %v4215_v31  ;;  %2576 = vmatpush.msra.mxu0 %v2567_v20  ;;  %v2529_v20 = vld [vmem:[%s6671_s9 + $0x90] sm:$0xff] }
 0x355   : > { %2596 = vmatpush.msra.mxu1 %v2568_v13  ;;  %2636 = vmatpush.msra.mxu3 %v2570_v8  ;;  %v2525_v13 = vld [vmem:[%s6671_s9 + $0x70] sm:$0xff] }
 0x356   : > { %2577 = vmatpush.msra.mxu0 %v2563_v15  ;;  %2385 = vmatmul.f32.vlgmr.msrb.gmra.mxu1 %v4215_v31  ;;  %v2521_v8 = vld [vmem:[%s6671_s9 + $0x50] sm:$0xff] }
 0x357   : > { %2597 = vmatpush.msra.mxu1 %v2564_v56  ;;  %2637 = vmatpush.msra.mxu3 %v2566_v61  ;;  %v2517_v15 = vld [vmem:[%s6671_s9 + $0x30] sm:$0xff]  ;;  %v2259_v61 = vld [vmem:[%s6673_s11] sm:$0xf] }
 0x358   : > { %2365 = vmatmul.f32.vlgmr.msrb.gmra.mxu0 %v4223_v32  ;;  %2615 = vmatpush.msra.mxu2 %v2573_v63  ;;  %v2513_v56 = vld [vmem:[%s6671_s9 + $0x10] sm:$0xff]  ;;  %v2262_v63 = vperm.slane %v2259_v61, 1 }
 0x359   : > { %2578 = vmatpush.msra.mxu0 %v2559_v0  ;;  %2598 = vmatpush.msra.mxu1 %v2560_v18  ;;  %v2261_v0 = vperm.slane %v2259_v61, 0 }
 0x35a   : > { %2638 = vmatpush.msra.mxu3 %v2562_v23  ;;  %2616 = vmatpush.msra.mxu2 %v2569_v48 }
 0x35b   : > { %2579 = vmatpush.msra.mxu0 %v2555_v30  ;;  %2599 = vmatpush.msra.mxu1 %v2556_v14 }
 0x35c   : > { %2639 = vmatpush.msra.mxu3 %v2558_v6  ;;  %2617 = vmatpush.msra.mxu2 %v2565_v17 }
 0x35d   : > { %2580 = vmatpush.msra.mxu0 %v2551_v29  ;;  %2600 = vmatpush.msra.mxu1 %v2552_v19 }
 0x35e   : > { %2640 = vmatpush.msra.mxu3 %v2554_v9  ;;  %2618 = vmatpush.msra.mxu2 %v2561_v51 }
 0x35f   : > { %2581 = vmatpush.msra.mxu0 %v2547_v49  ;;  %2601 = vmatpush.msra.mxu1 %v2548_v46 }
 0x360   : > { %2641 = vmatpush.msra.mxu3 %v2550_v50  ;;  %2619 = vmatpush.msra.mxu2 %v2557_v3  ;;  %v2263_v50 = vperm.slane %v2259_v61, 2  ;;  %v2264_v3 = vperm.slane %v2259_v61, 3 }
 0x361   : > { %2582 = vmatpush.msra.mxu0 %v2543_v42  ;;  %2602 = vmatpush.msra.mxu1 %v2544_v24 }
 0x362   : > { %2642 = vmatpush.msra.mxu3 %v2546_v10  ;;  %2620 = vmatpush.msra.mxu2 %v2553_v4 }
 0x363   : > { %2583 = vmatpush.msra.mxu0 %v2539_v58  ;;  %2603 = vmatpush.msra.mxu1 %v2540_v33 }
 0x364   : > { %2643 = vmatpush.msra.mxu3 %v2542_v22  ;;  %2621 = vmatpush.msra.mxu2 %v2549_v25 }
 0x365   : > { %2584 = vmatpush.msra.mxu0 %v2535_v53  ;;  %2604 = vmatpush.msra.mxu1 %v2536_v45 }
 0x366   : > { %2644 = vmatpush.msra.mxu3 %v2538_v55  ;;  %2622 = vmatpush.msra.mxu2 %v2545_v39 }
 0x367   : > { %2585 = vmatpush.msra.mxu0 %v2531_v1  ;;  %2605 = vmatpush.msra.mxu1 %v2532_v59 }
 0x368   : > { %2645 = vmatpush.msra.mxu3 %v2534_v41  ;;  %4105 = vset.pattern.permute.xlu0 %v4244_v28 }
 0x369   : > { %2586 = vmatpush.msra.mxu0 %v2527_v62  ;;  %2606 = vmatpush.msra.mxu1 %v2528_v37 }
 0x36a   : > { %2646 = vmatpush.msra.mxu3 %v2530_v35  ;;  %2496 = vperm.xlu0 %4105, %v2494_v38  }
 0x36b   : > { %2587 = vmatpush.msra.mxu0 %v2523_v43  ;;  %2607 = vmatpush.msra.mxu1 %v2524_v44 }
 0x36c   : > { %2647 = vmatpush.msra.mxu3 %v2526_v26  ;;  %2623 = vmatpush.msra.mxu2 %v2541_v2 }
 0x36d   : > { %2588 = vmatpush.msra.mxu0 %v2519_v7  ;;  %2608 = vmatpush.msra.mxu1 %v2520_v16 }
 0x36e   : > { %2648 = vmatpush.msra.mxu3 %v2522_v60  ;;  %2624 = vmatpush.msra.mxu2 %v2537_v40 }
 0x36f   : > { %2589 = vmatpush.msra.mxu0 %v2515_v5  ;;  %2609 = vmatpush.msra.mxu1 %v2516_v36 }
 0x370   : > { %2649 = vmatpush.msra.mxu3 %v2518_v57  ;;  %2625 = vmatpush.msra.mxu2 %v2533_v11 }
 0x371   : > { %2590 = vmatpush.msra.mxu0 %v2511_v12  ;;  %2610 = vmatpush.msra.mxu1 %v2512_v21 }
 0x372   : > { %2650 = vmatpush.msra.mxu3 %v2514_v27  ;;  %2591 = vmatmul.f32.vlgmr.msra.gmra.mxu0 %v4223_v32 }
 0x373   : > { %2611 = vmatmul.f32.vlgmr.msra.gmra.mxu1 %v4223_v32  ;;  %2651 = vmatmul.f32.vlgmr.msra.gmra.mxu3 %v4223_v32 }
 0x374   : > { %2626 = vmatpush.msra.mxu2 %v2529_v20 }
 0x376   : > { %2627 = vmatpush.msra.mxu2 %v2525_v13 }
 0x378   : > { %2628 = vmatpush.msra.mxu2 %v2521_v8 }
 0x37a   : > { %2629 = vmatpush.msra.mxu2 %v2517_v15 }
 0x37c   : > { %2630 = vmatpush.msra.mxu2 %v2513_v56  ;;  %v2507_v56 = vld [vmem:[%s6167_s24] sm:$0xff] }
 0x37d   : > { %2631 = vmatmul.f32.vlgmr.msra.gmra.mxu2 %v4223_v32 }
 0x3bd   : > { %v2326_v18 = vpop.f32.mrf.mxu2 }
 0x3be   : > { %v2286_v23 = vpop.f32.mrf.mxu0  ;;  %v2327_v48 = vadd.f32 %v2326_v18, %v2262_v63 }
 0x3bf   : > { %v2287_v30 = vadd.f32 %v2286_v23, %v2261_v0  ;;  %v2508_v0 = vld [vmem:[%s6167_s24 + $0x8] sm:$0xff] }
 0x3c0   : > { %v2306_v14 = vpop.f32.mrf.mxu1  ;;  %v2346_v6 = vpop.f32.mrf.mxu3 }
 0x3c1   : > { %v2307_v17 = vadd.f32 %v2306_v14, %v2287_v30  ;;  %v2347_v29 = vadd.f32 %v2346_v6, %v2327_v48 }
 0x3c3   : > { %v3824_v19 = vmul.f32 -1.442695, %v2307_v17  ;;  %v3825_v9 = vmul.f32 -1.442695, %v2347_v29 }
 0x3c5   : > { %4106 = vpow2.f32 %v3824_v19 }
 0x3c6   : > { %4108 = vpow2.f32 %v3825_v9  ;;  %v2510_v9 = vld [vmem:[%s6167_s24 + $0x18] sm:$0xff] }
 0x3cb   : > { %v4107_v51 = vpop.eup %4106 }
 0x3cc   : > { %v4109_v32 = vpop.eup %4108  ;;  %v2432_v49 = vadd.f32 1.0, %v4107_v51 }
 0x3cd   : > { %v2451_v46 = vadd.f32 1.0, %v4109_v32 }
 0x3ce   : > { %4110 = vrcp.f32 %v2432_v49  ;;  %vm2438_vm8 = vweird.f32 %v2432_v49  ;;  %v2442_v22 = vand.u32 2147483647, %v2432_v49  ;;  %v2444_v25 = vand.u32 2147483648, %v2432_v49 }
 0x3cf   : > { %4112 = vrcp.f32 %v2451_v46  ;;  %vm2457_vm9 = vweird.f32 %v2451_v46  ;;  %v2461_v1 = vand.u32 2147483647, %v2451_v46  ;;  %v2463_v59 = vand.u32 2147483648, %v2451_v46 }
 0x3d0   : > { %v2445_v28 = vor.u32 1.1754944e-38, %v2444_v25  ;;  %vm2443_vm13 = vcmp.eq.f32.partialorder %v2442_v22, 8.507059e+37 }
 0x3d1   : > { %v2464_v26 = vor.u32 1.1754944e-38, %v2463_v59  ;;  %vm2462_vm15 = vcmp.eq.f32.partialorder %v2461_v1, 8.507059e+37 }
 0x3d3   : > { %v2386_v24 = vpop.f32.mrf.mxu1 }
 0x3d4   : > { %v4111_v42 = vpop.eup %4110 }
 0x3d5   : > { %v4113_v10 = vpop.eup %4112  ;;  %v2434_v4 = vmul.f32 %v4111_v42, %v2432_v49  ;;  %v2366_v58 = vpop.f32.mrf.mxu0  ;;  %vm2439_vm10 = vweird.f32 %v4111_v42 }
 0x3d6   : > { %v2406_v33 = vpop.f32.mrf.mxu2  ;;  %v2453_v52 = vmul.f32 %v4113_v10, %v2451_v46  ;;  %v2367_v53 = vadd.f32 %v2366_v58, %v2263_v50  ;;  %vm2458_vm11 = vweird.f32 %v4113_v10  ;;  %vm2440_vm12 = vmor %vm2438_vm8, %vm2439_vm10 }
 0x3d7   : > { %v2407_v45 = vadd.f32 %v2406_v33, %v2264_v3  ;;  %v2435_v55 = vsub.f32 1.0, %v2434_v4  ;;  %v2426_v39 = vpop.f32.mrf.mxu3  ;;  %vm2459_vm14 = vmor %vm2457_vm9, %vm2458_vm11  ;;  %v2509_v33 = vld [vmem:[%s6167_s24 + $0x10] sm:$0xff] }
 0x3d8   : > { %v2454_v41 = vsub.f32 1.0, %v2453_v52  ;;  %v2387_v62 = vadd.f32 %v2386_v24, %v2367_v53 }
 0x3d9   : > { %v2427_v37 = vadd.f32 %v2426_v39, %v2407_v45  ;;  %v2436_v35 = vmul.f32 %v4111_v42, %v2435_v55 }
 0x3da   : > { %4114 = vtanh.f32 %v2387_v62  ;;  %v2455_v43 = vmul.f32 %v4113_v10, %v2454_v41 }
 0x3db   : > { %v3826_v38 = vmul.f32 -1.442695, %v2427_v37  ;;  %v2437_v44 = vadd.f32 %v4111_v42, %v2436_v35 }
 0x3dc   : > { %v2456_v2 = vadd.f32 %v4113_v10, %v2455_v43  ;;  %v2497_v36 = vpop.permute.xlu0 %2496 }
 0x3dd   : > { %4116 = vpow2.f32 %v3826_v38  ;;  %v2441_v7 = vsel %vm2440_vm12, %v4111_v42, %v2437_v44  ;;  %vm2498_vm0 = vcmp.eq.s32.totalorder %v2497_v36, 1 }
 0x3de   : > { %v2446_v16 = vsel %vm2443_vm13, %v2445_v28, %v2441_v7  ;;  %v2460_v60 = vsel %vm2459_vm14, %v4113_v10, %v2456_v2 }
 0x3df   : > { %v2465_v40 = vsel %vm2462_vm15, %v2464_v26, %v2460_v60 }
 0x3e0   : > { %v4115_v5 = vpop.eup %4114  ;;  %v2487_v57 = vmul.f32 %v4211_v54, %v2465_v40 }
 0x3e1   : > { %v2488_v11 = vmul.f32 %v4115_v5, %v2446_v16 }
 0x3e3   : > { %v4117_v12 = vpop.eup %4116  ;;  %v2489_v27 = vadd.f32 %v2488_v11, %v2487_v57 }
 0x3e4   : > { %v2471_v21 = vadd.f32 1.0, %v4117_v12 }
 0x3e5   : > { %v6165_v54 = vsel %vm2498_vm0, %v2489_v27, %v4211_v54  }
 0x3e6   : > { %4118 = vrcp.f32 %v2471_v21  ;;  %v6678_v20 = vmov %v6165_v54  ;;  %v2483_v15 = vand.u32 2147483648, %v2471_v21  ;;  %vm2477_vm1 = vweird.f32 %v2471_v21 }
 0x3e7   : > { %v2481_v63 = vand.u32 2147483647, %v2471_v21  ;;  %4120 = vtanh.f32 %v2489_v27 }
 0x3e8   : > { %v2484_v30 = vor.u32 1.1754944e-38, %v2483_v15 }
 0x3e9   : > { %vm2482_vm4 = vcmp.eq.f32.partialorder %v2481_v63, 8.507059e+37 }
 0x3ec   : > { %v4119_v13 = vpop.eup %4118 }
 0x3ed   : > { %v2473_v8 = vmul.f32 %v4119_v13, %v2471_v21  ;;  %vm2478_vm2 = vweird.f32 %v4119_v13  ;;  %v4121_v51 = vpop.eup %4120 }
 0x3ee   : > { %vm2479_vm3 = vmor %vm2477_vm1, %vm2478_vm2 }
 0x3ef   : > { %v2474_v61 = vsub.f32 1.0, %v2473_v8  ;;  %v2592_v18 = vpop.f32.mrf.mxu0 }
 0x3f0   : > { %v2655_v48 = vadd.f32 %v2592_v18, %v2507_v56  ;;  %v2612_v54 = vpop.f32.mrf.mxu1 }
 0x3f1   : > { %v2475_v23 = vmul.f32 %v4119_v13, %v2474_v61  ;;  %v2656_v14 = vadd.f32 %v2612_v54, %v2508_v0  ;;  %v6680_v54 = vmov %v6678_v20 }
 0x3f2   : > { %v3830_v17 = vmul.f32 -1.442695, %v2655_v48 }
 0x3f3   : > { %v2476_v6 = vadd.f32 %v4119_v13, %v2475_v23  ;;  %v3831_v29 = vmul.f32 -1.442695, %v2656_v14 }
 0x3f4   : > { %4122 = vpow2.f32 %v3830_v17 }
 0x3f5   : > { %v2480_v19 = vsel %vm2479_vm3, %v4119_v13, %v2476_v6  ;;  %4124 = vpow2.f32 %v3831_v29 }
 0x3f6   : > { %v2485_v32 = vsel %vm2482_vm4, %v2484_v30, %v2480_v19  ;;  %v2652_v46 = vpop.f32.mrf.mxu3 }
 0x3f7   : > { %v2491_v49 = vmul.f32 %v4121_v51, %v2485_v32  ;;  %v2658_v50 = vadd.f32 %v2652_v46, %v2510_v9 }
 0x3f9   : > { %v6174_v31 = vsel %vm2498_vm0, %v2491_v49, %v4215_v31   ;;  %v3832_v42 = vmul.f32 -1.442695, %v2658_v50 }
 0x3fa   : > { %v6679_v3 = vmov %v6174_v31  ;;  %v4123_v24 = vpop.eup %4122 }
 0x3fb   : > { %v4125_v10 = vpop.eup %4124  ;;  %v2662_v4 = vadd.f32 1.0, %v4123_v24  ;;  %4126 = vpow2.f32 %v3832_v42 }
 0x3fc   : > { %v2681_v58 = vadd.f32 1.0, %v4125_v10 }
 0x3fd   : > { %4128 = vrcp.f32 %v2662_v4  ;;  %v2674_v41 = vand.u32 2147483648, %v2662_v4  ;;  %v2672_v35 = vand.u32 2147483647, %v2662_v4  ;;  %vm2668_vm7 = vweird.f32 %v2662_v4 }
 0x3fe   : > { %4130 = vrcp.f32 %v2681_v58  ;;  %v2693_v62 = vand.u32 2147483648, %v2681_v58  ;;  %v2691_v38 = vand.u32 2147483647, %v2681_v58  ;;  %vm2687_vm8 = vweird.f32 %v2681_v58 }
 0x3ff   : > { %v2675_v7 = vor.u32 1.1754944e-38, %v2674_v41  ;;  %vm2673_vm11 = vcmp.eq.f32.partialorder %v2672_v35, 8.507059e+37 }
 0x400   : > { %v2632_v22 = vpop.f32.mrf.mxu2  ;;  %v2694_v60 = vor.u32 1.1754944e-38, %v2693_v62  ;;  %vm2692_vm12 = vcmp.eq.f32.partialorder %v2691_v38, 8.507059e+37  ;;  %v6683_v38 = vmov (%p2122_p1), %v6678_v20 }
 0x401   : > { %v4127_v25 = vpop.eup %4126  ;;  %v2657_v52 = vadd.f32 %v2632_v22, %v2509_v33 }
 0x402   : > { %v2701_v53 = vadd.f32 1.0, %v4127_v25 }
 0x403   : > { %v4129_v45 = vpop.eup %4128 }
 0x404   : > { %v4131_v55 = vpop.eup %4130  ;;  %v2664_v39 = vmul.f32 %v4129_v45, %v2662_v4  ;;  %4132 = vrcp.f32 %v2701_v53  ;;  %vm2669_vm5 = vweird.f32 %v4129_v45  ;;  %v2713_v8 = vand.u32 2147483648, %v2701_v53 }
 0x405   : > { %v2683_v1 = vmul.f32 %v4131_v55, %v2681_v58  ;;  %4134 = vtanh.f32 %v2657_v52  ;;  %vm2688_vm6 = vweird.f32 %v4131_v55  ;;  %vm2670_vm9 = vmor %vm2668_vm7, %vm2669_vm5  ;;  %vm2707_vm14 = vweird.f32 %v2701_v53 }
 0x406   : > { %v2665_v31 = vsub.f32 1.0, %v2664_v39  ;;  %vm2689_vm10 = vmor %vm2687_vm8, %vm2688_vm6  ;;  %v2711_v15 = vand.u32 2147483647, %v2701_v53  ;;  %v2714_v61 = vor.u32 1.1754944e-38, %v2713_v8 }
 0x407   : > { %v2684_v59 = vsub.f32 1.0, %v2683_v1 }
 0x408   : > { %v2666_v37 = vmul.f32 %v4129_v45, %v2665_v31  ;;  %vm2712_vm0 = vcmp.eq.f32.partialorder %v2711_v15, 8.507059e+37  ;;  %v6681_v31 = vmov %v6679_v3 }
 0x409   : > { %v2685_v28 = vmul.f32 %v4131_v55, %v2684_v59 }
 0x40a   : > { %v4133_v43 = vpop.eup %4132  ;;  %v2667_v44 = vadd.f32 %v4129_v45, %v2666_v37 }
 0x40b   : > { %v4135_v26 = vpop.eup %4134  ;;  %v2703_v2 = vmul.f32 %v4133_v43, %v2701_v53  ;;  %v2686_v16 = vadd.f32 %v4131_v55, %v2685_v28  ;;  %vm2708_vm13 = vweird.f32 %v4133_v43 }
 0x40c   : > { %v2671_v40 = vsel %vm2670_vm9, %v4129_v45, %v2667_v44  ;;  %vm2709_vm15 = vmor %vm2707_vm14, %vm2708_vm13 }
 0x40d   : > { %v2704_v5 = vsub.f32 1.0, %v2703_v2  ;;  %v2676_v36 = vsel %vm2673_vm11, %v2675_v7, %v2671_v40  ;;  %v2690_v57 = vsel %vm2689_vm10, %v4131_v55, %v2686_v16 }
 0x40e   : > { %v2695_v11 = vsel %vm2692_vm12, %v2694_v60, %v2690_v57  ;;  %v2718_v12 = vmul.f32 %v4135_v26, %v2676_v36 }
 0x40f   : > { %v2705_v21 = vmul.f32 %v4133_v43, %v2704_v5  ;;  %v2717_v27 = vmul.f32 %v4219_v47, %v2695_v11 }
 0x411   : > { %v2719_v47 = vadd.f32 %v2718_v12, %v2717_v27   ;;  %v2706_v13 = vadd.f32 %v4133_v43, %v2705_v21 }
 0x413   : > { %4136 = vtanh.f32 %v2719_v47  ;;  %v2710_v56 = vsel %vm2709_vm15, %v4133_v43, %v2706_v13  ;;  %v6684_v43 = vmov (%p2122_p1), %v6679_v3 }
 0x414   : > { %v2715_v0 = vsel %vm2712_vm0, %v2714_v61, %v2710_v56 }
 0x418   :  { %2125 = sbr.rel (!%p2122_p1) target bundleno = 783 (0x30f), region = 94 }
 0x419   : > { %v4137_v63 = vpop.eup %4136 }
 0x41a   : > { %v2721_v18 = vmul.f32 %v4137_v63, %v2715_v0  }
 0x41c   : > { %v6682_v32 = vmov %v2721_v18  ;;  %v6685_v44 = vmov (%p2122_p1), %v2721_v18 }
 0x41d PF:  { %v2784_v47 = vld [vmem:[%s6672_s10 + $0x1e8] sm:$0xff]  ;;  %v2783_v48 = vld [vmem:[%s6672_s10 + $0x1e0] sm:$0xff]  ;;  %s3833_s27 = sadd.s32 4294967295, %s4972_s28  ;;  %v4239_v44 = vphi %v6677_v44, %v6685_v44   ;;  %v4235_v43 = vphi %v5537_v43, %v6684_v43   ;;  %v4231_v38 = vphi %v5535_v38, %v6683_v38  }
 0x41e   :  { %v2780_v20 = vld [vmem:[%s6672_s10 + $0x1c8] sm:$0xff]  ;;  %2901 = vmatpush.msra.mxu2 %v2784_v47  ;;  %2861 = vmatpush.msra.mxu0 %v2783_v48  ;;  %v2779_v14 = vld [vmem:[%s6672_s10 + $0x1c0] sm:$0xff] }
 0x41f   :  { %v2848_v23 = vld [vmem:[%s6672_s10 + $0x3e8] sm:$0xff]  ;;  %v2847_v6 = vld [vmem:[%s6672_s10 + $0x3e0] sm:$0xff] }
 0x420   :  { %2921 = vmatpush.msra.mxu3 %v2848_v23  ;;  %v2844_v54 = vld [vmem:[%s6672_s10 + $0x3c8] sm:$0xff]  ;;  %2902 = vmatpush.msra.mxu2 %v2780_v20  ;;  %v2775_v29 = vld [vmem:[%s6672_s10 + $0x1a0] sm:$0xff]  ;;  %v2786_v20 = vld [vmem:[%s6672_s10 + $0x1f8] sm:$0xff] }
 0x421   :  { %v2776_v30 = vld [vmem:[%s6672_s10 + $0x1a8] sm:$0xff]  ;;  %v2843_v19 = vld [vmem:[%s6672_s10 + $0x3c0] sm:$0xff]  ;;  %2862 = vmatpush.msra.mxu0 %v2779_v14  ;;  %2881 = vmatpush.msra.mxu1 %v2847_v6  ;;  %v2785_v14 = vld [vmem:[%s6672_s10 + $0x1f0] sm:$0xff] }
 0x422   :  { %2922 = vmatpush.msra.mxu3 %v2844_v54  ;;  %v2840_v17 = vld [vmem:[%s6672_s10 + $0x3a8] sm:$0xff]  ;;  %2903 = vmatpush.msra.mxu2 %v2776_v30  ;;  %v2771_v32 = vld [vmem:[%s6672_s10 + $0x180] sm:$0xff]  ;;  %v2850_v54 = vld [vmem:[%s6672_s10 + $0x3f8] sm:$0xff] }
 0x423   :  { %v2772_v9 = vld [vmem:[%s6672_s10 + $0x188] sm:$0xff]  ;;  %v2839_v49 = vld [vmem:[%s6672_s10 + $0x3a0] sm:$0xff]  ;;  %2863 = vmatpush.msra.mxu0 %v2775_v29  ;;  %2882 = vmatpush.msra.mxu1 %v2843_v19  ;;  %v2782_v30 = vld [vmem:[%s6672_s10 + $0x1d8] sm:$0xff] }
 0x424   :  { %v2836_v51 = vld [vmem:[%s6672_s10 + $0x388] sm:$0xff]  ;;  %2923 = vmatpush.msra.mxu3 %v2840_v17  ;;  %2904 = vmatpush.msra.mxu2 %v2772_v9  ;;  %v2767_v3 = vld [vmem:[%s6672_s10 + $0x160] sm:$0xff]  ;;  %v2846_v17 = vld [vmem:[%s6672_s10 + $0x3d8] sm:$0xff] }
 0x425   :  { %v2768_v46 = vld [vmem:[%s6672_s10 + $0x168] sm:$0xff]  ;;  %v2835_v42 = vld [vmem:[%s6672_s10 + $0x380] sm:$0xff]  ;;  %2864 = vmatpush.msra.mxu0 %v2771_v32  ;;  %2883 = vmatpush.msra.mxu1 %v2839_v49  ;;  %v2778_v29 = vld [vmem:[%s6672_s10 + $0x1b8] sm:$0xff] }
 0x426   :  { %v2832_v50 = vld [vmem:[%s6672_s10 + $0x368] sm:$0xff]  ;;  %2924 = vmatpush.msra.mxu3 %v2836_v51  ;;  %2905 = vmatpush.msra.mxu2 %v2768_v46  ;;  %v2763_v4 = vld [vmem:[%s6672_s10 + $0x140] sm:$0xff]  ;;  %v2781_v19 = vld [vmem:[%s6672_s10 + $0x1d0] sm:$0xff] }
 0x427   :  { %v2764_v24 = vld [vmem:[%s6672_s10 + $0x148] sm:$0xff]  ;;  %v2831_v58 = vld [vmem:[%s6672_s10 + $0x360] sm:$0xff]  ;;  %2865 = vmatpush.msra.mxu0 %v2767_v3  ;;  %2884 = vmatpush.msra.mxu1 %v2835_v42  ;;  %v2849_v9 = vld [vmem:[%s6672_s10 + $0x3f0] sm:$0xff] }
 0x428   :  { %v2828_v10 = vld [vmem:[%s6672_s10 + $0x348] sm:$0xff]  ;;  %2925 = vmatpush.msra.mxu3 %v2832_v50  ;;  %2906 = vmatpush.msra.mxu2 %v2764_v24  ;;  %v2759_v25 = vld [vmem:[%s6672_s10 + $0x120] sm:$0xff]  ;;  %v2842_v51 = vld [vmem:[%s6672_s10 + $0x3b8] sm:$0xff] }
 0x429   :  { %v2760_v33 = vld [vmem:[%s6672_s10 + $0x128] sm:$0xff]  ;;  %v2827_v52 = vld [vmem:[%s6672_s10 + $0x340] sm:$0xff]  ;;  %2866 = vmatpush.msra.mxu0 %v2763_v4  ;;  %2885 = vmatpush.msra.mxu1 %v2831_v58  ;;  %v2774_v32 = vld [vmem:[%s6672_s10 + $0x198] sm:$0xff] }
 0x42a   :  { %v2824_v22 = vld [vmem:[%s6672_s10 + $0x328] sm:$0xff]  ;;  %2926 = vmatpush.msra.mxu3 %v2828_v10  ;;  %2907 = vmatpush.msra.mxu2 %v2760_v33  ;;  %v2755_v55 = vld [vmem:[%s6672_s10 + $0x100] sm:$0xff]  ;;  %v2777_v49 = vld [vmem:[%s6672_s10 + $0x1b0] sm:$0xff] }
 0x42b   :  { %v2756_v53 = vld [vmem:[%s6672_s10 + $0x108] sm:$0xff]  ;;  %v2823_v39 = vld [vmem:[%s6672_s10 + $0x320] sm:$0xff]  ;;  %2867 = vmatpush.msra.mxu0 %v2759_v25  ;;  %2886 = vmatpush.msra.mxu1 %v2827_v52  ;;  %v2845_v46 = vld [vmem:[%s6672_s10 + $0x3d0] sm:$0xff] }
 0x42c   :  { %v2820_v45 = vld [vmem:[%s6672_s10 + $0x308] sm:$0xff]  ;;  %2927 = vmatpush.msra.mxu3 %v2824_v22  ;;  %2908 = vmatpush.msra.mxu2 %v2756_v53  ;;  %v2751_v59 = vld [vmem:[%s6672_s10 + $0xe0] sm:$0xff]  ;;  %v2770_v50 = vld [vmem:[%s6672_s10 + $0x178] sm:$0xff] }
 0x42d   :  { %v2752_v1 = vld [vmem:[%s6672_s10 + $0xe8] sm:$0xff]  ;;  %v2819_v41 = vld [vmem:[%s6672_s10 + $0x300] sm:$0xff]  ;;  %2868 = vmatpush.msra.mxu0 %v2755_v55  ;;  %2887 = vmatpush.msra.mxu1 %v2823_v39  ;;  %v2838_v3 = vld [vmem:[%s6672_s10 + $0x398] sm:$0xff] }
 0x42e   :  { %v2816_v31 = vld [vmem:[%s6672_s10 + $0x2e8] sm:$0xff]  ;;  %2928 = vmatpush.msra.mxu3 %v2820_v45  ;;  %2909 = vmatpush.msra.mxu2 %v2752_v1  ;;  %v2747_v35 = vld [vmem:[%s6672_s10 + $0xc0] sm:$0xff]  ;;  %v2773_v42 = vld [vmem:[%s6672_s10 + $0x190] sm:$0xff] }
 0x42f   :  { %v2748_v62 = vld [vmem:[%s6672_s10 + $0xc8] sm:$0xff]  ;;  %v2815_v28 = vld [vmem:[%s6672_s10 + $0x2e0] sm:$0xff]  ;;  %2869 = vmatpush.msra.mxu0 %v2751_v59  ;;  %2888 = vmatpush.msra.mxu1 %v2819_v41  ;;  %v2841_v24 = vld [vmem:[%s6672_s10 + $0x3b0] sm:$0xff] }
 0x430   :  { %v2812_v37 = vld [vmem:[%s6672_s10 + $0x2c8] sm:$0xff]  ;;  %2929 = vmatpush.msra.mxu3 %v2816_v31  ;;  %2910 = vmatpush.msra.mxu2 %v2748_v62  ;;  %v2743_v7 = vld [vmem:[%s6672_s10 + $0xa0] sm:$0xff]  ;;  %v2766_v10 = vld [vmem:[%s6672_s10 + $0x158] sm:$0xff] }
 0x431   :  { %v2744_v26 = vld [vmem:[%s6672_s10 + $0xa8] sm:$0xff]  ;;  %v2811_v16 = vld [vmem:[%s6672_s10 + $0x2c0] sm:$0xff]  ;;  %2870 = vmatpush.msra.mxu0 %v2747_v35  ;;  %2889 = vmatpush.msra.mxu1 %v2815_v28  ;;  %v2834_v4 = vld [vmem:[%s6672_s10 + $0x378] sm:$0xff] }
 0x432   :  { %v2808_v2 = vld [vmem:[%s6672_s10 + $0x2a8] sm:$0xff]  ;;  %2930 = vmatpush.msra.mxu3 %v2812_v37  ;;  %2911 = vmatpush.msra.mxu2 %v2744_v26  ;;  %v2739_v5 = vld [vmem:[%s6672_s10 + $0x80] sm:$0xff]  ;;  %v2769_v58 = vld [vmem:[%s6672_s10 + $0x170] sm:$0xff] }
 0x433   :  { %v2740_v60 = vld [vmem:[%s6672_s10 + $0x88] sm:$0xff]  ;;  %v2807_v36 = vld [vmem:[%s6672_s10 + $0x2a0] sm:$0xff]  ;;  %2871 = vmatpush.msra.mxu0 %v2743_v7  ;;  %2890 = vmatpush.msra.mxu1 %v2811_v16  ;;  %v2837_v33 = vld [vmem:[%s6672_s10 + $0x390] sm:$0xff] }
 0x434   :  { %v2804_v40 = vld [vmem:[%s6672_s10 + $0x288] sm:$0xff]  ;;  %2931 = vmatpush.msra.mxu3 %v2808_v2  ;;  %2912 = vmatpush.msra.mxu2 %v2740_v60  ;;  %v2735_v12 = vld [vmem:[%s6672_s10 + $0x60] sm:$0xff]  ;;  %v2762_v22 = vld [vmem:[%s6672_s10 + $0x138] sm:$0xff] }
 0x435   :  { %v2736_v57 = vld [vmem:[%s6672_s10 + $0x68] sm:$0xff]  ;;  %v2803_v21 = vld [vmem:[%s6672_s10 + $0x280] sm:$0xff]  ;;  %2872 = vmatpush.msra.mxu0 %v2739_v5  ;;  %2891 = vmatpush.msra.mxu1 %v2807_v36  ;;  %v2830_v25 = vld [vmem:[%s6672_s10 + $0x358] sm:$0xff] }
 0x436   :  { %v2800_v11 = vld [vmem:[%s6672_s10 + $0x268] sm:$0xff]  ;;  %2932 = vmatpush.msra.mxu3 %v2804_v40  ;;  %2913 = vmatpush.msra.mxu2 %v2736_v57  ;;  %v2731_v8 = vld [vmem:[%s6672_s10 + $0x40] sm:$0xff]  ;;  %v2765_v52 = vld [vmem:[%s6672_s10 + $0x150] sm:$0xff] }
 0x437   :  { %v2732_v27 = vld [vmem:[%s6672_s10 + $0x48] sm:$0xff]  ;;  %v2799_v15 = vld [vmem:[%s6672_s10 + $0x260] sm:$0xff]  ;;  %2873 = vmatpush.msra.mxu0 %v2735_v12  ;;  %2892 = vmatpush.msra.mxu1 %v2803_v21  ;;  %v2833_v53 = vld [vmem:[%s6672_s10 + $0x370] sm:$0xff] }
 0x438   :  { %v2796_v13 = vld [vmem:[%s6672_s10 + $0x248] sm:$0xff]  ;;  %2933 = vmatpush.msra.mxu3 %v2800_v11  ;;  %2914 = vmatpush.msra.mxu2 %v2732_v27  ;;  %v2727_v63 = vld [vmem:[%s6672_s10 + $0x20] sm:$0xff]  ;;  %v2758_v45 = vld [vmem:[%s6672_s10 + $0x118] sm:$0xff] }
 0x439   :  { %v2728_v56 = vld [vmem:[%s6672_s10 + $0x28] sm:$0xff]  ;;  %v2795_v0 = vld [vmem:[%s6672_s10 + $0x240] sm:$0xff]  ;;  %2874 = vmatpush.msra.mxu0 %v2731_v8  ;;  %2893 = vmatpush.msra.mxu1 %v2799_v15  ;;  %v2826_v55 = vld [vmem:[%s6672_s10 + $0x338] sm:$0xff] }
 0x43a   :  { %v2792_v61 = vld [vmem:[%s6672_s10 + $0x228] sm:$0xff]  ;;  %2934 = vmatpush.msra.mxu3 %v2796_v13  ;;  %2915 = vmatpush.msra.mxu2 %v2728_v56  ;;  %v2723_v23 = vld [vmem:[%s6672_s10] sm:$0xff]  ;;  %v2761_v39 = vld [vmem:[%s6672_s10 + $0x130] sm:$0xff] }
 0x43b   :  { %v2724_v18 = vld [vmem:[%s6672_s10 + $0x8] sm:$0xff]  ;;  %2875 = vmatpush.msra.mxu0 %v2727_v63  ;;  %2894 = vmatpush.msra.mxu1 %v2795_v0  ;;  %v2791_v48 = vld [vmem:[%s6672_s10 + $0x220] sm:$0xff]  ;;  %v2829_v1 = vld [vmem:[%s6672_s10 + $0x350] sm:$0xff] }
 0x43c   :  { %v2788_v47 = vld [vmem:[%s6672_s10 + $0x208] sm:$0xff]  ;;  %2935 = vmatpush.msra.mxu3 %v2792_v61  ;;  %2916 = vmatpush.msra.mxu2 %v2724_v18  ;;  %v2787_v6 = vld [vmem:[%s6672_s10 + $0x200] sm:$0xff]  ;;  %v2754_v31 = vld [vmem:[%s6672_s10 + $0xf8] sm:$0xff] }
 0x43d   :  { %2876 = vmatpush.msra.mxu0 %v2723_v23  ;;  %2895 = vmatpush.msra.mxu1 %v2791_v48  ;;  %v2822_v59 = vld [vmem:[%s6672_s10 + $0x318] sm:$0xff]  ;;  %v2757_v41 = vld [vmem:[%s6672_s10 + $0x110] sm:$0xff] }
 0x43e   :  { %2936 = vmatpush.msra.mxu3 %v2788_v47  ;;  %2981 = vmatpush.msrb.mxu2 %v2786_v20  ;;  %v2825_v62 = vld [vmem:[%s6672_s10 + $0x330] sm:$0xff]  ;;  %v2750_v37 = vld [vmem:[%s6672_s10 + $0xd8] sm:$0xff]  ;;  %v3084_v20 = vstv %s3833_s27 }
 0x43f   :  { %2941 = vmatpush.msrb.mxu0 %v2785_v14  ;;  %2896 = vmatpush.msra.mxu1 %v2787_v6  ;;  %v2818_v35 = vld [vmem:[%s6672_s10 + $0x2f8] sm:$0xff]  ;;  %v2753_v28 = vld [vmem:[%s6672_s10 + $0xf0] sm:$0xff]  ;;  %vm3085_vm1 = vcmp.gt.s32.totalorder %v5203_v34, %v3084_v20  ;;  %v2851_v34 = vld [vmem:[%s6673_s11] sm:$0xf] }
 0x440   :  { %3001 = vmatpush.msrb.mxu3 %v2850_v54  ;;  %2982 = vmatpush.msrb.mxu2 %v2782_v30  ;;  %v2821_v26 = vld [vmem:[%s6672_s10 + $0x310] sm:$0xff]  ;;  %v2746_v2 = vld [vmem:[%s6672_s10 + $0xb8] sm:$0xff] }
 0x441   :  { %2942 = vmatpush.msrb.mxu0 %v2781_v19  ;;  %2961 = vmatpush.msrb.mxu1 %v2849_v9  ;;  %v2814_v7 = vld [vmem:[%s6672_s10 + $0x2d8] sm:$0xff]  ;;  %v2749_v16 = vld [vmem:[%s6672_s10 + $0xd0] sm:$0xff]  ;;  %v2853_v9 = vperm.slane %v2851_v34, 0 }
 0x442   :  { %3002 = vmatpush.msrb.mxu3 %v2846_v17  ;;  %2983 = vmatpush.msrb.mxu2 %v2778_v29  ;;  %v2817_v60 = vld [vmem:[%s6672_s10 + $0x2f0] sm:$0xff]  ;;  %v2742_v40 = vld [vmem:[%s6672_s10 + $0x98] sm:$0xff]  ;;  %v4245_v29 = vmov 0  }
 0x443   :  { %2943 = vmatpush.msrb.mxu0 %v2777_v49  ;;  %2917 = vmatmul.f32.vlgmr.msra.gmra.mxu2 %v4239_v44  ;;  %v2810_v5 = vld [vmem:[%s6672_s10 + $0x2b8] sm:$0xff]  ;;  %v2745_v36 = vld [vmem:[%s6672_s10 + $0xb0] sm:$0xff]  ;;  %v3086_v19 = vsel %vm3085_vm1, 1, %v4245_v29 }
 0x444   :  { %3003 = vmatpush.msrb.mxu3 %v2842_v51  ;;  %2984 = vmatpush.msrb.mxu2 %v2774_v32  ;;  %v2813_v57 = vld [vmem:[%s6672_s10 + $0x2d0] sm:$0xff]  ;;  %v2738_v11 = vld [vmem:[%s6672_s10 + $0x78] sm:$0xff]  ;;  %v2854_v51 = vperm.slane %v2851_v34, 1 }
 0x445   :  { %2962 = vmatpush.msrb.mxu1 %v2845_v46  ;;  %2937 = vmatmul.f32.vlgmr.msra.gmra.mxu3 %v4235_v43  ;;  %v2806_v12 = vld [vmem:[%s6672_s10 + $0x298] sm:$0xff]  ;;  %v2741_v21 = vld [vmem:[%s6672_s10 + $0x90] sm:$0xff] }
 0x446   :  { %2985 = vmatpush.msrb.mxu2 %v2770_v50  ;;  %3004 = vmatpush.msrb.mxu3 %v2838_v3  ;;  %v2809_v27 = vld [vmem:[%s6672_s10 + $0x2b0] sm:$0xff]  ;;  %v2734_v13 = vld [vmem:[%s6672_s10 + $0x58] sm:$0xff] }
 0x447   :  { %2944 = vmatpush.msrb.mxu0 %v2773_v42  ;;  %2963 = vmatpush.msrb.mxu1 %v2841_v24  ;;  %v2802_v8 = vld [vmem:[%s6672_s10 + $0x278] sm:$0xff]  ;;  %v2737_v15 = vld [vmem:[%s6672_s10 + $0x70] sm:$0xff]  ;;  %v3105_v24 = vld [vmem:[%s6674_s12 + $0x68] sm:$0xff] }
 0x448   :  { %2986 = vmatpush.msrb.mxu2 %v2766_v10  ;;  %3005 = vmatpush.msrb.mxu3 %v2834_v4  ;;  %v2805_v56 = vld [vmem:[%s6672_s10 + $0x290] sm:$0xff]  ;;  %v2730_v61 = vld [vmem:[%s6672_s10 + $0x38] sm:$0xff] }
 0x449   :  { %2945 = vmatpush.msrb.mxu0 %v2769_v58  ;;  %2964 = vmatpush.msrb.mxu1 %v2837_v33  ;;  %v2798_v63 = vld [vmem:[%s6672_s10 + $0x258] sm:$0xff]  ;;  %v2733_v0 = vld [vmem:[%s6672_s10 + $0x50] sm:$0xff]  ;;  %v3104_v33 = vld [vmem:[%s6674_s12 + $0x60] sm:$0xff] }
 0x44a   :  { %2987 = vmatpush.msrb.mxu2 %v2762_v22  ;;  %3006 = vmatpush.msrb.mxu3 %v2830_v25  ;;  %v2801_v18 = vld [vmem:[%s6672_s10 + $0x270] sm:$0xff]  ;;  %v2726_v47 = vld [vmem:[%s6672_s10 + $0x18] sm:$0xff] }
 0x44b   :  { %2877 = vmatmul.f32.vlgmr.msra.gmra.mxu0 %v4239_v44  ;;  %2965 = vmatpush.msrb.mxu1 %v2833_v53  ;;  %v2794_v23 = vld [vmem:[%s6672_s10 + $0x238] sm:$0xff]  ;;  %v2729_v48 = vld [vmem:[%s6672_s10 + $0x30] sm:$0xff] }
 0x44c   :  { %2946 = vmatpush.msrb.mxu0 %v2765_v52  ;;  %2988 = vmatpush.msrb.mxu2 %v2758_v45  ;;  %v2797_v54 = vld [vmem:[%s6672_s10 + $0x250] sm:$0xff]  ;;  %v2790_v30 = vld [vmem:[%s6672_s10 + $0x218] sm:$0xff]  ;;  %v3101_v45 = vld [vmem:[%s6674_s12 + $0x48] sm:$0xff] }
 0x44d   :  { %3007 = vmatpush.msrb.mxu3 %v2826_v55  ;;  %2897 = vmatmul.f32.vlgmr.msra.gmra.mxu1 %v4235_v43  ;;  %v2725_v14 = vld [vmem:[%s6672_s10 + $0x10] sm:$0xff]  ;;  %v3107_v32 = vld [vmem:[%s6674_s12 + $0x78] sm:$0xff]  ;;  %v3100_v55 = vld [vmem:[%s6674_s12 + $0x40] sm:$0xff] }
 0x44e   :  { %2947 = vmatpush.msrb.mxu0 %v2761_v39  ;;  %2966 = vmatpush.msrb.mxu1 %v2829_v1  ;;  %v2793_v6 = vld [vmem:[%s6672_s10 + $0x230] sm:$0xff]  ;;  %v3103_v52 = vld [vmem:[%s6674_s12 + $0x58] sm:$0xff] }
 0x44f   :  { %2989 = vmatpush.msrb.mxu2 %v2754_v31  ;;  %3008 = vmatpush.msrb.mxu3 %v2822_v59  ;;  %v2789_v17 = vld [vmem:[%s6672_s10 + $0x210] sm:$0xff]  ;;  %v3099_v39 = vld [vmem:[%s6674_s12 + $0x38] sm:$0xff] }
 0x450   :  { %2948 = vmatpush.msrb.mxu0 %v2757_v41  ;;  %2967 = vmatpush.msrb.mxu1 %v2825_v62  ;;  %v3102_v53 = vld [vmem:[%s6674_s12 + $0x50] sm:$0xff] }
 0x451   :  { %2990 = vmatpush.msrb.mxu2 %v2750_v37  ;;  %3009 = vmatpush.msrb.mxu3 %v2818_v35  ;;  %v3098_v41 = vld [vmem:[%s6674_s12 + $0x30] sm:$0xff]  ;;  %v3097_v37 = vld [vmem:[%s6674_s12 + $0x28] sm:$0xff]  ;;  %v3096_v35 = vld [vmem:[%s6674_s12 + $0x20] sm:$0xff] }
 0x452   :  { %2949 = vmatpush.msrb.mxu0 %v2753_v28  ;;  %2968 = vmatpush.msrb.mxu1 %v2821_v26  ;;  %v3095_v28 = vld [vmem:[%s6674_s12 + $0x18] sm:$0xff] }
 0x453   :  { %2991 = vmatpush.msrb.mxu2 %v2746_v2  ;;  %3010 = vmatpush.msrb.mxu3 %v2814_v7  ;;  %v3094_v2 = vld [vmem:[%s6674_s12 + $0x10] sm:$0xff] }
 0x454   :  { %2950 = vmatpush.msrb.mxu0 %v2749_v16  ;;  %2969 = vmatpush.msrb.mxu1 %v2817_v60  ;;  %v2855_v60 = vperm.slane %v2851_v34, 2 }
 0x455   :  { %2992 = vmatpush.msrb.mxu2 %v2742_v40  ;;  %3011 = vmatpush.msrb.mxu3 %v2810_v5  ;;  %v2856_v40 = vperm.slane %v2851_v34, 3 }
 0x456   :  { %2951 = vmatpush.msrb.mxu0 %v2745_v36  ;;  %2970 = vmatpush.msrb.mxu1 %v2813_v57  ;;  %v3093_v57 = vld [vmem:[%s6674_s12 + $0x8] sm:$0xff] }
 0x457   :  { %2993 = vmatpush.msrb.mxu2 %v2738_v11  ;;  %3012 = vmatpush.msrb.mxu3 %v2806_v12 }
 0x458   :  { %2952 = vmatpush.msrb.mxu0 %v2741_v21  ;;  %2971 = vmatpush.msrb.mxu1 %v2809_v27 }
 0x459   :  { %2994 = vmatpush.msrb.mxu2 %v2734_v13  ;;  %3013 = vmatpush.msrb.mxu3 %v2802_v8 }
 0x45a   :  { %2953 = vmatpush.msrb.mxu0 %v2737_v15  ;;  %2972 = vmatpush.msrb.mxu1 %v2805_v56  ;;  %v3092_v56 = vld [vmem:[%s6674_s12] sm:$0xff] }
 0x45b   :  { %2995 = vmatpush.msrb.mxu2 %v2730_v61  ;;  %3014 = vmatpush.msrb.mxu3 %v2798_v63 }
 0x45c   :  { %2954 = vmatpush.msrb.mxu0 %v2733_v0  ;;  %2973 = vmatpush.msrb.mxu1 %v2801_v18 }
 0x45d   :  { %2996 = vmatpush.msrb.mxu2 %v2726_v47  ;;  %3015 = vmatpush.msrb.mxu3 %v2794_v23 }
 0x45e   :  { %2955 = vmatpush.msrb.mxu0 %v2729_v48  ;;  %2974 = vmatpush.msrb.mxu1 %v2797_v54 }
 0x45f   :  { %2997 = vmatmul.f32.vlgmr.msrb.gmra.mxu2 %v4239_v44  ;;  %3016 = vmatpush.msrb.mxu3 %v2790_v30 }
 0x460   :  { %2956 = vmatpush.msrb.mxu0 %v2725_v14  ;;  %2975 = vmatpush.msrb.mxu1 %v2793_v6 }
 0x461   :  { %3017 = vmatmul.f32.vlgmr.msrb.gmra.mxu3 %v4235_v43  ;;  %2957 = vmatmul.f32.vlgmr.msrb.gmra.mxu0 %v4239_v44  ;;  %v3106_v44 = vld [vmem:[%s6674_s12 + $0x70] sm:$0xff] }
 0x462   :  { %4138 = vset.pattern.permute.xlu0 %v4245_v29  ;;  %2976 = vmatpush.msrb.mxu1 %v2789_v17 }
 0x463   :  { %3088 = vperm.xlu0 %4138, %v3086_v19   ;;  %2977 = vmatmul.f32.vlgmr.msrb.gmra.mxu1 %v4235_v43 }
 0x464   :  { %3112 = vmatpush.msra.mxu0 %v3107_v32 }
 0x466   :  { %3113 = vmatpush.msra.mxu0 %v3106_v44 }
 0x468   :  { %3114 = vmatpush.msra.mxu0 %v3105_v24 }
 0x46a   :  { %3115 = vmatpush.msra.mxu0 %v3104_v33 }
 0x46c   :  { %3116 = vmatpush.msra.mxu0 %v3103_v52 }
 0x46e   :  { %3117 = vmatpush.msra.mxu0 %v3102_v53 }
 0x470   :  { %3118 = vmatpush.msra.mxu0 %v3101_v45 }
 0x472   :  { %3119 = vmatpush.msra.mxu0 %v3100_v55 }
 0x474   :  { %3120 = vmatpush.msra.mxu0 %v3099_v39  ;;  %v4139_v39 = vld [vmem:[%s6675_s13] ss:$0 sm:$0xff] }
 0x476   :  { %3121 = vmatpush.msra.mxu0 %v3098_v41 }
 0x478   :  { %3122 = vmatpush.msra.mxu0 %v3097_v37 }
 0x47a   :  { %3123 = vmatpush.msra.mxu0 %v3096_v35 }
 0x47c   :  { %3124 = vmatpush.msra.mxu0 %v3095_v28 }
 0x47e   :  { %3125 = vmatpush.msra.mxu0 %v3094_v2 }
 0x480   :  { %3126 = vmatpush.msra.mxu0 %v3093_v57 }
 0x482   :  { %3127 = vmatpush.msra.mxu0 %v3092_v56 }
 0x4c6   :  { %v2918_v46 = vpop.f32.mrf.mxu2 }
 0x4c7   :  { %v2919_v3 = vadd.f32 %v2918_v46, %v2854_v51 }
 0x4c8   :  { %v2878_v49 = vpop.f32.mrf.mxu0  ;;  %v2938_v42 = vpop.f32.mrf.mxu3 }
 0x4c9   :  { %v2879_v50 = vadd.f32 %v2878_v49, %v2853_v9  ;;  %v2939_v4 = vadd.f32 %v2938_v42, %v2919_v3 }
 0x4ca   :  { %v2898_v10 = vpop.f32.mrf.mxu1 }
 0x4cb   :  { %v2899_v58 = vadd.f32 %v2898_v10, %v2879_v50  ;;  %v3835_v22 = vmul.f32 -1.442695, %v2939_v4 }
 0x4cd   :  { %v3834_v25 = vmul.f32 -1.442695, %v2899_v58  ;;  %4140 = vpow2.f32 %v3835_v22 }
 0x4cf   :  { %4142 = vpow2.f32 %v3834_v25 }
 0x4d3   :  { %v4141_v1 = vpop.eup %4140 }
 0x4d4   :  { %v3043_v59 = vadd.f32 1.0, %v4141_v1 }
 0x4d5   :  { %v4143_v31 = vpop.eup %4142  ;;  %v3089_v22 = vpop.permute.xlu0 %3088 }
 0x4d6   :  { %v3024_v62 = vadd.f32 1.0, %v4143_v31  ;;  %4144 = vrcp.f32 %v3043_v59  ;;  %vm3049_vm2 = vweird.f32 %v3043_v59  ;;  %v3055_v20 = vand.u32 2147483648, %v3043_v59 }
 0x4d7   :  { %v3053_v14 = vand.u32 2147483647, %v3043_v59  ;;  %vm3090_vm14 = vcmp.eq.s32.totalorder %v3089_v22, 1 }
 0x4d8   :  { %4146 = vrcp.f32 %v3024_v62  ;;  %vm3030_vm4 = vweird.f32 %v3024_v62  ;;  %v3036_v23 = vand.u32 2147483648, %v3024_v62  ;;  %v3034_v54 = vand.u32 2147483647, %v3024_v62 }
 0x4d9   :  { %v3056_v6 = vor.u32 1.1754944e-38, %v3055_v20  ;;  %vm3054_vm9 = vcmp.eq.f32.partialorder %v3053_v14, 8.507059e+37 }
 0x4da   :  { %v3037_v17 = vor.u32 1.1754944e-38, %v3036_v23  ;;  %vm3035_vm8 = vcmp.eq.f32.partialorder %v3034_v54, 8.507059e+37 }
 0x4dc   :  { %v4145_v26 = vpop.eup %4144 }
 0x4dd   :  { %v3045_v16 = vmul.f32 %v4145_v26, %v3043_v59  ;;  %vm3050_vm3 = vweird.f32 %v4145_v26 }
 0x4de   :  { %v4147_v7 = vpop.eup %4146  ;;  %v2958_v36 = vpop.f32.mrf.mxu0  ;;  %vm3051_vm6 = vmor %vm3049_vm2, %vm3050_vm3 }
 0x4df   :  { %v3026_v5 = vmul.f32 %v4147_v7, %v3024_v62  ;;  %v3046_v12 = vsub.f32 1.0, %v3045_v16  ;;  %v2959_v27 = vadd.f32 %v2958_v36, %v2855_v60  ;;  %vm3031_vm5 = vweird.f32 %v4147_v7 }
 0x4e0   :  { %v2978_v8 = vpop.f32.mrf.mxu1  ;;  %vm3032_vm7 = vmor %vm3030_vm4, %vm3031_vm5 }
 0x4e1   :  { %v3027_v11 = vsub.f32 1.0, %v3026_v5  ;;  %v3047_v63 = vmul.f32 %v4145_v26, %v3046_v12  ;;  %v2979_v18 = vadd.f32 %v2978_v8, %v2959_v27 }
 0x4e2   :  { %v2998_v21 = vpop.f32.mrf.mxu2 }
 0x4e3   :  { %v2999_v13 = vadd.f32 %v2998_v21, %v2856_v40  ;;  %v3028_v0 = vmul.f32 %v4147_v7, %v3027_v11  ;;  %v3048_v30 = vadd.f32 %v4145_v26, %v3047_v63 }
 0x4e4   :  { %v3018_v15 = vpop.f32.mrf.mxu3 }
 0x4e5   :  { %v3019_v61 = vadd.f32 %v3018_v15, %v2999_v13  ;;  %v3029_v48 = vadd.f32 %v4147_v7, %v3028_v0  ;;  %v3052_v19 = vsel %vm3051_vm6, %v4145_v26, %v3048_v30 }
 0x4e6   :  { %v3057_v49 = vsel %vm3054_vm9, %v3056_v6, %v3052_v19 }
 0x4e7   :  { %v3836_v47 = vmul.f32 -1.442695, %v3019_v61  ;;  %v3033_v29 = vsel %vm3032_vm7, %v4147_v7, %v3029_v48  ;;  %v3079_v46 = vmul.f32 %v4231_v38, %v3057_v49 }
 0x4e8   :  { %v3038_v32 = vsel %vm3035_vm8, %v3037_v17, %v3033_v29 }
 0x4e9   :  { %4148 = vpow2.f32 %v3836_v47 }
 0x4ea   :  { %4150 = vtanh.f32 %v2979_v18 }
 0x4ef   :  { %v4149_v34 = vpop.eup %4148 }
 0x4f0   :  { %v3063_v9 = vadd.f32 1.0, %v4149_v34  ;;  %v4151_v51 = vpop.eup %4150 }
 0x4f1   :  { %v3080_v44 = vmul.f32 %v4151_v51, %v3038_v32 }
 0x4f2   :  { %4152 = vrcp.f32 %v3063_v9  ;;  %v3075_v10 = vand.u32 2147483648, %v3063_v9  ;;  %v3073_v58 = vand.u32 2147483647, %v3063_v9  ;;  %vm3069_vm11 = vweird.f32 %v3063_v9 }
 0x4f3   :  { %v3081_v3 = vadd.f32 %v3080_v44, %v3079_v46 }
 0x4f4   :  { %v3076_v25 = vor.u32 1.1754944e-38, %v3075_v10  ;;  %vm3074_vm13 = vcmp.eq.f32.partialorder %v3073_v58, 8.507059e+37 }
 0x4f5   :  { %4154 = vtanh.f32 %v3081_v3 }
 0x4f8   :  { %v4153_v50 = vpop.eup %4152 }
 0x4f9   :  { %v3065_v42 = vmul.f32 %v4153_v50, %v3063_v9  ;;  %vm3070_vm10 = vweird.f32 %v4153_v50 }
 0x4fa   :  { %vm3071_vm12 = vmor %vm3069_vm11, %vm3070_vm10 }
 0x4fb   :  { %v3066_v24 = vsub.f32 1.0, %v3065_v42  ;;  %v4155_v53 = vpop.eup %4154 }
 0x4fd   :  { %v3067_v4 = vmul.f32 %v4153_v50, %v3066_v24 }
 0x4ff   :  { %v3068_v33 = vadd.f32 %v4153_v50, %v3067_v4 }
 0x501   :  { %v3072_v52 = vsel %vm3071_vm12, %v4153_v50, %v3068_v33 }
 0x502   :  { %v3077_v45 = vsel %vm3074_vm13, %v3076_v25, %v3072_v52 }
 0x503   :  { %v3083_v38 = vmul.f32 %v4155_v53, %v3077_v45 }
 0x505   :  { %v3091_v55 = vsel %vm3090_vm14, %v3083_v38, %v4235_v43 }
 0x506   :  { %3128 = vmatmul.f32.vlgmr.msra.gmra.mxu0 %v3091_v55 }
 0x583   :  { %v3129_v1 = vpop.f32.mrf.mxu0 }
 0x584   :  { %v3130_v31 = vadd.f32 %v4139_v39, %v3129_v1 }
 0x586   :  { %3132 = vst [vmem:[%s6676_s14] sm:$0xff] %v3130_v31 }
 0x587   :  { %3137 = vsyncpa [#allocation4], 1 }

</bundles_post_ra>
